<compile_context>
chip_gen: v5e
topology: v5e:2x2
jax: 0.10.0
libtpu: 0.0.40
codegen_flags: <defaults>
</compile_context>

<pallas_src>
import jax
import jax.numpy as jnp
from jax.experimental import pallas as pl
from jax.experimental.pallas import tpu as pltpu


# ------------------------------- config ------------------------------------
class Cfg:
    num_items = 20                 # number of gradable questions
    num_nongradable_items = 15     # number of lectures / non-gradable items
    embedding_size_q = 32
    embedding_size_a = 16
    embedding_size_l = 32
    num_concepts = 8
    key_dim = 32
    value_dim = 32
    summary_dim = 32
    lambda_q = 0.3
    lambda_l = 0.6
    init_std = 0.2
    metric = "auc"                 # non-rmse -> answer embedding table (3, Ea)
    n_neighbors = 4


# --------------------------- parameter init --------------------------------
def init_params(key, cfg):
    Eq, Ea, El = cfg.embedding_size_q, cfg.embedding_size_a, cfg.embedding_size_l
    C, K, V, SD = cfg.num_concepts, cfg.key_dim, cfg.value_dim, cfg.summary_dim
    Nq, Nl = cfg.num_items, cfg.num_nongradable_items
    std = cfg.init_std

    names_shapes = [
        ("key_matrix", (C, K)),
        ("value_matrix_init", (C, V)),
        ("q_emb_table", (Nq + 1, Eq)),
        ("l_emb_table", (Nl + 1, El)),
        ("a_emb_table", (3, Ea)),
        ("w_gnn_qq", (Eq, Eq)), ("w_gnn_ql", (El, Eq)),
        ("w_gnn_lq", (Eq, El)), ("w_gnn_ll", (El, El)),
        ("w_gnn_q", (Eq, Eq)), ("b_gnn_q", (1, Eq)),
        ("w_gnn_l", (El, El)), ("b_gnn_l", (1, El)),
        ("w_mq_key", (Eq, K)), ("b_mq_key", (1, K)),
        ("w_ml_key", (El, K)), ("b_ml_key", (1, K)),
        ("w_mq_keyt", (Eq, K)), ("b_mq_keyt", (1, K)),
        ("w_ml_keyt", (El, K)), ("b_ml_keyt", (1, K)),
        ("w_eq", (Eq + Ea, V)), ("b_eq", (1, V)),
        ("w_el", (El, V)), ("b_el", (1, V)),
        ("w_aq", (Eq + Ea, V)), ("b_aq", (1, V)),
        ("w_al", (El, V)), ("b_al", (1, V)),
        ("w_tqq", (V, V)), ("w_tql", (V, V)),
        ("w_tlq", (V, V)), ("w_tll", (V, V)),
        ("w_sum", (V + Eq, SD)), ("b_sum", (1, SD)),
        ("w_out", (SD, 1)), ("b_out", (1, 1)),
        ("w_otq", (V, 1)), ("b_otq", (1, 1)),
        ("w_otl", (V, 1)), ("b_otl", (1, 1)),
    ]
    keys = jax.random.split(key, len(names_shapes))
    params = {}
    for (name, shape), k in zip(names_shapes, keys):
        params[name] = (std * jax.random.normal(k, shape)).astype(jnp.float32)

    # padding rows behave like nn.Embedding(padding_idx=...)
    params["q_emb_table"] = params["q_emb_table"].at[0].set(0.0)
    params["l_emb_table"] = params["l_emb_table"].at[0].set(0.0)
    params["a_emb_table"] = params["a_emb_table"].at[2].set(0.0)
    return params


# ----------------------------- forward pass ---------------------------------
def gmkt_forward(params, neighbors, q_data, a_data, l_data, d_data, cfg):
    B, S = q_data.shape
    Eq, Ea, El = cfg.embedding_size_q, cfg.embedding_size_a, cfg.embedding_size_l
    C, K, V, SD = cfg.num_concepts, cfg.key_dim, cfg.value_dim, cfg.summary_dim
    lam_q, lam_l = float(cfg.lambda_q), float(cfg.lambda_l)
    T_out = S - 2

    # ---------------- JAX glue: embedding / neighbor gathers ----------------
    q_tab, l_tab, a_tab = (params["q_emb_table"], params["l_emb_table"],
                           params["a_emb_table"])

    def tmajor_flat(x):  # (B, S, F) -> (S*B, F), row index = t*B + b
        return jnp.transpose(x, (1, 0, 2)).reshape(S * B, x.shape[-1])

    q_emb = tmajor_flat(q_tab[q_data])                          # (S*B, Eq)
    a_emb = tmajor_flat(a_tab[a_data])                          # (S*B, Ea)
    l_emb = tmajor_flat(l_tab[l_data])                          # (S*B, El)
    d_f = tmajor_flat(d_data.astype(jnp.float32)[..., None])    # (S*B, 1)

    def nbr_mean(nbr_table, emb_table, idx_data):
        nbr_idx = nbr_table[idx_data]                               # (B,S,Kn)
        nbr_emb = emb_table[nbr_idx]                                # (B,S,Kn,E)
        s = nbr_emb.sum(axis=2)                                     # (B,S,E)
        size = (nbr_table != 0).sum(axis=1).astype(jnp.float32)     # (rows,)
        n = size[idx_data][..., None]                               # (B,S,1)
        # Safe reciprocal: 0 neighbors -> mean 0 (matches torch.nan_to_num of
        # 0/0; the +-inf clamp cannot trigger at these magnitudes).
        inv = jnp.where(n > 0, 1.0 / n, 0.0)
        return tmajor_flat(s * inv)                                 # (S*B,E)

    qq_mean = nbr_mean(neighbors["q_q"], q_tab, q_data)
    ql_mean = nbr_mean(neighbors["q_l"], l_tab, q_data)
    lq_mean = nbr_mean(neighbors["l_q"], q_tab, l_data)
    ll_mean = nbr_mean(neighbors["l_l"], l_tab, l_data)

    key_mat_t = params["key_matrix"].T                              # (K, C)

    # Fused / split weights (host-side, one time):
    w_t4 = jnp.concatenate([params["w_tqq"], params["w_tql"],
                            params["w_tlq"], params["w_tll"]], axis=1)   # (V, 4V)
    w_t2 = jnp.concatenate([params["w_tqq"], params["w_tlq"]], axis=1)   # (V, 2V)
    w_eq_q, w_eq_a = params["w_eq"][:Eq], params["w_eq"][Eq:]
    w_aq_q, w_aq_a = params["w_aq"][:Eq], params["w_aq"][Eq:]
    w_sum_v, w_sum_q = params["w_sum"][:V], params["w_sum"][V:]
    w_out_row = params["w_out"].T                                   # (1, SD)
    w_otq_row = params["w_otq"].T                                   # (1, V)
    w_otl_row = params["w_otl"].T                                   # (1, V)

    # --------------------------- Pallas kernel ------------------------------
    def kernel(
        # sequence inputs, time-major flattened (S*B, feature)
        q_emb_ref, a_emb_ref, l_emb_ref, d_ref,
        qq_mean_ref, ql_mean_ref, lq_mean_ref, ll_mean_ref,
        # parameters
        key_t_ref, vm_init_ref,
        w_gnn_qq_ref, w_gnn_ql_ref, w_gnn_lq_ref, w_gnn_ll_ref,
        w_gnn_q_ref, b_gnn_q_ref, w_gnn_l_ref, b_gnn_l_ref,
        w_mq_key_ref, b_mq_key_ref, w_ml_key_ref, b_ml_key_ref,
        w_mq_keyt_ref, b_mq_keyt_ref, w_ml_keyt_ref, b_ml_keyt_ref,
        w_eq_q_ref, w_eq_a_ref, b_eq_ref, w_el_ref, b_el_ref,
        w_aq_q_ref, w_aq_a_ref, b_aq_ref, w_al_ref, b_al_ref,
        w_t4_ref, w_t2_ref,
        w_sum_v_ref, w_sum_q_ref, b_sum_ref,
        w_out_row_ref, b_out_ref,
        w_otq_row_ref, b_otq_ref, w_otl_row_ref, b_otl_ref,
        # outputs
        pred_ref, pred_type_ref,
    ):
        def mm(x, w):
            return jnp.dot(x, w, preferred_element_type=jnp.float32)

        def softmax_rows(x):
            m = jnp.max(x, axis=1, keepdims=True)
            e = jnp.exp(x - m)
            denom = jnp.sum(e, axis=1, keepdims=True)
            return e * pl.reciprocal(denom, approx=True)

        # =====================================================================
        # Batched, state-independent precompute over ALL S*B rows (hoisted out
        # of the serial recurrence; nothing here depends on the value matrix).
        # =====================================================================
        q_raw = q_emb_ref[...]                              # (SB, Eq)
        a_all = a_emb_ref[...]                              # (SB, Ea)
        l_raw = l_emb_ref[...]                              # (SB, El)
        d_all = d_ref[...]                                  # (SB, 1)
        key_t = key_t_ref[...]                              # (K, C)

        qq_agg = mm(qq_mean_ref[...], w_gnn_qq_ref[...])
        ql_agg = mm(ql_mean_ref[...], w_gnn_ql_ref[...])
        lq_agg = mm(lq_mean_ref[...], w_gnn_lq_ref[...])
        ll_agg = mm(ll_mean_ref[...], w_gnn_ll_ref[...])

        q_g = mm(q_raw + lam_q * qq_agg + (1.0 - lam_q) * ql_agg,
                 w_gnn_q_ref[...]) + b_gnn_q_ref[...]
        # NOTE: reference code intentionally mixes lambda_q / (1-lambda_l)
        l_g = mm(l_raw + lam_q * ll_agg + (1.0 - lam_l) * lq_agg,
                 w_gnn_l_ref[...]) + b_gnn_l_ref[...]

        one_m_d = 1.0 - d_all

        # correlation weights for write (cw) and type-read (cw_t)
        q_rk = mm(q_g, w_mq_key_ref[...]) + b_mq_key_ref[...]
        l_rk = mm(l_g, w_ml_key_ref[...]) + b_ml_key_ref[...]
        cw_all = softmax_rows(mm(one_m_d * q_rk + d_all * l_rk, key_t))      # (SB,C)

        q_rkt = mm(q_g, w_mq_keyt_ref[...]) + b_mq_keyt_ref[...]
        l_rkt = mm(l_g, w_ml_keyt_ref[...]) + b_ml_keyt_ref[...]
        cw_t_all = softmax_rows(mm(one_m_d * q_rkt + d_all * l_rkt, key_t))  # (SB,C)

        # erase / add gates (qa = concat([q_gnn, a]) via split weights)
        eq = mm(q_g, w_eq_q_ref[...]) + mm(a_all, w_eq_a_ref[...]) + b_eq_ref[...]
        el = mm(l_g, w_el_ref[...]) + b_el_ref[...]
        erase_all = jax.nn.sigmoid(one_m_d * eq + d_all * el)                # (SB,V)

        aq = mm(q_g, w_aq_q_ref[...]) + mm(a_all, w_aq_a_ref[...]) + b_aq_ref[...]
        al = mm(l_g, w_al_ref[...]) + b_al_ref[...]
        add_all = jnp.tanh(one_m_d * aq + d_all * al)                        # (SB,V)

        # next-question read key + correlation weight (RAW q embedding)
        q_rk_next = mm(q_raw, w_mq_key_ref[...]) + b_mq_key_ref[...]
        cw_next_all = softmax_rows(mm(q_rk_next, key_t))                     # (SB,C)

        # q_next contribution to the summary layer
        sumq_all = mm(q_raw, w_sum_q_ref[...]) + b_sum_ref[...]              # (SB,SD)

        # type-head: blended weight/bias per row (1-lane heads folded to VPU)
        w_type_all = d_all * w_otq_row_ref[...] + one_m_d * w_otl_row_ref[...]  # (SB,V)
        b_type_all = d_all * b_otq_ref[...] + one_m_d * b_otl_ref[...]          # (SB,1)

        w_t4 = w_t4_ref[...]          # (V, 4V): [T_QQ | T_QL | T_LQ | T_LL]
        w_t2 = w_t2_ref[...]          # (V, 2V): [T_QQ | T_LQ]
        w_sum_v = w_sum_v_ref[...]
        w_out_row = w_out_row_ref[...]
        b_out = b_out_ref[...]

        # =====================================================================
        # Recurrence over time — fully unrolled (S is static); only the T_*
        # matmuls, the memory blend and the readouts remain per step.
        # =====================================================================
        vm = jnp.zeros((B, C, V), jnp.float32) + vm_init_ref[...][None, :, :]

        preds = []
        pred_types = []
        for i in range(1, S - 1):
            r0, r1 = i * B, (i + 1) * B
            d_t = d_all[r0:r1]                       # (B,1)
            d_t1 = d_all[(i - 1) * B:r0]             # (B,1)
            d3 = d_t[:, :, None]                     # (B,1,1)
            d13 = d_t1[:, :, None]

            cw = cw_all[r0:r1]                       # (B,C)
            cw_t = cw_t_all[r0:r1]                   # (B,C)
            erase = erase_all[r0:r1]                 # (B,V)
            add_v = add_all[r0:r1]                   # (B,V)

            # ---- write: one fused (V,4V) matmul on the old memory
            vm2 = vm.reshape(B * C, V)
            t4 = mm(vm2, w_t4).reshape(B, C, 4 * V)
            t_qq = t4[:, :, 0 * V:1 * V]
            t_ql = t4[:, :, 1 * V:2 * V]
            t_lq = t4[:, :, 2 * V:3 * V]
            t_ll = t4[:, :, 3 * V:4 * V]

            erase_mul = erase[:, None, :] * cw[:, :, None]            # (B,C,V)
            mem_after_erase = (
                (1.0 - d3) * (1.0 - d13) * t_qq
                + d3 * d13 * t_ll
                + (1.0 - d13) * d3 * t_ql
                + d13 * (1.0 - d3) * t_lq
            ) * (1.0 - erase_mul)
            vm = mem_after_erase + add_v[:, None, :] * cw[:, :, None]

            # ---- type prediction (read_type on the updated memory)
            rc_t = jnp.sum(vm * cw_t[:, :, None], axis=1)             # (B,V)
            pt_logit = (jnp.sum(rc_t * w_type_all[r0:r1], axis=-1, keepdims=True)
                        + b_type_all[r0:r1])
            p_type = jax.nn.sigmoid(pt_logit)                         # (B,1)

            # ---- next-question prediction: one fused (V,2V) matmul
            cw_nx = cw_next_all[r1:r1 + B]                            # (B,C)
            sumq = sumq_all[r1:r1 + B]                                # (B,SD)
            t2 = mm(vm.reshape(B * C, V), w_t2).reshape(B, C, 2 * V)
            t_qq2 = t2[:, :, :V]
            t_lq2 = t2[:, :, V:]
            vm_r = d3 * t_qq2 + (1.0 - d3) * t_lq2
            rc_next = jnp.sum(vm_r * cw_nx[:, :, None], axis=1)       # (B,V)

            summ = jnp.tanh(mm(rc_next, w_sum_v) + sumq)              # (B,SD)
            p_logit = jnp.sum(summ * w_out_row, axis=-1, keepdims=True) + b_out
            p = jax.nn.sigmoid(p_logit)                               # (B,1)

            preds.append(p)
            pred_types.append(p_type)

        # Single lane-dense store of the whole prediction slab.
        pred_ref[...] = jnp.concatenate(preds, axis=1)                # (B,T_out)
        pred_type_ref[...] = jnp.concatenate(pred_types, axis=1)      # (B,T_out)

    args = [
        q_emb, a_emb, l_emb, d_f,
        qq_mean, ql_mean, lq_mean, ll_mean,
        key_mat_t, params["value_matrix_init"],
        params["w_gnn_qq"], params["w_gnn_ql"], params["w_gnn_lq"], params["w_gnn_ll"],
        params["w_gnn_q"], params["b_gnn_q"], params["w_gnn_l"], params["b_gnn_l"],
        params["w_mq_key"], params["b_mq_key"], params["w_ml_key"], params["b_ml_key"],
        params["w_mq_keyt"], params["b_mq_keyt"], params["w_ml_keyt"], params["b_ml_keyt"],
        w_eq_q, w_eq_a, params["b_eq"], params["w_el"], params["b_el"],
        w_aq_q, w_aq_a, params["b_aq"], params["w_al"], params["b_al"],
        w_t4, w_t2,
        w_sum_v, w_sum_q, params["b_sum"],
        w_out_row, params["b_out"],
        w_otq_row, params["b_otq"], w_otl_row, params["b_otl"],
    ]
    vmem_spec = pl.BlockSpec(memory_space=pltpu.MemorySpace.VMEM)

    batch_pred, batch_pred_type = pl.pallas_call(
        kernel,
        out_shape=(jax.ShapeDtypeStruct((B, T_out), jnp.float32),
                   jax.ShapeDtypeStruct((B, T_out), jnp.float32)),
        in_specs=[vmem_spec] * len(args),
        out_specs=(vmem_spec, vmem_spec),
    )(*args)

    # already in torch output convention: (batch, seq_len - 2)
    return batch_pred, batch_pred_type


# --------------------------------- main -------------------------------------
if __name__ == "__main__":
    cfg = Cfg()
    B, S, Kn = 2, 8, cfg.n_neighbors
    Nq, Nl = cfg.num_items, cfg.num_nongradable_items

    root = jax.random.PRNGKey(0)
    k_par, k_nb, k_dat = jax.random.split(root, 3)

    params = init_params(k_par, cfg)

    k1, k2, k3, k4 = jax.random.split(k_nb, 4)
    neighbors = {
        "q_q": jax.random.randint(k1, (Nq + 1, Kn), 0, Nq + 1, dtype=jnp.int32),
        "q_l": jax.random.randint(k2, (Nq + 1, Kn), 0, Nl + 1, dtype=jnp.int32),
        "l_q": jax.random.randint(k3, (Nl + 1, Kn), 0, Nq + 1, dtype=jnp.int32),
        "l_l": jax.random.randint(k4, (Nl + 1, Kn), 0, Nl + 1, dtype=jnp.int32),
    }

    kq, ka, kl, kd = jax.random.split(k_dat, 4)
    q_data = jax.random.randint(kq, (B, S), 1, Nq + 1, dtype=jnp.int32)
    a_data = jax.random.randint(ka, (B, S), 0, 2, dtype=jnp.int32)   # correct/incorrect
    l_data = jax.random.randint(kl, (B, S), 1, Nl + 1, dtype=jnp.int32)
    d_data = jax.random.bernoulli(kd, 0.5, (B, S)).astype(jnp.float32)

    fwd = jax.jit(lambda p, nb, q, a, l, d: gmkt_forward(p, nb, q, a, l, d, cfg))
    batch_pred, batch_pred_type = fwd(params, neighbors, q_data, a_data, l_data, d_data)
    jax.block_until_ready((batch_pred, batch_pred_type))

    assert batch_pred.shape == (B, S - 2)
    assert batch_pred_type.shape == (B, S - 2)
    assert bool(jnp.all(jnp.isfinite(batch_pred)))
    assert bool(jnp.all(jnp.isfinite(batch_pred_type)))
    print("KERNEL_OK")
</pallas_src>

<mosaic_0001>
module attributes {stable_mosaic.version = 11 : i64} {
  func.func @kernel(%arg0: memref<16x32xf32, #tpu.memory_space<vmem>>, %arg1: memref<16x16xf32, #tpu.memory_space<vmem>>, %arg2: memref<16x32xf32, #tpu.memory_space<vmem>>, %arg3: memref<16x1xf32, #tpu.memory_space<vmem>>, %arg4: memref<16x32xf32, #tpu.memory_space<vmem>>, %arg5: memref<16x32xf32, #tpu.memory_space<vmem>>, %arg6: memref<16x32xf32, #tpu.memory_space<vmem>>, %arg7: memref<16x32xf32, #tpu.memory_space<vmem>>, %arg8: memref<32x8xf32, #tpu.memory_space<vmem>>, %arg9: memref<8x32xf32, #tpu.memory_space<vmem>>, %arg10: memref<32x32xf32, #tpu.memory_space<vmem>>, %arg11: memref<32x32xf32, #tpu.memory_space<vmem>>, %arg12: memref<32x32xf32, #tpu.memory_space<vmem>>, %arg13: memref<32x32xf32, #tpu.memory_space<vmem>>, %arg14: memref<32x32xf32, #tpu.memory_space<vmem>>, %arg15: memref<1x32xf32, #tpu.memory_space<vmem>>, %arg16: memref<32x32xf32, #tpu.memory_space<vmem>>, %arg17: memref<1x32xf32, #tpu.memory_space<vmem>>, %arg18: memref<32x32xf32, #tpu.memory_space<vmem>>, %arg19: memref<1x32xf32, #tpu.memory_space<vmem>>, %arg20: memref<32x32xf32, #tpu.memory_space<vmem>>, %arg21: memref<1x32xf32, #tpu.memory_space<vmem>>, %arg22: memref<32x32xf32, #tpu.memory_space<vmem>>, %arg23: memref<1x32xf32, #tpu.memory_space<vmem>>, %arg24: memref<32x32xf32, #tpu.memory_space<vmem>>, %arg25: memref<1x32xf32, #tpu.memory_space<vmem>>, %arg26: memref<32x32xf32, #tpu.memory_space<vmem>>, %arg27: memref<16x32xf32, #tpu.memory_space<vmem>>, %arg28: memref<1x32xf32, #tpu.memory_space<vmem>>, %arg29: memref<32x32xf32, #tpu.memory_space<vmem>>, %arg30: memref<1x32xf32, #tpu.memory_space<vmem>>, %arg31: memref<32x32xf32, #tpu.memory_space<vmem>>, %arg32: memref<16x32xf32, #tpu.memory_space<vmem>>, %arg33: memref<1x32xf32, #tpu.memory_space<vmem>>, %arg34: memref<32x32xf32, #tpu.memory_space<vmem>>, %arg35: memref<1x32xf32, #tpu.memory_space<vmem>>, %arg36: memref<32x128xf32, #tpu.memory_space<vmem>>, %arg37: memref<32x64xf32, #tpu.memory_space<vmem>>, %arg38: memref<32x32xf32, #tpu.memory_space<vmem>>, %arg39: memref<32x32xf32, #tpu.memory_space<vmem>>, %arg40: memref<1x32xf32, #tpu.memory_space<vmem>>, %arg41: memref<1x32xf32, #tpu.memory_space<vmem>>, %arg42: memref<1x1xf32, #tpu.memory_space<vmem>>, %arg43: memref<1x32xf32, #tpu.memory_space<vmem>>, %arg44: memref<1x1xf32, #tpu.memory_space<vmem>>, %arg45: memref<1x32xf32, #tpu.memory_space<vmem>>, %arg46: memref<1x1xf32, #tpu.memory_space<vmem>>, %arg47: memref<2x6xf32, #tpu.memory_space<vmem>>, %arg48: memref<2x6xf32, #tpu.memory_space<vmem>>) attributes {dimension_semantics = [], scalar_prefetch = 0 : i64, scratch_operands = 0 : i64, tpu.core_type = #tpu.core_type<tc>} {
    %c0 = arith.constant 0 : index
    %c0_0 = arith.constant 0 : index
    %0 = vector.load %arg0[%c0, %c0_0] : memref<16x32xf32, #tpu.memory_space<vmem>>, vector<16x32xf32>
    %c0_1 = arith.constant 0 : index
    %c0_2 = arith.constant 0 : index
    %1 = vector.load %arg1[%c0_1, %c0_2] : memref<16x16xf32, #tpu.memory_space<vmem>>, vector<16x16xf32>
    %c0_3 = arith.constant 0 : index
    %c0_4 = arith.constant 0 : index
    %2 = vector.load %arg2[%c0_3, %c0_4] : memref<16x32xf32, #tpu.memory_space<vmem>>, vector<16x32xf32>
    %c0_5 = arith.constant 0 : index
    %c0_6 = arith.constant 0 : index
    %3 = vector.load %arg3[%c0_5, %c0_6] : memref<16x1xf32, #tpu.memory_space<vmem>>, vector<16x1xf32>
    %c0_7 = arith.constant 0 : index
    %c0_8 = arith.constant 0 : index
    %4 = vector.load %arg8[%c0_7, %c0_8] : memref<32x8xf32, #tpu.memory_space<vmem>>, vector<32x8xf32>
    %c0_9 = arith.constant 0 : index
    %c0_10 = arith.constant 0 : index
    %5 = vector.load %arg4[%c0_9, %c0_10] : memref<16x32xf32, #tpu.memory_space<vmem>>, vector<16x32xf32>
    %c0_11 = arith.constant 0 : index
    %c0_12 = arith.constant 0 : index
    %6 = vector.load %arg10[%c0_11, %c0_12] : memref<32x32xf32, #tpu.memory_space<vmem>>, vector<32x32xf32>
    %cst = arith.constant dense<0.000000e+00> : vector<16x32xf32>
    %7 = tpu.matmul %5, %6, %cst {dimension_numbers = #tpu.dot_dimension_numbers<[1], [0], [0], [1], [0, 0, 1, 1], [], []>} : vector<16x32xf32>, vector<32x32xf32>, vector<16x32xf32> -> vector<16x32xf32>
    %c0_13 = arith.constant 0 : index
    %c0_14 = arith.constant 0 : index
    %8 = vector.load %arg5[%c0_13, %c0_14] : memref<16x32xf32, #tpu.memory_space<vmem>>, vector<16x32xf32>
    %c0_15 = arith.constant 0 : index
    %c0_16 = arith.constant 0 : index
    %9 = vector.load %arg11[%c0_15, %c0_16] : memref<32x32xf32, #tpu.memory_space<vmem>>, vector<32x32xf32>
    %cst_17 = arith.constant dense<0.000000e+00> : vector<16x32xf32>
    %10 = tpu.matmul %8, %9, %cst_17 {dimension_numbers = #tpu.dot_dimension_numbers<[1], [0], [0], [1], [0, 0, 1, 1], [], []>} : vector<16x32xf32>, vector<32x32xf32>, vector<16x32xf32> -> vector<16x32xf32>
    %c0_18 = arith.constant 0 : index
    %c0_19 = arith.constant 0 : index
    %11 = vector.load %arg6[%c0_18, %c0_19] : memref<16x32xf32, #tpu.memory_space<vmem>>, vector<16x32xf32>
    %c0_20 = arith.constant 0 : index
    %c0_21 = arith.constant 0 : index
    %12 = vector.load %arg12[%c0_20, %c0_21] : memref<32x32xf32, #tpu.memory_space<vmem>>, vector<32x32xf32>
    %cst_22 = arith.constant dense<0.000000e+00> : vector<16x32xf32>
    %13 = tpu.matmul %11, %12, %cst_22 {dimension_numbers = #tpu.dot_dimension_numbers<[1], [0], [0], [1], [0, 0, 1, 1], [], []>} : vector<16x32xf32>, vector<32x32xf32>, vector<16x32xf32> -> vector<16x32xf32>
    %c0_23 = arith.constant 0 : index
    %c0_24 = arith.constant 0 : index
    %14 = vector.load %arg7[%c0_23, %c0_24] : memref<16x32xf32, #tpu.memory_space<vmem>>, vector<16x32xf32>
    %c0_25 = arith.constant 0 : index
    %c0_26 = arith.constant 0 : index
    %15 = vector.load %arg13[%c0_25, %c0_26] : memref<32x32xf32, #tpu.memory_space<vmem>>, vector<32x32xf32>
    %cst_27 = arith.constant dense<0.000000e+00> : vector<16x32xf32>
    %16 = tpu.matmul %14, %15, %cst_27 {dimension_numbers = #tpu.dot_dimension_numbers<[1], [0], [0], [1], [0, 0, 1, 1], [], []>} : vector<16x32xf32>, vector<32x32xf32>, vector<16x32xf32> -> vector<16x32xf32>
    %cst_28 = arith.constant 3.000000e-01 : f32
    %17 = vector.broadcast %cst_28 : f32 to vector<16x32xf32>
    %18 = arith.mulf %17, %7 : vector<16x32xf32>
    %19 = arith.addf %0, %18 : vector<16x32xf32>
    %cst_29 = arith.constant 0.699999988 : f32
    %20 = vector.broadcast %cst_29 : f32 to vector<16x32xf32>
    %21 = arith.mulf %20, %10 : vector<16x32xf32>
    %22 = arith.addf %19, %21 : vector<16x32xf32>
    %c0_30 = arith.constant 0 : index
    %c0_31 = arith.constant 0 : index
    %23 = vector.load %arg14[%c0_30, %c0_31] : memref<32x32xf32, #tpu.memory_space<vmem>>, vector<32x32xf32>
    %cst_32 = arith.constant dense<0.000000e+00> : vector<16x32xf32>
    %24 = tpu.matmul %22, %23, %cst_32 {dimension_numbers = #tpu.dot_dimension_numbers<[1], [0], [0], [1], [0, 0, 1, 1], [], []>} : vector<16x32xf32>, vector<32x32xf32>, vector<16x32xf32> -> vector<16x32xf32>
    %c0_33 = arith.constant 0 : index
    %c0_34 = arith.constant 0 : index
    %25 = vector.load %arg15[%c0_33, %c0_34] : memref<1x32xf32, #tpu.memory_space<vmem>>, vector<1x32xf32>
    %26 = vector.broadcast %25 : vector<1x32xf32> to vector<16x32xf32>
    %27 = arith.addf %24, %26 : vector<16x32xf32>
    %cst_35 = arith.constant 3.000000e-01 : f32
    %28 = vector.broadcast %cst_35 : f32 to vector<16x32xf32>
    %29 = arith.mulf %28, %16 : vector<16x32xf32>
    %30 = arith.addf %2, %29 : vector<16x32xf32>
    %cst_36 = arith.constant 4.000000e-01 : f32
    %31 = vector.broadcast %cst_36 : f32 to vector<16x32xf32>
    %32 = arith.mulf %31, %13 : vector<16x32xf32>
    %33 = arith.addf %30, %32 : vector<16x32xf32>
    %c0_37 = arith.constant 0 : index
    %c0_38 = arith.constant 0 : index
    %34 = vector.load %arg16[%c0_37, %c0_38] : memref<32x32xf32, #tpu.memory_space<vmem>>, vector<32x32xf32>
    %cst_39 = arith.constant dense<0.000000e+00> : vector<16x32xf32>
    %35 = tpu.matmul %33, %34, %cst_39 {dimension_numbers = #tpu.dot_dimension_numbers<[1], [0], [0], [1], [0, 0, 1, 1], [], []>} : vector<16x32xf32>, vector<32x32xf32>, vector<16x32xf32> -> vector<16x32xf32>
    %c0_40 = arith.constant 0 : index
    %c0_41 = arith.constant 0 : index
    %36 = vector.load %arg17[%c0_40, %c0_41] : memref<1x32xf32, #tpu.memory_space<vmem>>, vector<1x32xf32>
    %37 = vector.broadcast %36 : vector<1x32xf32> to vector<16x32xf32>
    %38 = arith.addf %35, %37 : vector<16x32xf32>
    %cst_42 = arith.constant 1.000000e+00 : f32
    %39 = vector.broadcast %cst_42 : f32 to vector<16x1xf32>
    %40 = arith.subf %39, %3 : vector<16x1xf32>
    %c0_43 = arith.constant 0 : index
    %c0_44 = arith.constant 0 : index
    %41 = vector.load %arg18[%c0_43, %c0_44] : memref<32x32xf32, #tpu.memory_space<vmem>>, vector<32x32xf32>
    %cst_45 = arith.constant dense<0.000000e+00> : vector<16x32xf32>
    %42 = tpu.matmul %27, %41, %cst_45 {dimension_numbers = #tpu.dot_dimension_numbers<[1], [0], [0], [1], [0, 0, 1, 1], [], []>} : vector<16x32xf32>, vector<32x32xf32>, vector<16x32xf32> -> vector<16x32xf32>
    %c0_46 = arith.constant 0 : index
    %c0_47 = arith.constant 0 : index
    %43 = vector.load %arg19[%c0_46, %c0_47] : memref<1x32xf32, #tpu.memory_space<vmem>>, vector<1x32xf32>
    %44 = vector.broadcast %43 : vector<1x32xf32> to vector<16x32xf32>
    %45 = arith.addf %42, %44 : vector<16x32xf32>
    %c0_48 = arith.constant 0 : index
    %c0_49 = arith.constant 0 : index
    %46 = vector.load %arg20[%c0_48, %c0_49] : memref<32x32xf32, #tpu.memory_space<vmem>>, vector<32x32xf32>
    %cst_50 = arith.constant dense<0.000000e+00> : vector<16x32xf32>
    %47 = tpu.matmul %38, %46, %cst_50 {dimension_numbers = #tpu.dot_dimension_numbers<[1], [0], [0], [1], [0, 0, 1, 1], [], []>} : vector<16x32xf32>, vector<32x32xf32>, vector<16x32xf32> -> vector<16x32xf32>
    %c0_51 = arith.constant 0 : index
    %c0_52 = arith.constant 0 : index
    %48 = vector.load %arg21[%c0_51, %c0_52] : memref<1x32xf32, #tpu.memory_space<vmem>>, vector<1x32xf32>
    %49 = vector.broadcast %48 : vector<1x32xf32> to vector<16x32xf32>
    %50 = arith.addf %47, %49 : vector<16x32xf32>
    %51 = vector.broadcast %40 : vector<16x1xf32> to vector<16x32xf32>
    %52 = arith.mulf %51, %45 : vector<16x32xf32>
    %53 = vector.broadcast %3 : vector<16x1xf32> to vector<16x32xf32>
    %54 = arith.mulf %53, %50 : vector<16x32xf32>
    %55 = arith.addf %52, %54 : vector<16x32xf32>
    %cst_53 = arith.constant dense<0.000000e+00> : vector<16x8xf32>
    %56 = tpu.matmul %55, %4, %cst_53 {dimension_numbers = #tpu.dot_dimension_numbers<[1], [0], [0], [1], [0, 0, 1, 1], [], []>} : vector<16x32xf32>, vector<32x8xf32>, vector<16x8xf32> -> vector<16x8xf32>
    %cst_54 = arith.constant dense<0xFF800000> : vector<16xf32>
    %57 = vector.multi_reduction <maximumf>, %56, %cst_54 [1] : vector<16x8xf32> to vector<16xf32>
    %58 = vector.shape_cast %57 : vector<16xf32> to vector<16x1xf32>
    %59 = vector.broadcast %58 : vector<16x1xf32> to vector<16x8xf32>
    %60 = arith.subf %56, %59 : vector<16x8xf32>
    %61 = math.exp %60 : vector<16x8xf32>
    %cst_55 = arith.constant dense<0.000000e+00> : vector<16xf32>
    %62 = vector.multi_reduction <add>, %61, %cst_55 [1] : vector<16x8xf32> to vector<16xf32>
    %63 = vector.shape_cast %62 : vector<16xf32> to vector<16x1xf32>
    %64 = tpu.reciprocal %63 {approx = true} : vector<16x1xf32> -> vector<16x1xf32>
    %65 = vector.broadcast %64 : vector<16x1xf32> to vector<16x8xf32>
    %66 = arith.mulf %61, %65 : vector<16x8xf32>
    %c0_56 = arith.constant 0 : index
    %c0_57 = arith.constant 0 : index
    %67 = vector.load %arg22[%c0_56, %c0_57] : memref<32x32xf32, #tpu.memory_space<vmem>>, vector<32x32xf32>
    %cst_58 = arith.constant dense<0.000000e+00> : vector<16x32xf32>
    %68 = tpu.matmul %27, %67, %cst_58 {dimension_numbers = #tpu.dot_dimension_numbers<[1], [0], [0], [1], [0, 0, 1, 1], [], []>} : vector<16x32xf32>, vector<32x32xf32>, vector<16x32xf32> -> vector<16x32xf32>
    %c0_59 = arith.constant 0 : index
    %c0_60 = arith.constant 0 : index
    %69 = vector.load %arg23[%c0_59, %c0_60] : memref<1x32xf32, #tpu.memory_space<vmem>>, vector<1x32xf32>
    %70 = vector.broadcast %69 : vector<1x32xf32> to vector<16x32xf32>
    %71 = arith.addf %68, %70 : vector<16x32xf32>
    %c0_61 = arith.constant 0 : index
    %c0_62 = arith.constant 0 : index
    %72 = vector.load %arg24[%c0_61, %c0_62] : memref<32x32xf32, #tpu.memory_space<vmem>>, vector<32x32xf32>
    %cst_63 = arith.constant dense<0.000000e+00> : vector<16x32xf32>
    %73 = tpu.matmul %38, %72, %cst_63 {dimension_numbers = #tpu.dot_dimension_numbers<[1], [0], [0], [1], [0, 0, 1, 1], [], []>} : vector<16x32xf32>, vector<32x32xf32>, vector<16x32xf32> -> vector<16x32xf32>
    %c0_64 = arith.constant 0 : index
    %c0_65 = arith.constant 0 : index
    %74 = vector.load %arg25[%c0_64, %c0_65] : memref<1x32xf32, #tpu.memory_space<vmem>>, vector<1x32xf32>
    %75 = vector.broadcast %74 : vector<1x32xf32> to vector<16x32xf32>
    %76 = arith.addf %73, %75 : vector<16x32xf32>
    %77 = vector.broadcast %40 : vector<16x1xf32> to vector<16x32xf32>
    %78 = arith.mulf %77, %71 : vector<16x32xf32>
    %79 = vector.broadcast %3 : vector<16x1xf32> to vector<16x32xf32>
    %80 = arith.mulf %79, %76 : vector<16x32xf32>
    %81 = arith.addf %78, %80 : vector<16x32xf32>
    %cst_66 = arith.constant dense<0.000000e+00> : vector<16x8xf32>
    %82 = tpu.matmul %81, %4, %cst_66 {dimension_numbers = #tpu.dot_dimension_numbers<[1], [0], [0], [1], [0, 0, 1, 1], [], []>} : vector<16x32xf32>, vector<32x8xf32>, vector<16x8xf32> -> vector<16x8xf32>
    %cst_67 = arith.constant dense<0xFF800000> : vector<16xf32>
    %83 = vector.multi_reduction <maximumf>, %82, %cst_67 [1] : vector<16x8xf32> to vector<16xf32>
    %84 = vector.shape_cast %83 : vector<16xf32> to vector<16x1xf32>
    %85 = vector.broadcast %84 : vector<16x1xf32> to vector<16x8xf32>
    %86 = arith.subf %82, %85 : vector<16x8xf32>
    %87 = math.exp %86 : vector<16x8xf32>
    %cst_68 = arith.constant dense<0.000000e+00> : vector<16xf32>
    %88 = vector.multi_reduction <add>, %87, %cst_68 [1] : vector<16x8xf32> to vector<16xf32>
    %89 = vector.shape_cast %88 : vector<16xf32> to vector<16x1xf32>
    %90 = tpu.reciprocal %89 {approx = true} : vector<16x1xf32> -> vector<16x1xf32>
    %91 = vector.broadcast %90 : vector<16x1xf32> to vector<16x8xf32>
    %92 = arith.mulf %87, %91 : vector<16x8xf32>
    %c0_69 = arith.constant 0 : index
    %c0_70 = arith.constant 0 : index
    %93 = vector.load %arg26[%c0_69, %c0_70] : memref<32x32xf32, #tpu.memory_space<vmem>>, vector<32x32xf32>
    %cst_71 = arith.constant dense<0.000000e+00> : vector<16x32xf32>
    %94 = tpu.matmul %27, %93, %cst_71 {dimension_numbers = #tpu.dot_dimension_numbers<[1], [0], [0], [1], [0, 0, 1, 1], [], []>} : vector<16x32xf32>, vector<32x32xf32>, vector<16x32xf32> -> vector<16x32xf32>
    %c0_72 = arith.constant 0 : index
    %c0_73 = arith.constant 0 : index
    %95 = vector.load %arg27[%c0_72, %c0_73] : memref<16x32xf32, #tpu.memory_space<vmem>>, vector<16x32xf32>
    %cst_74 = arith.constant dense<0.000000e+00> : vector<16x32xf32>
    %96 = tpu.matmul %1, %95, %cst_74 {dimension_numbers = #tpu.dot_dimension_numbers<[1], [0], [0], [1], [0, 0, 1, 1], [], []>} : vector<16x16xf32>, vector<16x32xf32>, vector<16x32xf32> -> vector<16x32xf32>
    %97 = arith.addf %94, %96 : vector<16x32xf32>
    %c0_75 = arith.constant 0 : index
    %c0_76 = arith.constant 0 : index
    %98 = vector.load %arg28[%c0_75, %c0_76] : memref<1x32xf32, #tpu.memory_space<vmem>>, vector<1x32xf32>
    %99 = vector.broadcast %98 : vector<1x32xf32> to vector<16x32xf32>
    %100 = arith.addf %97, %99 : vector<16x32xf32>
    %c0_77 = arith.constant 0 : index
    %c0_78 = arith.constant 0 : index
    %101 = vector.load %arg29[%c0_77, %c0_78] : memref<32x32xf32, #tpu.memory_space<vmem>>, vector<32x32xf32>
    %cst_79 = arith.constant dense<0.000000e+00> : vector<16x32xf32>
    %102 = tpu.matmul %38, %101, %cst_79 {dimension_numbers = #tpu.dot_dimension_numbers<[1], [0], [0], [1], [0, 0, 1, 1], [], []>} : vector<16x32xf32>, vector<32x32xf32>, vector<16x32xf32> -> vector<16x32xf32>
    %c0_80 = arith.constant 0 : index
    %c0_81 = arith.constant 0 : index
    %103 = vector.load %arg30[%c0_80, %c0_81] : memref<1x32xf32, #tpu.memory_space<vmem>>, vector<1x32xf32>
    %104 = vector.broadcast %103 : vector<1x32xf32> to vector<16x32xf32>
    %105 = arith.addf %102, %104 : vector<16x32xf32>
    %106 = vector.broadcast %40 : vector<16x1xf32> to vector<16x32xf32>
    %107 = arith.mulf %106, %100 : vector<16x32xf32>
    %108 = vector.broadcast %3 : vector<16x1xf32> to vector<16x32xf32>
    %109 = arith.mulf %108, %105 : vector<16x32xf32>
    %110 = arith.addf %107, %109 : vector<16x32xf32>
    %111 = arith.negf %110 : vector<16x32xf32>
    %112 = math.exp %111 : vector<16x32xf32>
    %cst_82 = arith.constant 1.000000e+00 : f32
    %113 = vector.broadcast %cst_82 : f32 to vector<16x32xf32>
    %114 = arith.addf %113, %112 : vector<16x32xf32>
    %115 = arith.divf %113, %114 : vector<16x32xf32>
    %c0_83 = arith.constant 0 : index
    %c0_84 = arith.constant 0 : index
    %116 = vector.load %arg31[%c0_83, %c0_84] : memref<32x32xf32, #tpu.memory_space<vmem>>, vector<32x32xf32>
    %cst_85 = arith.constant dense<0.000000e+00> : vector<16x32xf32>
    %117 = tpu.matmul %27, %116, %cst_85 {dimension_numbers = #tpu.dot_dimension_numbers<[1], [0], [0], [1], [0, 0, 1, 1], [], []>} : vector<16x32xf32>, vector<32x32xf32>, vector<16x32xf32> -> vector<16x32xf32>
    %c0_86 = arith.constant 0 : index
    %c0_87 = arith.constant 0 : index
    %118 = vector.load %arg32[%c0_86, %c0_87] : memref<16x32xf32, #tpu.memory_space<vmem>>, vector<16x32xf32>
    %cst_88 = arith.constant dense<0.000000e+00> : vector<16x32xf32>
    %119 = tpu.matmul %1, %118, %cst_88 {dimension_numbers = #tpu.dot_dimension_numbers<[1], [0], [0], [1], [0, 0, 1, 1], [], []>} : vector<16x16xf32>, vector<16x32xf32>, vector<16x32xf32> -> vector<16x32xf32>
    %120 = arith.addf %117, %119 : vector<16x32xf32>
    %c0_89 = arith.constant 0 : index
    %c0_90 = arith.constant 0 : index
    %121 = vector.load %arg33[%c0_89, %c0_90] : memref<1x32xf32, #tpu.memory_space<vmem>>, vector<1x32xf32>
    %122 = vector.broadcast %121 : vector<1x32xf32> to vector<16x32xf32>
    %123 = arith.addf %120, %122 : vector<16x32xf32>
    %c0_91 = arith.constant 0 : index
    %c0_92 = arith.constant 0 : index
    %124 = vector.load %arg34[%c0_91, %c0_92] : memref<32x32xf32, #tpu.memory_space<vmem>>, vector<32x32xf32>
    %cst_93 = arith.constant dense<0.000000e+00> : vector<16x32xf32>
    %125 = tpu.matmul %38, %124, %cst_93 {dimension_numbers = #tpu.dot_dimension_numbers<[1], [0], [0], [1], [0, 0, 1, 1], [], []>} : vector<16x32xf32>, vector<32x32xf32>, vector<16x32xf32> -> vector<16x32xf32>
    %c0_94 = arith.constant 0 : index
    %c0_95 = arith.constant 0 : index
    %126 = vector.load %arg35[%c0_94, %c0_95] : memref<1x32xf32, #tpu.memory_space<vmem>>, vector<1x32xf32>
    %127 = vector.broadcast %126 : vector<1x32xf32> to vector<16x32xf32>
    %128 = arith.addf %125, %127 : vector<16x32xf32>
    %129 = vector.broadcast %40 : vector<16x1xf32> to vector<16x32xf32>
    %130 = arith.mulf %129, %123 : vector<16x32xf32>
    %131 = vector.broadcast %3 : vector<16x1xf32> to vector<16x32xf32>
    %132 = arith.mulf %131, %128 : vector<16x32xf32>
    %133 = arith.addf %130, %132 : vector<16x32xf32>
    %134 = math.tanh %133 : vector<16x32xf32>
    %c0_96 = arith.constant 0 : index
    %c0_97 = arith.constant 0 : index
    %135 = vector.load %arg18[%c0_96, %c0_97] : memref<32x32xf32, #tpu.memory_space<vmem>>, vector<32x32xf32>
    %cst_98 = arith.constant dense<0.000000e+00> : vector<16x32xf32>
    %136 = tpu.matmul %0, %135, %cst_98 {dimension_numbers = #tpu.dot_dimension_numbers<[1], [0], [0], [1], [0, 0, 1, 1], [], []>} : vector<16x32xf32>, vector<32x32xf32>, vector<16x32xf32> -> vector<16x32xf32>
    %c0_99 = arith.constant 0 : index
    %c0_100 = arith.constant 0 : index
    %137 = vector.load %arg19[%c0_99, %c0_100] : memref<1x32xf32, #tpu.memory_space<vmem>>, vector<1x32xf32>
    %138 = vector.broadcast %137 : vector<1x32xf32> to vector<16x32xf32>
    %139 = arith.addf %136, %138 : vector<16x32xf32>
    %cst_101 = arith.constant dense<0.000000e+00> : vector<16x8xf32>
    %140 = tpu.matmul %139, %4, %cst_101 {dimension_numbers = #tpu.dot_dimension_numbers<[1], [0], [0], [1], [0, 0, 1, 1], [], []>} : vector<16x32xf32>, vector<32x8xf32>, vector<16x8xf32> -> vector<16x8xf32>
    %cst_102 = arith.constant dense<0xFF800000> : vector<16xf32>
    %141 = vector.multi_reduction <maximumf>, %140, %cst_102 [1] : vector<16x8xf32> to vector<16xf32>
    %142 = vector.shape_cast %141 : vector<16xf32> to vector<16x1xf32>
    %143 = vector.broadcast %142 : vector<16x1xf32> to vector<16x8xf32>
    %144 = arith.subf %140, %143 : vector<16x8xf32>
    %145 = math.exp %144 : vector<16x8xf32>
    %cst_103 = arith.constant dense<0.000000e+00> : vector<16xf32>
    %146 = vector.multi_reduction <add>, %145, %cst_103 [1] : vector<16x8xf32> to vector<16xf32>
    %147 = vector.shape_cast %146 : vector<16xf32> to vector<16x1xf32>
    %148 = tpu.reciprocal %147 {approx = true} : vector<16x1xf32> -> vector<16x1xf32>
    %149 = vector.broadcast %148 : vector<16x1xf32> to vector<16x8xf32>
    %150 = arith.mulf %145, %149 : vector<16x8xf32>
    %c0_104 = arith.constant 0 : index
    %c0_105 = arith.constant 0 : index
    %151 = vector.load %arg39[%c0_104, %c0_105] : memref<32x32xf32, #tpu.memory_space<vmem>>, vector<32x32xf32>
    %cst_106 = arith.constant dense<0.000000e+00> : vector<16x32xf32>
    %152 = tpu.matmul %0, %151, %cst_106 {dimension_numbers = #tpu.dot_dimension_numbers<[1], [0], [0], [1], [0, 0, 1, 1], [], []>} : vector<16x32xf32>, vector<32x32xf32>, vector<16x32xf32> -> vector<16x32xf32>
    %c0_107 = arith.constant 0 : index
    %c0_108 = arith.constant 0 : index
    %153 = vector.load %arg40[%c0_107, %c0_108] : memref<1x32xf32, #tpu.memory_space<vmem>>, vector<1x32xf32>
    %154 = vector.broadcast %153 : vector<1x32xf32> to vector<16x32xf32>
    %155 = arith.addf %152, %154 : vector<16x32xf32>
    %c0_109 = arith.constant 0 : index
    %c0_110 = arith.constant 0 : index
    %156 = vector.load %arg43[%c0_109, %c0_110] : memref<1x32xf32, #tpu.memory_space<vmem>>, vector<1x32xf32>
    %157 = vector.broadcast %3 : vector<16x1xf32> to vector<16x32xf32>
    %158 = vector.broadcast %156 : vector<1x32xf32> to vector<16x32xf32>
    %159 = arith.mulf %157, %158 : vector<16x32xf32>
    %c0_111 = arith.constant 0 : index
    %c0_112 = arith.constant 0 : index
    %160 = vector.load %arg45[%c0_111, %c0_112] : memref<1x32xf32, #tpu.memory_space<vmem>>, vector<1x32xf32>
    %161 = vector.broadcast %40 : vector<16x1xf32> to vector<16x32xf32>
    %162 = vector.broadcast %160 : vector<1x32xf32> to vector<16x32xf32>
    %163 = arith.mulf %161, %162 : vector<16x32xf32>
    %164 = arith.addf %159, %163 : vector<16x32xf32>
    %c0_113 = arith.constant 0 : index
    %c0_114 = arith.constant 0 : index
    %165 = vector.load %arg44[%c0_113, %c0_114] : memref<1x1xf32, #tpu.memory_space<vmem>>, vector<1x1xf32>
    %166 = vector.broadcast %165 : vector<1x1xf32> to vector<16x1xf32>
    %167 = arith.mulf %3, %166 : vector<16x1xf32>
    %c0_115 = arith.constant 0 : index
    %c0_116 = arith.constant 0 : index
    %168 = vector.load %arg46[%c0_115, %c0_116] : memref<1x1xf32, #tpu.memory_space<vmem>>, vector<1x1xf32>
    %169 = vector.broadcast %168 : vector<1x1xf32> to vector<16x1xf32>
    %170 = arith.mulf %40, %169 : vector<16x1xf32>
    %171 = arith.addf %167, %170 : vector<16x1xf32>
    %c0_117 = arith.constant 0 : index
    %c0_118 = arith.constant 0 : index
    %172 = vector.load %arg36[%c0_117, %c0_118] : memref<32x128xf32, #tpu.memory_space<vmem>>, vector<32x128xf32>
    %c0_119 = arith.constant 0 : index
    %c0_120 = arith.constant 0 : index
    %173 = vector.load %arg37[%c0_119, %c0_120] : memref<32x64xf32, #tpu.memory_space<vmem>>, vector<32x64xf32>
    %c0_121 = arith.constant 0 : index
    %c0_122 = arith.constant 0 : index
    %174 = vector.load %arg38[%c0_121, %c0_122] : memref<32x32xf32, #tpu.memory_space<vmem>>, vector<32x32xf32>
    %c0_123 = arith.constant 0 : index
    %c0_124 = arith.constant 0 : index
    %175 = vector.load %arg41[%c0_123, %c0_124] : memref<1x32xf32, #tpu.memory_space<vmem>>, vector<1x32xf32>
    %c0_125 = arith.constant 0 : index
    %c0_126 = arith.constant 0 : index
    %176 = vector.load %arg42[%c0_125, %c0_126] : memref<1x1xf32, #tpu.memory_space<vmem>>, vector<1x1xf32>
    %cst_127 = arith.constant 0.000000e+00 : f32
    %177 = vector.broadcast %cst_127 : f32 to vector<2x8x32xf32>
    %c0_128 = arith.constant 0 : index
    %c0_129 = arith.constant 0 : index
    %178 = vector.load %arg9[%c0_128, %c0_129] : memref<8x32xf32, #tpu.memory_space<vmem>>, vector<8x32xf32>
    %179 = vector.shape_cast %178 : vector<8x32xf32> to vector<1x8x32xf32>
    %180 = vector.broadcast %179 : vector<1x8x32xf32> to vector<2x8x32xf32>
    %181 = arith.addf %177, %180 : vector<2x8x32xf32>
    %182 = vector.extract_strided_slice %3 {offsets = [2, 0], sizes = [2, 1], strides = [1, 1]} : vector<16x1xf32> to vector<2x1xf32>
    %183 = vector.extract_strided_slice %3 {offsets = [0, 0], sizes = [2, 1], strides = [1, 1]} : vector<16x1xf32> to vector<2x1xf32>
    %184 = vector.shape_cast %182 : vector<2x1xf32> to vector<2x1x1xf32>
    %185 = vector.shape_cast %183 : vector<2x1xf32> to vector<2x1x1xf32>
    %186 = vector.extract_strided_slice %66 {offsets = [2, 0], sizes = [2, 8], strides = [1, 1]} : vector<16x8xf32> to vector<2x8xf32>
    %187 = vector.extract_strided_slice %92 {offsets = [2, 0], sizes = [2, 8], strides = [1, 1]} : vector<16x8xf32> to vector<2x8xf32>
    %188 = vector.extract_strided_slice %115 {offsets = [2, 0], sizes = [2, 32], strides = [1, 1]} : vector<16x32xf32> to vector<2x32xf32>
    %189 = vector.extract_strided_slice %134 {offsets = [2, 0], sizes = [2, 32], strides = [1, 1]} : vector<16x32xf32> to vector<2x32xf32>
    %190 = vector.shape_cast %181 : vector<2x8x32xf32> to vector<16x32xf32>
    %cst_130 = arith.constant dense<0.000000e+00> : vector<16x128xf32>
    %191 = tpu.matmul %190, %172, %cst_130 {dimension_numbers = #tpu.dot_dimension_numbers<[1], [0], [0], [1], [0, 0, 1, 1], [], []>} : vector<16x32xf32>, vector<32x128xf32>, vector<16x128xf32> -> vector<16x128xf32>
    %192 = vector.shape_cast %191 : vector<16x128xf32> to vector<2x8x128xf32>
    %193 = vector.extract_strided_slice %192 {offsets = [0, 0, 0], sizes = [2, 8, 32], strides = [1, 1, 1]} : vector<2x8x128xf32> to vector<2x8x32xf32>
    %194 = vector.extract_strided_slice %192 {offsets = [0, 0, 32], sizes = [2, 8, 32], strides = [1, 1, 1]} : vector<2x8x128xf32> to vector<2x8x32xf32>
    %195 = vector.extract_strided_slice %192 {offsets = [0, 0, 64], sizes = [2, 8, 32], strides = [1, 1, 1]} : vector<2x8x128xf32> to vector<2x8x32xf32>
    %196 = vector.extract_strided_slice %192 {offsets = [0, 0, 96], sizes = [2, 8, 32], strides = [1, 1, 1]} : vector<2x8x128xf32> to vector<2x8x32xf32>
    %197 = vector.shape_cast %188 : vector<2x32xf32> to vector<2x1x32xf32>
    %198 = vector.shape_cast %186 : vector<2x8xf32> to vector<2x8x1xf32>
    %199 = vector.broadcast %197 : vector<2x1x32xf32> to vector<2x8x32xf32>
    %200 = vector.broadcast %198 : vector<2x8x1xf32> to vector<2x8x32xf32>
    %201 = arith.mulf %199, %200 : vector<2x8x32xf32>
    %cst_131 = arith.constant 1.000000e+00 : f32
    %202 = vector.broadcast %cst_131 : f32 to vector<2x1x1xf32>
    %203 = arith.subf %202, %184 : vector<2x1x1xf32>
    %cst_132 = arith.constant 1.000000e+00 : f32
    %204 = vector.broadcast %cst_132 : f32 to vector<2x1x1xf32>
    %205 = arith.subf %204, %185 : vector<2x1x1xf32>
    %206 = arith.mulf %203, %205 : vector<2x1x1xf32>
    %207 = vector.broadcast %206 : vector<2x1x1xf32> to vector<2x8x32xf32>
    %208 = arith.mulf %207, %193 : vector<2x8x32xf32>
    %209 = arith.mulf %184, %185 : vector<2x1x1xf32>
    %210 = vector.broadcast %209 : vector<2x1x1xf32> to vector<2x8x32xf32>
    %211 = arith.mulf %210, %196 : vector<2x8x32xf32>
    %212 = arith.addf %208, %211 : vector<2x8x32xf32>
    %cst_133 = arith.constant 1.000000e+00 : f32
    %213 = vector.broadcast %cst_133 : f32 to vector<2x1x1xf32>
    %214 = arith.subf %213, %185 : vector<2x1x1xf32>
    %215 = arith.mulf %214, %184 : vector<2x1x1xf32>
    %216 = vector.broadcast %215 : vector<2x1x1xf32> to vector<2x8x32xf32>
    %217 = arith.mulf %216, %194 : vector<2x8x32xf32>
    %218 = arith.addf %212, %217 : vector<2x8x32xf32>
    %cst_134 = arith.constant 1.000000e+00 : f32
    %219 = vector.broadcast %cst_134 : f32 to vector<2x1x1xf32>
    %220 = arith.subf %219, %184 : vector<2x1x1xf32>
    %221 = arith.mulf %185, %220 : vector<2x1x1xf32>
    %222 = vector.broadcast %221 : vector<2x1x1xf32> to vector<2x8x32xf32>
    %223 = arith.mulf %222, %195 : vector<2x8x32xf32>
    %224 = arith.addf %218, %223 : vector<2x8x32xf32>
    %cst_135 = arith.constant 1.000000e+00 : f32
    %225 = vector.broadcast %cst_135 : f32 to vector<2x8x32xf32>
    %226 = arith.subf %225, %201 : vector<2x8x32xf32>
    %227 = arith.mulf %224, %226 : vector<2x8x32xf32>
    %228 = vector.shape_cast %189 : vector<2x32xf32> to vector<2x1x32xf32>
    %229 = vector.shape_cast %186 : vector<2x8xf32> to vector<2x8x1xf32>
    %230 = vector.broadcast %228 : vector<2x1x32xf32> to vector<2x8x32xf32>
    %231 = vector.broadcast %229 : vector<2x8x1xf32> to vector<2x8x32xf32>
    %232 = arith.mulf %230, %231 : vector<2x8x32xf32>
    %233 = arith.addf %227, %232 : vector<2x8x32xf32>
    %234 = vector.shape_cast %187 : vector<2x8xf32> to vector<2x8x1xf32>
    %235 = vector.broadcast %234 : vector<2x8x1xf32> to vector<2x8x32xf32>
    %236 = arith.mulf %233, %235 : vector<2x8x32xf32>
    %cst_136 = arith.constant dense<0.000000e+00> : vector<2x32xf32>
    %237 = vector.multi_reduction <add>, %236, %cst_136 [1] : vector<2x8x32xf32> to vector<2x32xf32>
    %238 = vector.extract_strided_slice %164 {offsets = [2, 0], sizes = [2, 32], strides = [1, 1]} : vector<16x32xf32> to vector<2x32xf32>
    %239 = arith.mulf %237, %238 : vector<2x32xf32>
    %cst_137 = arith.constant dense<0.000000e+00> : vector<2xf32>
    %240 = vector.multi_reduction <add>, %239, %cst_137 [1] : vector<2x32xf32> to vector<2xf32>
    %241 = vector.shape_cast %240 : vector<2xf32> to vector<2x1xf32>
    %242 = vector.extract_strided_slice %171 {offsets = [2, 0], sizes = [2, 1], strides = [1, 1]} : vector<16x1xf32> to vector<2x1xf32>
    %243 = arith.addf %241, %242 : vector<2x1xf32>
    %244 = arith.negf %243 : vector<2x1xf32>
    %245 = math.exp %244 : vector<2x1xf32>
    %cst_138 = arith.constant 1.000000e+00 : f32
    %246 = vector.broadcast %cst_138 : f32 to vector<2x1xf32>
    %247 = arith.addf %246, %245 : vector<2x1xf32>
    %248 = arith.divf %246, %247 : vector<2x1xf32>
    %249 = vector.extract_strided_slice %150 {offsets = [4, 0], sizes = [2, 8], strides = [1, 1]} : vector<16x8xf32> to vector<2x8xf32>
    %250 = vector.extract_strided_slice %155 {offsets = [4, 0], sizes = [2, 32], strides = [1, 1]} : vector<16x32xf32> to vector<2x32xf32>
    %251 = vector.shape_cast %233 : vector<2x8x32xf32> to vector<16x32xf32>
    %cst_139 = arith.constant dense<0.000000e+00> : vector<16x64xf32>
    %252 = tpu.matmul %251, %173, %cst_139 {dimension_numbers = #tpu.dot_dimension_numbers<[1], [0], [0], [1], [0, 0, 1, 1], [], []>} : vector<16x32xf32>, vector<32x64xf32>, vector<16x64xf32> -> vector<16x64xf32>
    %253 = vector.shape_cast %252 : vector<16x64xf32> to vector<2x8x64xf32>
    %254 = vector.extract_strided_slice %253 {offsets = [0, 0, 0], sizes = [2, 8, 32], strides = [1, 1, 1]} : vector<2x8x64xf32> to vector<2x8x32xf32>
    %255 = vector.extract_strided_slice %253 {offsets = [0, 0, 32], sizes = [2, 8, 32], strides = [1, 1, 1]} : vector<2x8x64xf32> to vector<2x8x32xf32>
    %256 = vector.broadcast %184 : vector<2x1x1xf32> to vector<2x8x32xf32>
    %257 = arith.mulf %256, %254 : vector<2x8x32xf32>
    %cst_140 = arith.constant 1.000000e+00 : f32
    %258 = vector.broadcast %cst_140 : f32 to vector<2x1x1xf32>
    %259 = arith.subf %258, %184 : vector<2x1x1xf32>
    %260 = vector.broadcast %259 : vector<2x1x1xf32> to vector<2x8x32xf32>
    %261 = arith.mulf %260, %255 : vector<2x8x32xf32>
    %262 = arith.addf %257, %261 : vector<2x8x32xf32>
    %263 = vector.shape_cast %249 : vector<2x8xf32> to vector<2x8x1xf32>
    %264 = vector.broadcast %263 : vector<2x8x1xf32> to vector<2x8x32xf32>
    %265 = arith.mulf %262, %264 : vector<2x8x32xf32>
    %cst_141 = arith.constant dense<0.000000e+00> : vector<2x32xf32>
    %266 = vector.multi_reduction <add>, %265, %cst_141 [1] : vector<2x8x32xf32> to vector<2x32xf32>
    %cst_142 = arith.constant dense<0.000000e+00> : vector<2x32xf32>
    %267 = tpu.matmul %266, %174, %cst_142 {dimension_numbers = #tpu.dot_dimension_numbers<[1], [0], [0], [1], [0, 0, 1, 1], [], []>} : vector<2x32xf32>, vector<32x32xf32>, vector<2x32xf32> -> vector<2x32xf32>
    %268 = arith.addf %267, %250 : vector<2x32xf32>
    %269 = math.tanh %268 : vector<2x32xf32>
    %270 = vector.broadcast %175 : vector<1x32xf32> to vector<2x32xf32>
    %271 = arith.mulf %269, %270 : vector<2x32xf32>
    %cst_143 = arith.constant dense<0.000000e+00> : vector<2xf32>
    %272 = vector.multi_reduction <add>, %271, %cst_143 [1] : vector<2x32xf32> to vector<2xf32>
    %273 = vector.shape_cast %272 : vector<2xf32> to vector<2x1xf32>
    %274 = vector.broadcast %176 : vector<1x1xf32> to vector<2x1xf32>
    %275 = arith.addf %273, %274 : vector<2x1xf32>
    %276 = arith.negf %275 : vector<2x1xf32>
    %277 = math.exp %276 : vector<2x1xf32>
    %cst_144 = arith.constant 1.000000e+00 : f32
    %278 = vector.broadcast %cst_144 : f32 to vector<2x1xf32>
    %279 = arith.addf %278, %277 : vector<2x1xf32>
    %280 = arith.divf %278, %279 : vector<2x1xf32>
    %281 = vector.extract_strided_slice %3 {offsets = [4, 0], sizes = [2, 1], strides = [1, 1]} : vector<16x1xf32> to vector<2x1xf32>
    %282 = vector.extract_strided_slice %3 {offsets = [2, 0], sizes = [2, 1], strides = [1, 1]} : vector<16x1xf32> to vector<2x1xf32>
    %283 = vector.shape_cast %281 : vector<2x1xf32> to vector<2x1x1xf32>
    %284 = vector.shape_cast %282 : vector<2x1xf32> to vector<2x1x1xf32>
    %285 = vector.extract_strided_slice %66 {offsets = [4, 0], sizes = [2, 8], strides = [1, 1]} : vector<16x8xf32> to vector<2x8xf32>
    %286 = vector.extract_strided_slice %92 {offsets = [4, 0], sizes = [2, 8], strides = [1, 1]} : vector<16x8xf32> to vector<2x8xf32>
    %287 = vector.extract_strided_slice %115 {offsets = [4, 0], sizes = [2, 32], strides = [1, 1]} : vector<16x32xf32> to vector<2x32xf32>
    %288 = vector.extract_strided_slice %134 {offsets = [4, 0], sizes = [2, 32], strides = [1, 1]} : vector<16x32xf32> to vector<2x32xf32>
    %289 = vector.shape_cast %233 : vector<2x8x32xf32> to vector<16x32xf32>
    %cst_145 = arith.constant dense<0.000000e+00> : vector<16x128xf32>
    %290 = tpu.matmul %289, %172, %cst_145 {dimension_numbers = #tpu.dot_dimension_numbers<[1], [0], [0], [1], [0, 0, 1, 1], [], []>} : vector<16x32xf32>, vector<32x128xf32>, vector<16x128xf32> -> vector<16x128xf32>
    %291 = vector.shape_cast %290 : vector<16x128xf32> to vector<2x8x128xf32>
    %292 = vector.extract_strided_slice %291 {offsets = [0, 0, 0], sizes = [2, 8, 32], strides = [1, 1, 1]} : vector<2x8x128xf32> to vector<2x8x32xf32>
    %293 = vector.extract_strided_slice %291 {offsets = [0, 0, 32], sizes = [2, 8, 32], strides = [1, 1, 1]} : vector<2x8x128xf32> to vector<2x8x32xf32>
    %294 = vector.extract_strided_slice %291 {offsets = [0, 0, 64], sizes = [2, 8, 32], strides = [1, 1, 1]} : vector<2x8x128xf32> to vector<2x8x32xf32>
    %295 = vector.extract_strided_slice %291 {offsets = [0, 0, 96], sizes = [2, 8, 32], strides = [1, 1, 1]} : vector<2x8x128xf32> to vector<2x8x32xf32>
    %296 = vector.shape_cast %287 : vector<2x32xf32> to vector<2x1x32xf32>
    %297 = vector.shape_cast %285 : vector<2x8xf32> to vector<2x8x1xf32>
    %298 = vector.broadcast %296 : vector<2x1x32xf32> to vector<2x8x32xf32>
    %299 = vector.broadcast %297 : vector<2x8x1xf32> to vector<2x8x32xf32>
    %300 = arith.mulf %298, %299 : vector<2x8x32xf32>
    %cst_146 = arith.constant 1.000000e+00 : f32
    %301 = vector.broadcast %cst_146 : f32 to vector<2x1x1xf32>
    %302 = arith.subf %301, %283 : vector<2x1x1xf32>
    %cst_147 = arith.constant 1.000000e+00 : f32
    %303 = vector.broadcast %cst_147 : f32 to vector<2x1x1xf32>
    %304 = arith.subf %303, %284 : vector<2x1x1xf32>
    %305 = arith.mulf %302, %304 : vector<2x1x1xf32>
    %306 = vector.broadcast %305 : vector<2x1x1xf32> to vector<2x8x32xf32>
    %307 = arith.mulf %306, %292 : vector<2x8x32xf32>
    %308 = arith.mulf %283, %284 : vector<2x1x1xf32>
    %309 = vector.broadcast %308 : vector<2x1x1xf32> to vector<2x8x32xf32>
    %310 = arith.mulf %309, %295 : vector<2x8x32xf32>
    %311 = arith.addf %307, %310 : vector<2x8x32xf32>
    %cst_148 = arith.constant 1.000000e+00 : f32
    %312 = vector.broadcast %cst_148 : f32 to vector<2x1x1xf32>
    %313 = arith.subf %312, %284 : vector<2x1x1xf32>
    %314 = arith.mulf %313, %283 : vector<2x1x1xf32>
    %315 = vector.broadcast %314 : vector<2x1x1xf32> to vector<2x8x32xf32>
    %316 = arith.mulf %315, %293 : vector<2x8x32xf32>
    %317 = arith.addf %311, %316 : vector<2x8x32xf32>
    %cst_149 = arith.constant 1.000000e+00 : f32
    %318 = vector.broadcast %cst_149 : f32 to vector<2x1x1xf32>
    %319 = arith.subf %318, %283 : vector<2x1x1xf32>
    %320 = arith.mulf %284, %319 : vector<2x1x1xf32>
    %321 = vector.broadcast %320 : vector<2x1x1xf32> to vector<2x8x32xf32>
    %322 = arith.mulf %321, %294 : vector<2x8x32xf32>
    %323 = arith.addf %317, %322 : vector<2x8x32xf32>
    %cst_150 = arith.constant 1.000000e+00 : f32
    %324 = vector.broadcast %cst_150 : f32 to vector<2x8x32xf32>
    %325 = arith.subf %324, %300 : vector<2x8x32xf32>
    %326 = arith.mulf %323, %325 : vector<2x8x32xf32>
    %327 = vector.shape_cast %288 : vector<2x32xf32> to vector<2x1x32xf32>
    %328 = vector.shape_cast %285 : vector<2x8xf32> to vector<2x8x1xf32>
    %329 = vector.broadcast %327 : vector<2x1x32xf32> to vector<2x8x32xf32>
    %330 = vector.broadcast %328 : vector<2x8x1xf32> to vector<2x8x32xf32>
    %331 = arith.mulf %329, %330 : vector<2x8x32xf32>
    %332 = arith.addf %326, %331 : vector<2x8x32xf32>
    %333 = vector.shape_cast %286 : vector<2x8xf32> to vector<2x8x1xf32>
    %334 = vector.broadcast %333 : vector<2x8x1xf32> to vector<2x8x32xf32>
    %335 = arith.mulf %332, %334 : vector<2x8x32xf32>
    %cst_151 = arith.constant dense<0.000000e+00> : vector<2x32xf32>
    %336 = vector.multi_reduction <add>, %335, %cst_151 [1] : vector<2x8x32xf32> to vector<2x32xf32>
    %337 = vector.extract_strided_slice %164 {offsets = [4, 0], sizes = [2, 32], strides = [1, 1]} : vector<16x32xf32> to vector<2x32xf32>
    %338 = arith.mulf %336, %337 : vector<2x32xf32>
    %cst_152 = arith.constant dense<0.000000e+00> : vector<2xf32>
    %339 = vector.multi_reduction <add>, %338, %cst_152 [1] : vector<2x32xf32> to vector<2xf32>
    %340 = vector.shape_cast %339 : vector<2xf32> to vector<2x1xf32>
    %341 = vector.extract_strided_slice %171 {offsets = [4, 0], sizes = [2, 1], strides = [1, 1]} : vector<16x1xf32> to vector<2x1xf32>
    %342 = arith.addf %340, %341 : vector<2x1xf32>
    %343 = arith.negf %342 : vector<2x1xf32>
    %344 = math.exp %343 : vector<2x1xf32>
    %cst_153 = arith.constant 1.000000e+00 : f32
    %345 = vector.broadcast %cst_153 : f32 to vector<2x1xf32>
    %346 = arith.addf %345, %344 : vector<2x1xf32>
    %347 = arith.divf %345, %346 : vector<2x1xf32>
    %348 = vector.extract_strided_slice %150 {offsets = [6, 0], sizes = [2, 8], strides = [1, 1]} : vector<16x8xf32> to vector<2x8xf32>
    %349 = vector.extract_strided_slice %155 {offsets = [6, 0], sizes = [2, 32], strides = [1, 1]} : vector<16x32xf32> to vector<2x32xf32>
    %350 = vector.shape_cast %332 : vector<2x8x32xf32> to vector<16x32xf32>
    %cst_154 = arith.constant dense<0.000000e+00> : vector<16x64xf32>
    %351 = tpu.matmul %350, %173, %cst_154 {dimension_numbers = #tpu.dot_dimension_numbers<[1], [0], [0], [1], [0, 0, 1, 1], [], []>} : vector<16x32xf32>, vector<32x64xf32>, vector<16x64xf32> -> vector<16x64xf32>
    %352 = vector.shape_cast %351 : vector<16x64xf32> to vector<2x8x64xf32>
    %353 = vector.extract_strided_slice %352 {offsets = [0, 0, 0], sizes = [2, 8, 32], strides = [1, 1, 1]} : vector<2x8x64xf32> to vector<2x8x32xf32>
    %354 = vector.extract_strided_slice %352 {offsets = [0, 0, 32], sizes = [2, 8, 32], strides = [1, 1, 1]} : vector<2x8x64xf32> to vector<2x8x32xf32>
    %355 = vector.broadcast %283 : vector<2x1x1xf32> to vector<2x8x32xf32>
    %356 = arith.mulf %355, %353 : vector<2x8x32xf32>
    %cst_155 = arith.constant 1.000000e+00 : f32
    %357 = vector.broadcast %cst_155 : f32 to vector<2x1x1xf32>
    %358 = arith.subf %357, %283 : vector<2x1x1xf32>
    %359 = vector.broadcast %358 : vector<2x1x1xf32> to vector<2x8x32xf32>
    %360 = arith.mulf %359, %354 : vector<2x8x32xf32>
    %361 = arith.addf %356, %360 : vector<2x8x32xf32>
    %362 = vector.shape_cast %348 : vector<2x8xf32> to vector<2x8x1xf32>
    %363 = vector.broadcast %362 : vector<2x8x1xf32> to vector<2x8x32xf32>
    %364 = arith.mulf %361, %363 : vector<2x8x32xf32>
    %cst_156 = arith.constant dense<0.000000e+00> : vector<2x32xf32>
    %365 = vector.multi_reduction <add>, %364, %cst_156 [1] : vector<2x8x32xf32> to vector<2x32xf32>
    %cst_157 = arith.constant dense<0.000000e+00> : vector<2x32xf32>
    %366 = tpu.matmul %365, %174, %cst_157 {dimension_numbers = #tpu.dot_dimension_numbers<[1], [0], [0], [1], [0, 0, 1, 1], [], []>} : vector<2x32xf32>, vector<32x32xf32>, vector<2x32xf32> -> vector<2x32xf32>
    %367 = arith.addf %366, %349 : vector<2x32xf32>
    %368 = math.tanh %367 : vector<2x32xf32>
    %369 = vector.broadcast %175 : vector<1x32xf32> to vector<2x32xf32>
    %370 = arith.mulf %368, %369 : vector<2x32xf32>
    %cst_158 = arith.constant dense<0.000000e+00> : vector<2xf32>
    %371 = vector.multi_reduction <add>, %370, %cst_158 [1] : vector<2x32xf32> to vector<2xf32>
    %372 = vector.shape_cast %371 : vector<2xf32> to vector<2x1xf32>
    %373 = vector.broadcast %176 : vector<1x1xf32> to vector<2x1xf32>
    %374 = arith.addf %372, %373 : vector<2x1xf32>
    %375 = arith.negf %374 : vector<2x1xf32>
    %376 = math.exp %375 : vector<2x1xf32>
    %cst_159 = arith.constant 1.000000e+00 : f32
    %377 = vector.broadcast %cst_159 : f32 to vector<2x1xf32>
    %378 = arith.addf %377, %376 : vector<2x1xf32>
    %379 = arith.divf %377, %378 : vector<2x1xf32>
    %380 = vector.extract_strided_slice %3 {offsets = [6, 0], sizes = [2, 1], strides = [1, 1]} : vector<16x1xf32> to vector<2x1xf32>
    %381 = vector.extract_strided_slice %3 {offsets = [4, 0], sizes = [2, 1], strides = [1, 1]} : vector<16x1xf32> to vector<2x1xf32>
    %382 = vector.shape_cast %380 : vector<2x1xf32> to vector<2x1x1xf32>
    %383 = vector.shape_cast %381 : vector<2x1xf32> to vector<2x1x1xf32>
    %384 = vector.extract_strided_slice %66 {offsets = [6, 0], sizes = [2, 8], strides = [1, 1]} : vector<16x8xf32> to vector<2x8xf32>
    %385 = vector.extract_strided_slice %92 {offsets = [6, 0], sizes = [2, 8], strides = [1, 1]} : vector<16x8xf32> to vector<2x8xf32>
    %386 = vector.extract_strided_slice %115 {offsets = [6, 0], sizes = [2, 32], strides = [1, 1]} : vector<16x32xf32> to vector<2x32xf32>
    %387 = vector.extract_strided_slice %134 {offsets = [6, 0], sizes = [2, 32], strides = [1, 1]} : vector<16x32xf32> to vector<2x32xf32>
    %388 = vector.shape_cast %332 : vector<2x8x32xf32> to vector<16x32xf32>
    %cst_160 = arith.constant dense<0.000000e+00> : vector<16x128xf32>
    %389 = tpu.matmul %388, %172, %cst_160 {dimension_numbers = #tpu.dot_dimension_numbers<[1], [0], [0], [1], [0, 0, 1, 1], [], []>} : vector<16x32xf32>, vector<32x128xf32>, vector<16x128xf32> -> vector<16x128xf32>
    %390 = vector.shape_cast %389 : vector<16x128xf32> to vector<2x8x128xf32>
    %391 = vector.extract_strided_slice %390 {offsets = [0, 0, 0], sizes = [2, 8, 32], strides = [1, 1, 1]} : vector<2x8x128xf32> to vector<2x8x32xf32>
    %392 = vector.extract_strided_slice %390 {offsets = [0, 0, 32], sizes = [2, 8, 32], strides = [1, 1, 1]} : vector<2x8x128xf32> to vector<2x8x32xf32>
    %393 = vector.extract_strided_slice %390 {offsets = [0, 0, 64], sizes = [2, 8, 32], strides = [1, 1, 1]} : vector<2x8x128xf32> to vector<2x8x32xf32>
    %394 = vector.extract_strided_slice %390 {offsets = [0, 0, 96], sizes = [2, 8, 32], strides = [1, 1, 1]} : vector<2x8x128xf32> to vector<2x8x32xf32>
    %395 = vector.shape_cast %386 : vector<2x32xf32> to vector<2x1x32xf32>
    %396 = vector.shape_cast %384 : vector<2x8xf32> to vector<2x8x1xf32>
    %397 = vector.broadcast %395 : vector<2x1x32xf32> to vector<2x8x32xf32>
    %398 = vector.broadcast %396 : vector<2x8x1xf32> to vector<2x8x32xf32>
    %399 = arith.mulf %397, %398 : vector<2x8x32xf32>
    %cst_161 = arith.constant 1.000000e+00 : f32
    %400 = vector.broadcast %cst_161 : f32 to vector<2x1x1xf32>
    %401 = arith.subf %400, %382 : vector<2x1x1xf32>
    %cst_162 = arith.constant 1.000000e+00 : f32
    %402 = vector.broadcast %cst_162 : f32 to vector<2x1x1xf32>
    %403 = arith.subf %402, %383 : vector<2x1x1xf32>
    %404 = arith.mulf %401, %403 : vector<2x1x1xf32>
    %405 = vector.broadcast %404 : vector<2x1x1xf32> to vector<2x8x32xf32>
    %406 = arith.mulf %405, %391 : vector<2x8x32xf32>
    %407 = arith.mulf %382, %383 : vector<2x1x1xf32>
    %408 = vector.broadcast %407 : vector<2x1x1xf32> to vector<2x8x32xf32>
    %409 = arith.mulf %408, %394 : vector<2x8x32xf32>
    %410 = arith.addf %406, %409 : vector<2x8x32xf32>
    %cst_163 = arith.constant 1.000000e+00 : f32
    %411 = vector.broadcast %cst_163 : f32 to vector<2x1x1xf32>
    %412 = arith.subf %411, %383 : vector<2x1x1xf32>
    %413 = arith.mulf %412, %382 : vector<2x1x1xf32>
    %414 = vector.broadcast %413 : vector<2x1x1xf32> to vector<2x8x32xf32>
    %415 = arith.mulf %414, %392 : vector<2x8x32xf32>
    %416 = arith.addf %410, %415 : vector<2x8x32xf32>
    %cst_164 = arith.constant 1.000000e+00 : f32
    %417 = vector.broadcast %cst_164 : f32 to vector<2x1x1xf32>
    %418 = arith.subf %417, %382 : vector<2x1x1xf32>
    %419 = arith.mulf %383, %418 : vector<2x1x1xf32>
    %420 = vector.broadcast %419 : vector<2x1x1xf32> to vector<2x8x32xf32>
    %421 = arith.mulf %420, %393 : vector<2x8x32xf32>
    %422 = arith.addf %416, %421 : vector<2x8x32xf32>
    %cst_165 = arith.constant 1.000000e+00 : f32
    %423 = vector.broadcast %cst_165 : f32 to vector<2x8x32xf32>
    %424 = arith.subf %423, %399 : vector<2x8x32xf32>
    %425 = arith.mulf %422, %424 : vector<2x8x32xf32>
    %426 = vector.shape_cast %387 : vector<2x32xf32> to vector<2x1x32xf32>
    %427 = vector.shape_cast %384 : vector<2x8xf32> to vector<2x8x1xf32>
    %428 = vector.broadcast %426 : vector<2x1x32xf32> to vector<2x8x32xf32>
    %429 = vector.broadcast %427 : vector<2x8x1xf32> to vector<2x8x32xf32>
    %430 = arith.mulf %428, %429 : vector<2x8x32xf32>
    %431 = arith.addf %425, %430 : vector<2x8x32xf32>
    %432 = vector.shape_cast %385 : vector<2x8xf32> to vector<2x8x1xf32>
    %433 = vector.broadcast %432 : vector<2x8x1xf32> to vector<2x8x32xf32>
    %434 = arith.mulf %431, %433 : vector<2x8x32xf32>
    %cst_166 = arith.constant dense<0.000000e+00> : vector<2x32xf32>
    %435 = vector.multi_reduction <add>, %434, %cst_166 [1] : vector<2x8x32xf32> to vector<2x32xf32>
    %436 = vector.extract_strided_slice %164 {offsets = [6, 0], sizes = [2, 32], strides = [1, 1]} : vector<16x32xf32> to vector<2x32xf32>
    %437 = arith.mulf %435, %436 : vector<2x32xf32>
    %cst_167 = arith.constant dense<0.000000e+00> : vector<2xf32>
    %438 = vector.multi_reduction <add>, %437, %cst_167 [1] : vector<2x32xf32> to vector<2xf32>
    %439 = vector.shape_cast %438 : vector<2xf32> to vector<2x1xf32>
    %440 = vector.extract_strided_slice %171 {offsets = [6, 0], sizes = [2, 1], strides = [1, 1]} : vector<16x1xf32> to vector<2x1xf32>
    %441 = arith.addf %439, %440 : vector<2x1xf32>
    %442 = arith.negf %441 : vector<2x1xf32>
    %443 = math.exp %442 : vector<2x1xf32>
    %cst_168 = arith.constant 1.000000e+00 : f32
    %444 = vector.broadcast %cst_168 : f32 to vector<2x1xf32>
    %445 = arith.addf %444, %443 : vector<2x1xf32>
    %446 = arith.divf %444, %445 : vector<2x1xf32>
    %447 = vector.extract_strided_slice %150 {offsets = [8, 0], sizes = [2, 8], strides = [1, 1]} : vector<16x8xf32> to vector<2x8xf32>
    %448 = vector.extract_strided_slice %155 {offsets = [8, 0], sizes = [2, 32], strides = [1, 1]} : vector<16x32xf32> to vector<2x32xf32>
    %449 = vector.shape_cast %431 : vector<2x8x32xf32> to vector<16x32xf32>
    %cst_169 = arith.constant dense<0.000000e+00> : vector<16x64xf32>
    %450 = tpu.matmul %449, %173, %cst_169 {dimension_numbers = #tpu.dot_dimension_numbers<[1], [0], [0], [1], [0, 0, 1, 1], [], []>} : vector<16x32xf32>, vector<32x64xf32>, vector<16x64xf32> -> vector<16x64xf32>
    %451 = vector.shape_cast %450 : vector<16x64xf32> to vector<2x8x64xf32>
    %452 = vector.extract_strided_slice %451 {offsets = [0, 0, 0], sizes = [2, 8, 32], strides = [1, 1, 1]} : vector<2x8x64xf32> to vector<2x8x32xf32>
    %453 = vector.extract_strided_slice %451 {offsets = [0, 0, 32], sizes = [2, 8, 32], strides = [1, 1, 1]} : vector<2x8x64xf32> to vector<2x8x32xf32>
    %454 = vector.broadcast %382 : vector<2x1x1xf32> to vector<2x8x32xf32>
    %455 = arith.mulf %454, %452 : vector<2x8x32xf32>
    %cst_170 = arith.constant 1.000000e+00 : f32
    %456 = vector.broadcast %cst_170 : f32 to vector<2x1x1xf32>
    %457 = arith.subf %456, %382 : vector<2x1x1xf32>
    %458 = vector.broadcast %457 : vector<2x1x1xf32> to vector<2x8x32xf32>
    %459 = arith.mulf %458, %453 : vector<2x8x32xf32>
    %460 = arith.addf %455, %459 : vector<2x8x32xf32>
    %461 = vector.shape_cast %447 : vector<2x8xf32> to vector<2x8x1xf32>
    %462 = vector.broadcast %461 : vector<2x8x1xf32> to vector<2x8x32xf32>
    %463 = arith.mulf %460, %462 : vector<2x8x32xf32>
    %cst_171 = arith.constant dense<0.000000e+00> : vector<2x32xf32>
    %464 = vector.multi_reduction <add>, %463, %cst_171 [1] : vector<2x8x32xf32> to vector<2x32xf32>
    %cst_172 = arith.constant dense<0.000000e+00> : vector<2x32xf32>
    %465 = tpu.matmul %464, %174, %cst_172 {dimension_numbers = #tpu.dot_dimension_numbers<[1], [0], [0], [1], [0, 0, 1, 1], [], []>} : vector<2x32xf32>, vector<32x32xf32>, vector<2x32xf32> -> vector<2x32xf32>
    %466 = arith.addf %465, %448 : vector<2x32xf32>
    %467 = math.tanh %466 : vector<2x32xf32>
    %468 = vector.broadcast %175 : vector<1x32xf32> to vector<2x32xf32>
    %469 = arith.mulf %467, %468 : vector<2x32xf32>
    %cst_173 = arith.constant dense<0.000000e+00> : vector<2xf32>
    %470 = vector.multi_reduction <add>, %469, %cst_173 [1] : vector<2x32xf32> to vector<2xf32>
    %471 = vector.shape_cast %470 : vector<2xf32> to vector<2x1xf32>
    %472 = vector.broadcast %176 : vector<1x1xf32> to vector<2x1xf32>
    %473 = arith.addf %471, %472 : vector<2x1xf32>
    %474 = arith.negf %473 : vector<2x1xf32>
    %475 = math.exp %474 : vector<2x1xf32>
    %cst_174 = arith.constant 1.000000e+00 : f32
    %476 = vector.broadcast %cst_174 : f32 to vector<2x1xf32>
    %477 = arith.addf %476, %475 : vector<2x1xf32>
    %478 = arith.divf %476, %477 : vector<2x1xf32>
    %479 = vector.extract_strided_slice %3 {offsets = [8, 0], sizes = [2, 1], strides = [1, 1]} : vector<16x1xf32> to vector<2x1xf32>
    %480 = vector.extract_strided_slice %3 {offsets = [6, 0], sizes = [2, 1], strides = [1, 1]} : vector<16x1xf32> to vector<2x1xf32>
    %481 = vector.shape_cast %479 : vector<2x1xf32> to vector<2x1x1xf32>
    %482 = vector.shape_cast %480 : vector<2x1xf32> to vector<2x1x1xf32>
    %483 = vector.extract_strided_slice %66 {offsets = [8, 0], sizes = [2, 8], strides = [1, 1]} : vector<16x8xf32> to vector<2x8xf32>
    %484 = vector.extract_strided_slice %92 {offsets = [8, 0], sizes = [2, 8], strides = [1, 1]} : vector<16x8xf32> to vector<2x8xf32>
    %485 = vector.extract_strided_slice %115 {offsets = [8, 0], sizes = [2, 32], strides = [1, 1]} : vector<16x32xf32> to vector<2x32xf32>
    %486 = vector.extract_strided_slice %134 {offsets = [8, 0], sizes = [2, 32], strides = [1, 1]} : vector<16x32xf32> to vector<2x32xf32>
    %487 = vector.shape_cast %431 : vector<2x8x32xf32> to vector<16x32xf32>
    %cst_175 = arith.constant dense<0.000000e+00> : vector<16x128xf32>
    %488 = tpu.matmul %487, %172, %cst_175 {dimension_numbers = #tpu.dot_dimension_numbers<[1], [0], [0], [1], [0, 0, 1, 1], [], []>} : vector<16x32xf32>, vector<32x128xf32>, vector<16x128xf32> -> vector<16x128xf32>
    %489 = vector.shape_cast %488 : vector<16x128xf32> to vector<2x8x128xf32>
    %490 = vector.extract_strided_slice %489 {offsets = [0, 0, 0], sizes = [2, 8, 32], strides = [1, 1, 1]} : vector<2x8x128xf32> to vector<2x8x32xf32>
    %491 = vector.extract_strided_slice %489 {offsets = [0, 0, 32], sizes = [2, 8, 32], strides = [1, 1, 1]} : vector<2x8x128xf32> to vector<2x8x32xf32>
    %492 = vector.extract_strided_slice %489 {offsets = [0, 0, 64], sizes = [2, 8, 32], strides = [1, 1, 1]} : vector<2x8x128xf32> to vector<2x8x32xf32>
    %493 = vector.extract_strided_slice %489 {offsets = [0, 0, 96], sizes = [2, 8, 32], strides = [1, 1, 1]} : vector<2x8x128xf32> to vector<2x8x32xf32>
    %494 = vector.shape_cast %485 : vector<2x32xf32> to vector<2x1x32xf32>
    %495 = vector.shape_cast %483 : vector<2x8xf32> to vector<2x8x1xf32>
    %496 = vector.broadcast %494 : vector<2x1x32xf32> to vector<2x8x32xf32>
    %497 = vector.broadcast %495 : vector<2x8x1xf32> to vector<2x8x32xf32>
    %498 = arith.mulf %496, %497 : vector<2x8x32xf32>
    %cst_176 = arith.constant 1.000000e+00 : f32
    %499 = vector.broadcast %cst_176 : f32 to vector<2x1x1xf32>
    %500 = arith.subf %499, %481 : vector<2x1x1xf32>
    %cst_177 = arith.constant 1.000000e+00 : f32
    %501 = vector.broadcast %cst_177 : f32 to vector<2x1x1xf32>
    %502 = arith.subf %501, %482 : vector<2x1x1xf32>
    %503 = arith.mulf %500, %502 : vector<2x1x1xf32>
    %504 = vector.broadcast %503 : vector<2x1x1xf32> to vector<2x8x32xf32>
    %505 = arith.mulf %504, %490 : vector<2x8x32xf32>
    %506 = arith.mulf %481, %482 : vector<2x1x1xf32>
    %507 = vector.broadcast %506 : vector<2x1x1xf32> to vector<2x8x32xf32>
    %508 = arith.mulf %507, %493 : vector<2x8x32xf32>
    %509 = arith.addf %505, %508 : vector<2x8x32xf32>
    %cst_178 = arith.constant 1.000000e+00 : f32
    %510 = vector.broadcast %cst_178 : f32 to vector<2x1x1xf32>
    %511 = arith.subf %510, %482 : vector<2x1x1xf32>
    %512 = arith.mulf %511, %481 : vector<2x1x1xf32>
    %513 = vector.broadcast %512 : vector<2x1x1xf32> to vector<2x8x32xf32>
    %514 = arith.mulf %513, %491 : vector<2x8x32xf32>
    %515 = arith.addf %509, %514 : vector<2x8x32xf32>
    %cst_179 = arith.constant 1.000000e+00 : f32
    %516 = vector.broadcast %cst_179 : f32 to vector<2x1x1xf32>
    %517 = arith.subf %516, %481 : vector<2x1x1xf32>
    %518 = arith.mulf %482, %517 : vector<2x1x1xf32>
    %519 = vector.broadcast %518 : vector<2x1x1xf32> to vector<2x8x32xf32>
    %520 = arith.mulf %519, %492 : vector<2x8x32xf32>
    %521 = arith.addf %515, %520 : vector<2x8x32xf32>
    %cst_180 = arith.constant 1.000000e+00 : f32
    %522 = vector.broadcast %cst_180 : f32 to vector<2x8x32xf32>
    %523 = arith.subf %522, %498 : vector<2x8x32xf32>
    %524 = arith.mulf %521, %523 : vector<2x8x32xf32>
    %525 = vector.shape_cast %486 : vector<2x32xf32> to vector<2x1x32xf32>
    %526 = vector.shape_cast %483 : vector<2x8xf32> to vector<2x8x1xf32>
    %527 = vector.broadcast %525 : vector<2x1x32xf32> to vector<2x8x32xf32>
    %528 = vector.broadcast %526 : vector<2x8x1xf32> to vector<2x8x32xf32>
    %529 = arith.mulf %527, %528 : vector<2x8x32xf32>
    %530 = arith.addf %524, %529 : vector<2x8x32xf32>
    %531 = vector.shape_cast %484 : vector<2x8xf32> to vector<2x8x1xf32>
    %532 = vector.broadcast %531 : vector<2x8x1xf32> to vector<2x8x32xf32>
    %533 = arith.mulf %530, %532 : vector<2x8x32xf32>
    %cst_181 = arith.constant dense<0.000000e+00> : vector<2x32xf32>
    %534 = vector.multi_reduction <add>, %533, %cst_181 [1] : vector<2x8x32xf32> to vector<2x32xf32>
    %535 = vector.extract_strided_slice %164 {offsets = [8, 0], sizes = [2, 32], strides = [1, 1]} : vector<16x32xf32> to vector<2x32xf32>
    %536 = arith.mulf %534, %535 : vector<2x32xf32>
    %cst_182 = arith.constant dense<0.000000e+00> : vector<2xf32>
    %537 = vector.multi_reduction <add>, %536, %cst_182 [1] : vector<2x32xf32> to vector<2xf32>
    %538 = vector.shape_cast %537 : vector<2xf32> to vector<2x1xf32>
    %539 = vector.extract_strided_slice %171 {offsets = [8, 0], sizes = [2, 1], strides = [1, 1]} : vector<16x1xf32> to vector<2x1xf32>
    %540 = arith.addf %538, %539 : vector<2x1xf32>
    %541 = arith.negf %540 : vector<2x1xf32>
    %542 = math.exp %541 : vector<2x1xf32>
    %cst_183 = arith.constant 1.000000e+00 : f32
    %543 = vector.broadcast %cst_183 : f32 to vector<2x1xf32>
    %544 = arith.addf %543, %542 : vector<2x1xf32>
    %545 = arith.divf %543, %544 : vector<2x1xf32>
    %546 = vector.extract_strided_slice %150 {offsets = [10, 0], sizes = [2, 8], strides = [1, 1]} : vector<16x8xf32> to vector<2x8xf32>
    %547 = vector.extract_strided_slice %155 {offsets = [10, 0], sizes = [2, 32], strides = [1, 1]} : vector<16x32xf32> to vector<2x32xf32>
    %548 = vector.shape_cast %530 : vector<2x8x32xf32> to vector<16x32xf32>
    %cst_184 = arith.constant dense<0.000000e+00> : vector<16x64xf32>
    %549 = tpu.matmul %548, %173, %cst_184 {dimension_numbers = #tpu.dot_dimension_numbers<[1], [0], [0], [1], [0, 0, 1, 1], [], []>} : vector<16x32xf32>, vector<32x64xf32>, vector<16x64xf32> -> vector<16x64xf32>
    %550 = vector.shape_cast %549 : vector<16x64xf32> to vector<2x8x64xf32>
    %551 = vector.extract_strided_slice %550 {offsets = [0, 0, 0], sizes = [2, 8, 32], strides = [1, 1, 1]} : vector<2x8x64xf32> to vector<2x8x32xf32>
    %552 = vector.extract_strided_slice %550 {offsets = [0, 0, 32], sizes = [2, 8, 32], strides = [1, 1, 1]} : vector<2x8x64xf32> to vector<2x8x32xf32>
    %553 = vector.broadcast %481 : vector<2x1x1xf32> to vector<2x8x32xf32>
    %554 = arith.mulf %553, %551 : vector<2x8x32xf32>
    %cst_185 = arith.constant 1.000000e+00 : f32
    %555 = vector.broadcast %cst_185 : f32 to vector<2x1x1xf32>
    %556 = arith.subf %555, %481 : vector<2x1x1xf32>
    %557 = vector.broadcast %556 : vector<2x1x1xf32> to vector<2x8x32xf32>
    %558 = arith.mulf %557, %552 : vector<2x8x32xf32>
    %559 = arith.addf %554, %558 : vector<2x8x32xf32>
    %560 = vector.shape_cast %546 : vector<2x8xf32> to vector<2x8x1xf32>
    %561 = vector.broadcast %560 : vector<2x8x1xf32> to vector<2x8x32xf32>
    %562 = arith.mulf %559, %561 : vector<2x8x32xf32>
    %cst_186 = arith.constant dense<0.000000e+00> : vector<2x32xf32>
    %563 = vector.multi_reduction <add>, %562, %cst_186 [1] : vector<2x8x32xf32> to vector<2x32xf32>
    %cst_187 = arith.constant dense<0.000000e+00> : vector<2x32xf32>
    %564 = tpu.matmul %563, %174, %cst_187 {dimension_numbers = #tpu.dot_dimension_numbers<[1], [0], [0], [1], [0, 0, 1, 1], [], []>} : vector<2x32xf32>, vector<32x32xf32>, vector<2x32xf32> -> vector<2x32xf32>
    %565 = arith.addf %564, %547 : vector<2x32xf32>
    %566 = math.tanh %565 : vector<2x32xf32>
    %567 = vector.broadcast %175 : vector<1x32xf32> to vector<2x32xf32>
    %568 = arith.mulf %566, %567 : vector<2x32xf32>
    %cst_188 = arith.constant dense<0.000000e+00> : vector<2xf32>
    %569 = vector.multi_reduction <add>, %568, %cst_188 [1] : vector<2x32xf32> to vector<2xf32>
    %570 = vector.shape_cast %569 : vector<2xf32> to vector<2x1xf32>
    %571 = vector.broadcast %176 : vector<1x1xf32> to vector<2x1xf32>
    %572 = arith.addf %570, %571 : vector<2x1xf32>
    %573 = arith.negf %572 : vector<2x1xf32>
    %574 = math.exp %573 : vector<2x1xf32>
    %cst_189 = arith.constant 1.000000e+00 : f32
    %575 = vector.broadcast %cst_189 : f32 to vector<2x1xf32>
    %576 = arith.addf %575, %574 : vector<2x1xf32>
    %577 = arith.divf %575, %576 : vector<2x1xf32>
    %578 = vector.extract_strided_slice %3 {offsets = [10, 0], sizes = [2, 1], strides = [1, 1]} : vector<16x1xf32> to vector<2x1xf32>
    %579 = vector.extract_strided_slice %3 {offsets = [8, 0], sizes = [2, 1], strides = [1, 1]} : vector<16x1xf32> to vector<2x1xf32>
    %580 = vector.shape_cast %578 : vector<2x1xf32> to vector<2x1x1xf32>
    %581 = vector.shape_cast %579 : vector<2x1xf32> to vector<2x1x1xf32>
    %582 = vector.extract_strided_slice %66 {offsets = [10, 0], sizes = [2, 8], strides = [1, 1]} : vector<16x8xf32> to vector<2x8xf32>
    %583 = vector.extract_strided_slice %92 {offsets = [10, 0], sizes = [2, 8], strides = [1, 1]} : vector<16x8xf32> to vector<2x8xf32>
    %584 = vector.extract_strided_slice %115 {offsets = [10, 0], sizes = [2, 32], strides = [1, 1]} : vector<16x32xf32> to vector<2x32xf32>
    %585 = vector.extract_strided_slice %134 {offsets = [10, 0], sizes = [2, 32], strides = [1, 1]} : vector<16x32xf32> to vector<2x32xf32>
    %586 = vector.shape_cast %530 : vector<2x8x32xf32> to vector<16x32xf32>
    %cst_190 = arith.constant dense<0.000000e+00> : vector<16x128xf32>
    %587 = tpu.matmul %586, %172, %cst_190 {dimension_numbers = #tpu.dot_dimension_numbers<[1], [0], [0], [1], [0, 0, 1, 1], [], []>} : vector<16x32xf32>, vector<32x128xf32>, vector<16x128xf32> -> vector<16x128xf32>
    %588 = vector.shape_cast %587 : vector<16x128xf32> to vector<2x8x128xf32>
    %589 = vector.extract_strided_slice %588 {offsets = [0, 0, 0], sizes = [2, 8, 32], strides = [1, 1, 1]} : vector<2x8x128xf32> to vector<2x8x32xf32>
    %590 = vector.extract_strided_slice %588 {offsets = [0, 0, 32], sizes = [2, 8, 32], strides = [1, 1, 1]} : vector<2x8x128xf32> to vector<2x8x32xf32>
    %591 = vector.extract_strided_slice %588 {offsets = [0, 0, 64], sizes = [2, 8, 32], strides = [1, 1, 1]} : vector<2x8x128xf32> to vector<2x8x32xf32>
    %592 = vector.extract_strided_slice %588 {offsets = [0, 0, 96], sizes = [2, 8, 32], strides = [1, 1, 1]} : vector<2x8x128xf32> to vector<2x8x32xf32>
    %593 = vector.shape_cast %584 : vector<2x32xf32> to vector<2x1x32xf32>
    %594 = vector.shape_cast %582 : vector<2x8xf32> to vector<2x8x1xf32>
    %595 = vector.broadcast %593 : vector<2x1x32xf32> to vector<2x8x32xf32>
    %596 = vector.broadcast %594 : vector<2x8x1xf32> to vector<2x8x32xf32>
    %597 = arith.mulf %595, %596 : vector<2x8x32xf32>
    %cst_191 = arith.constant 1.000000e+00 : f32
    %598 = vector.broadcast %cst_191 : f32 to vector<2x1x1xf32>
    %599 = arith.subf %598, %580 : vector<2x1x1xf32>
    %cst_192 = arith.constant 1.000000e+00 : f32
    %600 = vector.broadcast %cst_192 : f32 to vector<2x1x1xf32>
    %601 = arith.subf %600, %581 : vector<2x1x1xf32>
    %602 = arith.mulf %599, %601 : vector<2x1x1xf32>
    %603 = vector.broadcast %602 : vector<2x1x1xf32> to vector<2x8x32xf32>
    %604 = arith.mulf %603, %589 : vector<2x8x32xf32>
    %605 = arith.mulf %580, %581 : vector<2x1x1xf32>
    %606 = vector.broadcast %605 : vector<2x1x1xf32> to vector<2x8x32xf32>
    %607 = arith.mulf %606, %592 : vector<2x8x32xf32>
    %608 = arith.addf %604, %607 : vector<2x8x32xf32>
    %cst_193 = arith.constant 1.000000e+00 : f32
    %609 = vector.broadcast %cst_193 : f32 to vector<2x1x1xf32>
    %610 = arith.subf %609, %581 : vector<2x1x1xf32>
    %611 = arith.mulf %610, %580 : vector<2x1x1xf32>
    %612 = vector.broadcast %611 : vector<2x1x1xf32> to vector<2x8x32xf32>
    %613 = arith.mulf %612, %590 : vector<2x8x32xf32>
    %614 = arith.addf %608, %613 : vector<2x8x32xf32>
    %cst_194 = arith.constant 1.000000e+00 : f32
    %615 = vector.broadcast %cst_194 : f32 to vector<2x1x1xf32>
    %616 = arith.subf %615, %580 : vector<2x1x1xf32>
    %617 = arith.mulf %581, %616 : vector<2x1x1xf32>
    %618 = vector.broadcast %617 : vector<2x1x1xf32> to vector<2x8x32xf32>
    %619 = arith.mulf %618, %591 : vector<2x8x32xf32>
    %620 = arith.addf %614, %619 : vector<2x8x32xf32>
    %cst_195 = arith.constant 1.000000e+00 : f32
    %621 = vector.broadcast %cst_195 : f32 to vector<2x8x32xf32>
    %622 = arith.subf %621, %597 : vector<2x8x32xf32>
    %623 = arith.mulf %620, %622 : vector<2x8x32xf32>
    %624 = vector.shape_cast %585 : vector<2x32xf32> to vector<2x1x32xf32>
    %625 = vector.shape_cast %582 : vector<2x8xf32> to vector<2x8x1xf32>
    %626 = vector.broadcast %624 : vector<2x1x32xf32> to vector<2x8x32xf32>
    %627 = vector.broadcast %625 : vector<2x8x1xf32> to vector<2x8x32xf32>
    %628 = arith.mulf %626, %627 : vector<2x8x32xf32>
    %629 = arith.addf %623, %628 : vector<2x8x32xf32>
    %630 = vector.shape_cast %583 : vector<2x8xf32> to vector<2x8x1xf32>
    %631 = vector.broadcast %630 : vector<2x8x1xf32> to vector<2x8x32xf32>
    %632 = arith.mulf %629, %631 : vector<2x8x32xf32>
    %cst_196 = arith.constant dense<0.000000e+00> : vector<2x32xf32>
    %633 = vector.multi_reduction <add>, %632, %cst_196 [1] : vector<2x8x32xf32> to vector<2x32xf32>
    %634 = vector.extract_strided_slice %164 {offsets = [10, 0], sizes = [2, 32], strides = [1, 1]} : vector<16x32xf32> to vector<2x32xf32>
    %635 = arith.mulf %633, %634 : vector<2x32xf32>
    %cst_197 = arith.constant dense<0.000000e+00> : vector<2xf32>
    %636 = vector.multi_reduction <add>, %635, %cst_197 [1] : vector<2x32xf32> to vector<2xf32>
    %637 = vector.shape_cast %636 : vector<2xf32> to vector<2x1xf32>
    %638 = vector.extract_strided_slice %171 {offsets = [10, 0], sizes = [2, 1], strides = [1, 1]} : vector<16x1xf32> to vector<2x1xf32>
    %639 = arith.addf %637, %638 : vector<2x1xf32>
    %640 = arith.negf %639 : vector<2x1xf32>
    %641 = math.exp %640 : vector<2x1xf32>
    %cst_198 = arith.constant 1.000000e+00 : f32
    %642 = vector.broadcast %cst_198 : f32 to vector<2x1xf32>
    %643 = arith.addf %642, %641 : vector<2x1xf32>
    %644 = arith.divf %642, %643 : vector<2x1xf32>
    %645 = vector.extract_strided_slice %150 {offsets = [12, 0], sizes = [2, 8], strides = [1, 1]} : vector<16x8xf32> to vector<2x8xf32>
    %646 = vector.extract_strided_slice %155 {offsets = [12, 0], sizes = [2, 32], strides = [1, 1]} : vector<16x32xf32> to vector<2x32xf32>
    %647 = vector.shape_cast %629 : vector<2x8x32xf32> to vector<16x32xf32>
    %cst_199 = arith.constant dense<0.000000e+00> : vector<16x64xf32>
    %648 = tpu.matmul %647, %173, %cst_199 {dimension_numbers = #tpu.dot_dimension_numbers<[1], [0], [0], [1], [0, 0, 1, 1], [], []>} : vector<16x32xf32>, vector<32x64xf32>, vector<16x64xf32> -> vector<16x64xf32>
    %649 = vector.shape_cast %648 : vector<16x64xf32> to vector<2x8x64xf32>
    %650 = vector.extract_strided_slice %649 {offsets = [0, 0, 0], sizes = [2, 8, 32], strides = [1, 1, 1]} : vector<2x8x64xf32> to vector<2x8x32xf32>
    %651 = vector.extract_strided_slice %649 {offsets = [0, 0, 32], sizes = [2, 8, 32], strides = [1, 1, 1]} : vector<2x8x64xf32> to vector<2x8x32xf32>
    %652 = vector.broadcast %580 : vector<2x1x1xf32> to vector<2x8x32xf32>
    %653 = arith.mulf %652, %650 : vector<2x8x32xf32>
    %cst_200 = arith.constant 1.000000e+00 : f32
    %654 = vector.broadcast %cst_200 : f32 to vector<2x1x1xf32>
    %655 = arith.subf %654, %580 : vector<2x1x1xf32>
    %656 = vector.broadcast %655 : vector<2x1x1xf32> to vector<2x8x32xf32>
    %657 = arith.mulf %656, %651 : vector<2x8x32xf32>
    %658 = arith.addf %653, %657 : vector<2x8x32xf32>
    %659 = vector.shape_cast %645 : vector<2x8xf32> to vector<2x8x1xf32>
    %660 = vector.broadcast %659 : vector<2x8x1xf32> to vector<2x8x32xf32>
    %661 = arith.mulf %658, %660 : vector<2x8x32xf32>
    %cst_201 = arith.constant dense<0.000000e+00> : vector<2x32xf32>
    %662 = vector.multi_reduction <add>, %661, %cst_201 [1] : vector<2x8x32xf32> to vector<2x32xf32>
    %cst_202 = arith.constant dense<0.000000e+00> : vector<2x32xf32>
    %663 = tpu.matmul %662, %174, %cst_202 {dimension_numbers = #tpu.dot_dimension_numbers<[1], [0], [0], [1], [0, 0, 1, 1], [], []>} : vector<2x32xf32>, vector<32x32xf32>, vector<2x32xf32> -> vector<2x32xf32>
    %664 = arith.addf %663, %646 : vector<2x32xf32>
    %665 = math.tanh %664 : vector<2x32xf32>
    %666 = vector.broadcast %175 : vector<1x32xf32> to vector<2x32xf32>
    %667 = arith.mulf %665, %666 : vector<2x32xf32>
    %cst_203 = arith.constant dense<0.000000e+00> : vector<2xf32>
    %668 = vector.multi_reduction <add>, %667, %cst_203 [1] : vector<2x32xf32> to vector<2xf32>
    %669 = vector.shape_cast %668 : vector<2xf32> to vector<2x1xf32>
    %670 = vector.broadcast %176 : vector<1x1xf32> to vector<2x1xf32>
    %671 = arith.addf %669, %670 : vector<2x1xf32>
    %672 = arith.negf %671 : vector<2x1xf32>
    %673 = math.exp %672 : vector<2x1xf32>
    %cst_204 = arith.constant 1.000000e+00 : f32
    %674 = vector.broadcast %cst_204 : f32 to vector<2x1xf32>
    %675 = arith.addf %674, %673 : vector<2x1xf32>
    %676 = arith.divf %674, %675 : vector<2x1xf32>
    %677 = vector.extract_strided_slice %3 {offsets = [12, 0], sizes = [2, 1], strides = [1, 1]} : vector<16x1xf32> to vector<2x1xf32>
    %678 = vector.extract_strided_slice %3 {offsets = [10, 0], sizes = [2, 1], strides = [1, 1]} : vector<16x1xf32> to vector<2x1xf32>
    %679 = vector.shape_cast %677 : vector<2x1xf32> to vector<2x1x1xf32>
    %680 = vector.shape_cast %678 : vector<2x1xf32> to vector<2x1x1xf32>
    %681 = vector.extract_strided_slice %66 {offsets = [12, 0], sizes = [2, 8], strides = [1, 1]} : vector<16x8xf32> to vector<2x8xf32>
    %682 = vector.extract_strided_slice %92 {offsets = [12, 0], sizes = [2, 8], strides = [1, 1]} : vector<16x8xf32> to vector<2x8xf32>
    %683 = vector.extract_strided_slice %115 {offsets = [12, 0], sizes = [2, 32], strides = [1, 1]} : vector<16x32xf32> to vector<2x32xf32>
    %684 = vector.extract_strided_slice %134 {offsets = [12, 0], sizes = [2, 32], strides = [1, 1]} : vector<16x32xf32> to vector<2x32xf32>
    %685 = vector.shape_cast %629 : vector<2x8x32xf32> to vector<16x32xf32>
    %cst_205 = arith.constant dense<0.000000e+00> : vector<16x128xf32>
    %686 = tpu.matmul %685, %172, %cst_205 {dimension_numbers = #tpu.dot_dimension_numbers<[1], [0], [0], [1], [0, 0, 1, 1], [], []>} : vector<16x32xf32>, vector<32x128xf32>, vector<16x128xf32> -> vector<16x128xf32>
    %687 = vector.shape_cast %686 : vector<16x128xf32> to vector<2x8x128xf32>
    %688 = vector.extract_strided_slice %687 {offsets = [0, 0, 0], sizes = [2, 8, 32], strides = [1, 1, 1]} : vector<2x8x128xf32> to vector<2x8x32xf32>
    %689 = vector.extract_strided_slice %687 {offsets = [0, 0, 32], sizes = [2, 8, 32], strides = [1, 1, 1]} : vector<2x8x128xf32> to vector<2x8x32xf32>
    %690 = vector.extract_strided_slice %687 {offsets = [0, 0, 64], sizes = [2, 8, 32], strides = [1, 1, 1]} : vector<2x8x128xf32> to vector<2x8x32xf32>
    %691 = vector.extract_strided_slice %687 {offsets = [0, 0, 96], sizes = [2, 8, 32], strides = [1, 1, 1]} : vector<2x8x128xf32> to vector<2x8x32xf32>
    %692 = vector.shape_cast %683 : vector<2x32xf32> to vector<2x1x32xf32>
    %693 = vector.shape_cast %681 : vector<2x8xf32> to vector<2x8x1xf32>
    %694 = vector.broadcast %692 : vector<2x1x32xf32> to vector<2x8x32xf32>
    %695 = vector.broadcast %693 : vector<2x8x1xf32> to vector<2x8x32xf32>
    %696 = arith.mulf %694, %695 : vector<2x8x32xf32>
    %cst_206 = arith.constant 1.000000e+00 : f32
    %697 = vector.broadcast %cst_206 : f32 to vector<2x1x1xf32>
    %698 = arith.subf %697, %679 : vector<2x1x1xf32>
    %cst_207 = arith.constant 1.000000e+00 : f32
    %699 = vector.broadcast %cst_207 : f32 to vector<2x1x1xf32>
    %700 = arith.subf %699, %680 : vector<2x1x1xf32>
    %701 = arith.mulf %698, %700 : vector<2x1x1xf32>
    %702 = vector.broadcast %701 : vector<2x1x1xf32> to vector<2x8x32xf32>
    %703 = arith.mulf %702, %688 : vector<2x8x32xf32>
    %704 = arith.mulf %679, %680 : vector<2x1x1xf32>
    %705 = vector.broadcast %704 : vector<2x1x1xf32> to vector<2x8x32xf32>
    %706 = arith.mulf %705, %691 : vector<2x8x32xf32>
    %707 = arith.addf %703, %706 : vector<2x8x32xf32>
    %cst_208 = arith.constant 1.000000e+00 : f32
    %708 = vector.broadcast %cst_208 : f32 to vector<2x1x1xf32>
    %709 = arith.subf %708, %680 : vector<2x1x1xf32>
    %710 = arith.mulf %709, %679 : vector<2x1x1xf32>
    %711 = vector.broadcast %710 : vector<2x1x1xf32> to vector<2x8x32xf32>
    %712 = arith.mulf %711, %689 : vector<2x8x32xf32>
    %713 = arith.addf %707, %712 : vector<2x8x32xf32>
    %cst_209 = arith.constant 1.000000e+00 : f32
    %714 = vector.broadcast %cst_209 : f32 to vector<2x1x1xf32>
    %715 = arith.subf %714, %679 : vector<2x1x1xf32>
    %716 = arith.mulf %680, %715 : vector<2x1x1xf32>
    %717 = vector.broadcast %716 : vector<2x1x1xf32> to vector<2x8x32xf32>
    %718 = arith.mulf %717, %690 : vector<2x8x32xf32>
    %719 = arith.addf %713, %718 : vector<2x8x32xf32>
    %cst_210 = arith.constant 1.000000e+00 : f32
    %720 = vector.broadcast %cst_210 : f32 to vector<2x8x32xf32>
    %721 = arith.subf %720, %696 : vector<2x8x32xf32>
    %722 = arith.mulf %719, %721 : vector<2x8x32xf32>
    %723 = vector.shape_cast %684 : vector<2x32xf32> to vector<2x1x32xf32>
    %724 = vector.shape_cast %681 : vector<2x8xf32> to vector<2x8x1xf32>
    %725 = vector.broadcast %723 : vector<2x1x32xf32> to vector<2x8x32xf32>
    %726 = vector.broadcast %724 : vector<2x8x1xf32> to vector<2x8x32xf32>
    %727 = arith.mulf %725, %726 : vector<2x8x32xf32>
    %728 = arith.addf %722, %727 : vector<2x8x32xf32>
    %729 = vector.shape_cast %682 : vector<2x8xf32> to vector<2x8x1xf32>
    %730 = vector.broadcast %729 : vector<2x8x1xf32> to vector<2x8x32xf32>
    %731 = arith.mulf %728, %730 : vector<2x8x32xf32>
    %cst_211 = arith.constant dense<0.000000e+00> : vector<2x32xf32>
    %732 = vector.multi_reduction <add>, %731, %cst_211 [1] : vector<2x8x32xf32> to vector<2x32xf32>
    %733 = vector.extract_strided_slice %164 {offsets = [12, 0], sizes = [2, 32], strides = [1, 1]} : vector<16x32xf32> to vector<2x32xf32>
    %734 = arith.mulf %732, %733 : vector<2x32xf32>
    %cst_212 = arith.constant dense<0.000000e+00> : vector<2xf32>
    %735 = vector.multi_reduction <add>, %734, %cst_212 [1] : vector<2x32xf32> to vector<2xf32>
    %736 = vector.shape_cast %735 : vector<2xf32> to vector<2x1xf32>
    %737 = vector.extract_strided_slice %171 {offsets = [12, 0], sizes = [2, 1], strides = [1, 1]} : vector<16x1xf32> to vector<2x1xf32>
    %738 = arith.addf %736, %737 : vector<2x1xf32>
    %739 = arith.negf %738 : vector<2x1xf32>
    %740 = math.exp %739 : vector<2x1xf32>
    %cst_213 = arith.constant 1.000000e+00 : f32
    %741 = vector.broadcast %cst_213 : f32 to vector<2x1xf32>
    %742 = arith.addf %741, %740 : vector<2x1xf32>
    %743 = arith.divf %741, %742 : vector<2x1xf32>
    %744 = vector.extract_strided_slice %150 {offsets = [14, 0], sizes = [2, 8], strides = [1, 1]} : vector<16x8xf32> to vector<2x8xf32>
    %745 = vector.extract_strided_slice %155 {offsets = [14, 0], sizes = [2, 32], strides = [1, 1]} : vector<16x32xf32> to vector<2x32xf32>
    %746 = vector.shape_cast %728 : vector<2x8x32xf32> to vector<16x32xf32>
    %cst_214 = arith.constant dense<0.000000e+00> : vector<16x64xf32>
    %747 = tpu.matmul %746, %173, %cst_214 {dimension_numbers = #tpu.dot_dimension_numbers<[1], [0], [0], [1], [0, 0, 1, 1], [], []>} : vector<16x32xf32>, vector<32x64xf32>, vector<16x64xf32> -> vector<16x64xf32>
    %748 = vector.shape_cast %747 : vector<16x64xf32> to vector<2x8x64xf32>
    %749 = vector.extract_strided_slice %748 {offsets = [0, 0, 0], sizes = [2, 8, 32], strides = [1, 1, 1]} : vector<2x8x64xf32> to vector<2x8x32xf32>
    %750 = vector.extract_strided_slice %748 {offsets = [0, 0, 32], sizes = [2, 8, 32], strides = [1, 1, 1]} : vector<2x8x64xf32> to vector<2x8x32xf32>
    %751 = vector.broadcast %679 : vector<2x1x1xf32> to vector<2x8x32xf32>
    %752 = arith.mulf %751, %749 : vector<2x8x32xf32>
    %cst_215 = arith.constant 1.000000e+00 : f32
    %753 = vector.broadcast %cst_215 : f32 to vector<2x1x1xf32>
    %754 = arith.subf %753, %679 : vector<2x1x1xf32>
    %755 = vector.broadcast %754 : vector<2x1x1xf32> to vector<2x8x32xf32>
    %756 = arith.mulf %755, %750 : vector<2x8x32xf32>
    %757 = arith.addf %752, %756 : vector<2x8x32xf32>
    %758 = vector.shape_cast %744 : vector<2x8xf32> to vector<2x8x1xf32>
    %759 = vector.broadcast %758 : vector<2x8x1xf32> to vector<2x8x32xf32>
    %760 = arith.mulf %757, %759 : vector<2x8x32xf32>
    %cst_216 = arith.constant dense<0.000000e+00> : vector<2x32xf32>
    %761 = vector.multi_reduction <add>, %760, %cst_216 [1] : vector<2x8x32xf32> to vector<2x32xf32>
    %cst_217 = arith.constant dense<0.000000e+00> : vector<2x32xf32>
    %762 = tpu.matmul %761, %174, %cst_217 {dimension_numbers = #tpu.dot_dimension_numbers<[1], [0], [0], [1], [0, 0, 1, 1], [], []>} : vector<2x32xf32>, vector<32x32xf32>, vector<2x32xf32> -> vector<2x32xf32>
    %763 = arith.addf %762, %745 : vector<2x32xf32>
    %764 = math.tanh %763 : vector<2x32xf32>
    %765 = vector.broadcast %175 : vector<1x32xf32> to vector<2x32xf32>
    %766 = arith.mulf %764, %765 : vector<2x32xf32>
    %cst_218 = arith.constant dense<0.000000e+00> : vector<2xf32>
    %767 = vector.multi_reduction <add>, %766, %cst_218 [1] : vector<2x32xf32> to vector<2xf32>
    %768 = vector.shape_cast %767 : vector<2xf32> to vector<2x1xf32>
    %769 = vector.broadcast %176 : vector<1x1xf32> to vector<2x1xf32>
    %770 = arith.addf %768, %769 : vector<2x1xf32>
    %771 = arith.negf %770 : vector<2x1xf32>
    %772 = math.exp %771 : vector<2x1xf32>
    %cst_219 = arith.constant 1.000000e+00 : f32
    %773 = vector.broadcast %cst_219 : f32 to vector<2x1xf32>
    %774 = arith.addf %773, %772 : vector<2x1xf32>
    %775 = arith.divf %773, %774 : vector<2x1xf32>
    %776 = tpu.concatenate %280, %379, %478, %577, %676, %775 in 1 : vector<2x1xf32>, vector<2x1xf32>, vector<2x1xf32>, vector<2x1xf32>, vector<2x1xf32>, vector<2x1xf32> -> vector<2x6xf32>
    %c0_220 = arith.constant 0 : index
    %c0_221 = arith.constant 0 : index
    %777 = vector.load %arg47[%c0_220, %c0_221] : memref<2x6xf32, #tpu.memory_space<vmem>>, vector<2x6xf32>
    tpu.vector_store %arg47[%c0_220, %c0_221], %776 {strides = array<i32>} : memref<2x6xf32, #tpu.memory_space<vmem>>, vector<2x6xf32>,
    %778 = tpu.concatenate %248, %347, %446, %545, %644, %743 in 1 : vector<2x1xf32>, vector<2x1xf32>, vector<2x1xf32>, vector<2x1xf32>, vector<2x1xf32>, vector<2x1xf32> -> vector<2x6xf32>
    %c0_222 = arith.constant 0 : index
    %c0_223 = arith.constant 0 : index
    %779 = vector.load %arg48[%c0_222, %c0_223] : memref<2x6xf32, #tpu.memory_space<vmem>>, vector<2x6xf32>
    tpu.vector_store %arg48[%c0_222, %c0_223], %778 {strides = array<i32>} : memref<2x6xf32, #tpu.memory_space<vmem>>, vector<2x6xf32>,
    return
  }
}

</mosaic_0001>

<bundles_post_ra>
// kernel: _lambda_.1
= control target key start
LH: loop header
LB: loop body
LE: loop exit
PB: predicated region body
PF: predicated region fallthrough
CT: control target
= control target key end

     0   :  { %s3904_s6 = smov 1   ;;  %s3905_s10 = smov 2   ;;  %s5396_s0 = inlined_call_operand.smem [shape: u32[49], index: -1, kind: input, shape index: {}] }
   0x1   :  { %s3971_s5 = sld [smem:[%s5396_s0]]   ;;  %s3906_s14 = smov 3  }
   0x2   :  { %s3976_s9 = sld [smem:[%s5396_s0 + %s3904_s6]]   ;;  %s3907_s18 = smov 4  }
   0x3   :  { %s3981_s13 = sld [smem:[%s5396_s0 + %s3905_s10]]   ;;  %s3908_s22 = smov 5  }
   0x4   :  { %s3986_s17 = sld [smem:[%s5396_s0 + %s3906_s14]]   ;;  %s3909_s26 = smov 6  }
   0x5   :  { %s3991_s21 = sld [smem:[%s5396_s0 + %s3907_s18]]   ;;  %s3910_s30 = smov 7  }
   0x6   :  { %s3996_s25 = sld [smem:[%s5396_s0 + %s3908_s22]]   ;;  %s3911_s4 = smov 8  }
   0x7   :  { %5423 = sst [smem:[#allocation11_spill]] %s3971_s5  ;;  %s3912_s10 = smov 9  }
   0x8   :  { %5424 = sst [smem:[#allocation12_spill]] %s3976_s9  ;;  %s3913_s15 = smov 10  }
   0x9   :  { %5425 = sst [smem:[#allocation13_spill]] %s3981_s13  ;;  %s3914_s20 = smov 11  }
   0xa   :  { %s4001_s29 = sld [smem:[%s5396_s0 + %s3909_s26]]   ;;  %s3915_s26 = smov 12  }
   0xb   :  { %s4006_s3 = sld [smem:[%s5396_s0 + %s3910_s30]]   ;;  %s3916_s1 = smov 13  }
   0xc   :  { %s4011_s8 = sld [smem:[%s5396_s0 + %s3911_s4]]   ;;  %s3917_s7 = smov 14  }
   0xd   :  { %s4016_s14 = sld [smem:[%s5396_s0 + %s3912_s10]]   ;;  %s3919_s22 = smov 16  }
   0xe   :  { %s4021_s19 = sld [smem:[%s5396_s0 + %s3913_s15]]   ;;  %s3918_s15 = smov 15  }
   0xf   :  { %s4026_s24 = sld [smem:[%s5396_s0 + %s3914_s20]]   ;;  %s3920_s28 = smov 17  }
  0x10   :  { %s4031_s30 = sld [smem:[%s5396_s0 + %s3915_s26]]   ;;  %s3946_s16 = smov 43  }
  0x11   :  { %s4036_s6 = sld [smem:[%s5396_s0 + %s3916_s1]]   ;;  %s3947_s23 = smov 45  }
  0x12   :  { %5426 = sst [smem:[#allocation14_spill]] %s4011_s8  ;;  %s3948_s1 = smov 47  }
  0x13   :  { %5427 = sst [smem:[#allocation15_spill]] %s4016_s14  ;;  %s3949_s10 = smov 48  }
  0x14   :  { %s4041_s12 = sld [smem:[%s5396_s0 + %s3917_s7]]   ;;  %s3921_s7 = smov 18  }
  0x15   :  { %s4046_s20 = sld [smem:[%s5396_s0 + %s3918_s15]]   ;;  %s3922_s15 = smov 19  }
  0x16   :  { %s4051_s27 = sld [smem:[%s5396_s0 + %s3919_s22]]   ;;  %s3923_s22 = smov 20  }
  0x17   :  { %s4056_s4 = sld [smem:[%s5396_s0 + %s3920_s28]]   ;;  %s3924_s28 = smov 21  }
  0x18   :  { %s4061_s9 = sld [smem:[%s5396_s0 + %s3921_s7]]   ;;  %s3925_s7 = smov 22  }
  0x19   :  { %s4066_s8 = sld [smem:[%s5396_s0 + %s3922_s15]]   ;;  %s3926_s15 = smov 23  }
  0x1a   :  { %s4071_s14 = sld [smem:[%s5396_s0 + %s3923_s22]]   ;;  %s3927_s22 = smov 24  }
  0x1b   :  { %5428 = sst [smem:[#allocation16_spill]] %s4046_s20 }
  0x1c   :  { %s4081_s20 = sld [smem:[%s5396_s0 + %s3925_s7]]   ;;  %s3929_s7 = smov 26  }
  0x1d   :  { %5429 = sst [smem:[#allocation17_spill]] %s4056_s4 }
  0x1e   :  { %s4076_s4 = sld [smem:[%s5396_s0 + %s3924_s28]]   ;;  %s3928_s28 = smov 25  }
  0x1f   :  { %5430 = sst [smem:[#allocation18_spill]] %s4066_s8 }
  0x20   :  { %5431 = sst [smem:[#allocation19_spill]] %s4071_s14 }
  0x21   :  { %s4086_s8 = sld [smem:[%s5396_s0 + %s3926_s15]]   ;;  %s3930_s15 = smov 27  }
  0x22   :  { %s4091_s14 = sld [smem:[%s5396_s0 + %s3927_s22]]   ;;  %s3931_s22 = smov 28  }
  0x23   :  { %s4101_s13 = sld [smem:[%s5396_s0 + %s3929_s7]]   ;;  %s3933_s7 = smov 30  }
  0x24   :  { %5432 = sst [smem:[#allocation20_spill]] %s4076_s4 }
  0x25   :  { %s4096_s4 = sld [smem:[%s5396_s0 + %s3928_s28]]   ;;  %s3932_s28 = smov 29  }
  0x26   :  { %s4199_s5 = sld [smem:[%s5396_s0 + %s3949_s10]]  }
  0x27   :  { %5433 = sst [smem:[#allocation21_spill]] %s4086_s8 }
  0x28   :  { %5434 = sst [smem:[#allocation22_spill]] %s4091_s14 }
  0x29   :  { %5436 = sst [smem:[#allocation24_spill]] %s4101_s13 }
  0x2a   :  { %s4106_s8 = sld [smem:[%s5396_s0 + %s3930_s15]]   ;;  %s3934_s15 = smov 31  }
  0x2b   :  { %5435 = sst [smem:[#allocation23_spill]] %s4096_s4 }
  0x2c   :  { %s4111_s14 = sld [smem:[%s5396_s0 + %s3931_s22]]   ;;  %s3935_s22 = smov 32  }
  0x2d   :  { %s4116_s4 = sld [smem:[%s5396_s0 + %s3932_s28]]   ;;  %s3936_s28 = smov 33  }
  0x2e   :  { %s4121_s13 = sld [smem:[%s5396_s0 + %s3933_s7]]   ;;  %s3937_s7 = smov 34  }
  0x30   :  { %5437 = sst [smem:[#allocation25_spill]] %s4106_s8 }
  0x31   :  { %s4126_s8 = sld [smem:[%s5396_s0 + %s3934_s15]]   ;;  %s3938_s15 = smov 35  }
  0x32   :  { %5438 = sst [smem:[#allocation26_spill]] %s4111_s14 }
  0x33   :  { %5439 = sst [smem:[#allocation27_spill]] %s4116_s4 }
  0x34   :  { %5440 = sst [smem:[#allocation28_spill]] %s4121_s13 }
  0x35   :  { %s4131_s14 = sld [smem:[%s5396_s0 + %s3935_s22]]   ;;  %s3939_s22 = smov 36  }
  0x36   :  { %s4136_s4 = sld [smem:[%s5396_s0 + %s3936_s28]]   ;;  %s3940_s28 = smov 37  }
  0x37   :  { %5441 = sst [smem:[#allocation29_spill]] %s4126_s8 }
  0x38   :  { %s4141_s13 = sld [smem:[%s5396_s0 + %s3937_s7]]   ;;  %s3941_s7 = smov 38  }
  0x39   :  { %s4146_s8 = sld [smem:[%s5396_s0 + %s3938_s15]]   ;;  %s3942_s15 = smov 39  }
  0x3b   :  { %5442 = sst [smem:[#allocation30_spill]] %s4131_s14 }
  0x3c   :  { %5443 = sst [smem:[#allocation31_spill]] %s4136_s4 }
  0x3d   :  { %s4151_s14 = sld [smem:[%s5396_s0 + %s3939_s22]]   ;;  %s3943_s22 = smov 40  }
  0x3e   :  { %5444 = sst [smem:[#allocation32_spill]] %s4141_s13 }
  0x3f   :  { %5445 = sst [smem:[#allocation33_spill]] %s4146_s8 }
  0x40   :  { %s4156_s4 = sld [smem:[%s5396_s0 + %s3940_s28]]   ;;  %s3944_s28 = smov 41  }
  0x41   :  { %s4161_s13 = sld [smem:[%s5396_s0 + %s3941_s7]]   ;;  %s3945_s7 = smov 42  }
  0x42   :  { %s4166_s8 = sld [smem:[%s5396_s0 + %s3942_s15]]  }
  0x43   :  { %5446 = sst [smem:[#allocation34_spill]] %s4151_s14 }
  0x44   :  { %s4171_s14 = sld [smem:[%s5396_s0 + %s3943_s22]]  }
  0x46   :  { %5447 = sst [smem:[#allocation35_spill]] %s4156_s4 }
  0x47   :  { %5448 = sst [smem:[#allocation36_spill]] %s4161_s13 }
  0x48   :  { %5449 = sst [smem:[#allocation37_spill]] %s4166_s8 }
  0x49   :  { %s4176_s4 = sld [smem:[%s5396_s0 + %s3944_s28]]  }
  0x4a   :  { %5450 = sst [smem:[#allocation38_spill]] %s4171_s14 }
  0x4b   :  { %s3534_s13 = sld [smem:[%s5396_s0 + %s3945_s7]]  }
  0x4c   :  { %s4184_s8 = sld [smem:[%s5396_s0 + %s3946_s16]]   ;;  %s3950_s16 = smov 44  }
  0x4d   :  { %s4189_s14 = sld [smem:[%s5396_s0 + %s3947_s23]]   ;;  %s3951_s23 = smov 46  }
  0x4f   :  { %5451 = sst [smem:[#allocation39_spill]] %s4176_s4 }
  0x50   :  { %s4194_s4 = sld [smem:[%s5396_s0 + %s3948_s1]]  }
  0x51   :  { %v103_v0 = vstv %s3534_s13 }
  0x52   :  { %5452 = sst [smem:[#allocation40_spill]] %s4184_s8  ;;  %104 = vst [vmem:[#allocation2] sm:$0x1] %v103_v0 }
  0x53   :  { %5453 = sst [smem:[#allocation41_spill]] %s4189_s14 }
  0x54   :  { %s3536_s8 = sld [smem:[%s5396_s0 + %s3950_s16]]  }
  0x55   :  { %s3538_s14 = sld [smem:[%s5396_s0 + %s3951_s23]]  }
  0x5a   :  { %v105_v1 = vstv %s3536_s8 }
  0x5b   :  { %106 = vst [vmem:[#allocation3] sm:$0x1] %v105_v1  ;;  %v107_v2 = vstv %s3538_s14 }
  0x5c   :  { %108 = vst [vmem:[#allocation4] sm:$0x1] %v107_v2 }
  0x5d   :  { %109 = vsyncpa [#allocation6], 0  ;;  %v222_v3 = vld [vmem:[%s4021_s19 + $0x18] sm:$0xff]  ;;  %v221_v5 = vld [vmem:[%s4021_s19 + $0x10] sm:$0xff]  ;;  %vm223_vm0 = vcmask 261120  }
  0x5e   :  { %v258_v4 = vld [vmem:[%s4026_s24 + $0x18] sm:$0xff]  ;;  %242 = vmatpush.msra.mxu0 %v222_v3  ;;  %3627 = vmatpush.msra.mxu3 %v222_v3  ;;  %v257_v6 = vld [vmem:[%s4026_s24 + $0x10] sm:$0xff]  ;;  %v220_v7 = vld [vmem:[%s4021_s19 + $0x8] sm:$0xff] }
  0x5f   :  { %277 = vmatpush.msra.mxu1 %v258_v4  ;;  %v256_v8 = vld [vmem:[%s4026_s24 + $0x8] sm:$0xff]  ;;  %v219_v9 = vld [vmem:[%s4021_s19] sm:$0xff]  ;;  %v293_v10 = vld [vmem:[%s4031_s30 + $0x18] sm:$0xff] }
  0x60   :  { %243 = vmatpush.msra.mxu0 %v221_v5  ;;  %3628 = vmatpush.msra.mxu3 %v221_v5  ;;  %v255_v11 = vld [vmem:[%s4026_s24] sm:$0xff]  ;;  %v218_v13 = vld [vmem:[%s3991_s21 + $0x8] sm:$0xff]  ;;  %v328_v15 = vld [vmem:[%s4036_s6 + $0x18] sm:$0xff] }
  0x61   :  { %278 = vmatpush.msra.mxu1 %v257_v6  ;;  %v217_v12 = vld [vmem:[%s3991_s21] sm:$0xff]  ;;  %312 = vmatpush.msra.mxu2 %v293_v10  ;;  %v327_v16 = vld [vmem:[%s4036_s6 + $0x10] sm:$0xff]  ;;  %v291_v18 = vld [vmem:[%s4031_s30 + $0x8] sm:$0xff] }
  0x62   :  { %244 = vmatpush.msra.mxu0 %v220_v7  ;;  %3629 = vmatpush.msra.mxu3 %v220_v7  ;;  %v253_v14 = vld [vmem:[%s3996_s25] sm:$0xff]  ;;  %v292_v17 = vld [vmem:[%s4031_s30 + $0x10] sm:$0xff]  ;;  %v326_v19 = vld [vmem:[%s4036_s6 + $0x8] sm:$0xff] }
  0x63   :  { %279 = vmatpush.msra.mxu1 %v256_v8  ;;  %v290_v20 = vld [vmem:[%s4031_s30] sm:$0xff]  ;;  %313 = vmatpush.msra.mxu2 %v292_v17  ;;  %v254_v23 = vld [vmem:[%s3996_s25 + $0x8] sm:$0xff] }
  0x64   :  { %245 = vmatpush.msra.mxu0 %v219_v9  ;;  %3630 = vmatpush.msra.mxu3 %v219_v9  ;;  %v288_v21 = vld [vmem:[%s4001_s29] sm:$0xff] }
  0x65   :  { %280 = vmatpush.msra.mxu1 %v255_v11  ;;  %3541 = vmatmul.msk.f32.vlgmr.msra.gmra.mxu0 %vm223_vm0, %v217_v12  ;;  %v325_v22 = vld [vmem:[%s4036_s6] sm:$0xff] }
  0x66   :  { %3542 = vmatmul.msk.f32.vlgmr.msra.gmra.mxu3 %vm223_vm0, %v218_v13  ;;  %3543 = vmatmul.msk.f32.vlgmr.msra.gmra.mxu1 %vm223_vm0, %v253_v14  ;;  %v323_v24 = vld [vmem:[%s4006_s3] sm:$0xff] }
  0x67   :  { %347 = vmatpush.msrb.mxu3 %v328_v15  ;;  %314 = vmatpush.msra.mxu2 %v291_v18 }
  0x69   :  { %348 = vmatpush.msrb.mxu3 %v327_v16  ;;  %315 = vmatpush.msra.mxu2 %v290_v20 }
  0x6b   :  { %349 = vmatpush.msrb.mxu3 %v326_v19 }
  0x6c   :  { %110 = vsyncpa [#allocation8], 0  ;;  %3545 = vmatmul.msk.f32.vlgmr.msra.gmra.mxu2 %vm223_vm0, %v288_v21  ;;  %v289_v25 = vld [vmem:[%s4001_s29 + $0x8] sm:$0xff]  ;;  %v369_v27 = vld [vmem:[%s4041_s12 + $0x18] sm:$0xff]  ;;  %s5454_s0 = sld [smem:[#allocation11_spill]]  ;;  %v5413_v38 = vmov 0  }
  0x6d   :  { %350 = vmatpush.msrb.mxu3 %v325_v22  ;;  %v324_v26 = vld [vmem:[%s4006_s3 + $0x8] sm:$0xff]  ;;  %392 = vmatpush.msrb.mxu0 %v369_v27  ;;  %v368_v28 = vld [vmem:[%s4041_s12 + $0x10] sm:$0xff]  ;;  %v414_v30 = vld [vmem:[%s4051_s27 + $0x18] sm:$0xff]  ;;  %s5457_s13 = sld [smem:[#allocation13_spill]]  ;;  %vm727_vm1 = vcmask 130048   ;;  %s3953_s11 = smov 32  }
  0x6e   :  { %3544 = vmatmul.msk.f32.gmra.mxu1 %vm223_vm0, %v254_v23  ;;  %3547 = vmatmul.msk.f32.vlgmr.msrb.gmra.mxu3 %vm223_vm0, %v323_v24  ;;  %v367_v29 = vld [vmem:[%s4041_s12 + $0x8] sm:$0xff]  ;;  %v366_v31 = vld [vmem:[%s4041_s12] sm:$0xff]  ;;  %v413_v32 = vld [vmem:[%s4051_s27 + $0x10] sm:$0xff]  ;;  %s5458_s21 = sld [smem:[#allocation19_spill]]  ;;  %vm579_vm2 = vcmask 64512   ;;  %s3954_s18 = smov 96  }
  0x6f   :  { %393 = vmatpush.msrb.mxu0 %v368_v28  ;;  %437 = vmatpush.msrb.mxu1 %v414_v30  ;;  %v412_v33 = vld [vmem:[%s4051_s27 + $0x8] sm:$0xff]  ;;  %v411_v34 = vld [vmem:[%s4051_s27] sm:$0xff]  ;;  %v4248_v35 = vld [vmem:[%s4061_s9 + $0x18] sm:$0xff]  ;;  %s5459_s25 = sld [smem:[#allocation22_spill]]  ;;  %s3955_s23 = smov 64   ;;  %vm1329_vm11 = vcmask 1041409  }
  0x70   :  { %v605_v36 = vld [vmem:[%s4081_s20 + $0x18] sm:$0xff]  ;;  %v4252_v37 = vld [vmem:[%s3986_s17] sm:$0xff]  ;;  %3690 = vset.pattern.permute.xlu0 %v5413_v38  ;;  %476 = vmatpush.msrb.mxu2 %v4248_v35  ;;  %v4261_v40 = vld [vmem:[%s4061_s9 + $0x10] sm:$0xff]  ;;  %s5460_s29 = sld [smem:[#allocation24_spill]]  ;;  %vm1332_vm12 = vcmask 254976  }
  0x71   :  { %394 = vmatpush.msrb.mxu0 %v367_v29  ;;  %438 = vmatpush.msrb.mxu1 %v413_v32  ;;  %5455 = vst [vmem:[#allocation42_spill] sm:$0xff] %v4252_v37  ;;  %v4257_v39 = vsub.f32 1.0, %v4252_v37  ;;  %v604_v41 = vld [vmem:[%s4081_s20 + $0x10] sm:$0xff]  ;;  %v4284_v6 = vld [vmem:[%s4061_s9 + $0x8] sm:$0xff]  ;;  %v4290_v9 = vld [vmem:[%s4061_s9] sm:$0xff]  ;;  %v4308_v22 = vrot.slane %v4252_v37, 1 }
  0x72   :  { %1113 = vst [vmem:[#allocation1] sm:$0xff] %v4252_v37  ;;  %v4265_v42 = vld [vmem:[%s5454_s0] sm:$0xff]  ;;  %3691 = vset.pattern.permute.xlu1 %v5413_v38  ;;  %477 = vmatpush.msrb.mxu2 %v4261_v40  ;;  %v4273_v49 = vld [vmem:[%s5454_s0 + $0x8] sm:$0xff]  ;;  %s5461_s9 = sld [smem:[#allocation16_spill]] }
  0x73   :  { %395 = vmatpush.msrb.mxu0 %v366_v31  ;;  %439 = vmatpush.msrb.mxu1 %v412_v33  ;;  %5456 = vst [vmem:[#allocation43_spill] sm:$0xff] %v4257_v39  ;;  %v209_v57 = vld [vmem:[%s5457_s13] sm:$0xff]  ;;  %v210_v0 = vld [vmem:[%s5457_s13 + $0x8] sm:$0xff]  ;;  %s5462_s3 = sld [smem:[#allocation27_spill]] }
  0x74   :  { %3546 = vmatmul.msk.f32.gmra.mxu2 %vm223_vm0, %v289_v25  ;;  %526 = vperm.xlu0 %3690, %v4257_v39   ;;  %v603_v7 = vld [vmem:[%s4081_s20 + $0x8] sm:$0xff]  ;;  %v490_v8 = vld [vmem:[%s5458_s21 + $0x18] sm:$0xff]  ;;  %v602_v10 = vld [vmem:[%s4081_s20] sm:$0xff]  ;;  %s5463_s8 = sld [smem:[#allocation32_spill]] }
  0x75   :  { %440 = vmatpush.msrb.mxu1 %v411_v34  ;;  %3692 = vset.pattern.permute.xlu2 %v5413_v38  ;;  %v489_v11 = vld [vmem:[%s5458_s21 + $0x10] sm:$0xff]  ;;  %v488_v13 = vld [vmem:[%s5458_s21 + $0x8] sm:$0xff]  ;;  %v636_v15 = vld [vmem:[%s5459_s25 + $0x18] sm:$0xff]  ;;  %s5465_s14 = sld [smem:[#allocation34_spill]] }
  0x76   :  { %3548 = vmatmul.msk.f32.gmra.mxu3 %vm223_vm0, %v324_v26  ;;  %478 = vmatpush.msrb.mxu2 %v4284_v6  ;;  %v724_v17 = vld [vmem:[%s5460_s29 + $0x18] sm:$0xff]  ;;  %v487_v18 = vld [vmem:[%s5458_s21] sm:$0xff]  ;;  %v635_v20 = vld [vmem:[%s5459_s25 + $0x10] sm:$0xff]  ;;  %s5466_s19 = sld [smem:[#allocation15_spill]] }
  0x77   :  { %622 = vmatpush.msra.mxu1 %v605_v36  ;;  %513 = vmatpush.msra.mxu3 %v490_v8  ;;  %v723_v21 = vld [vmem:[%s5460_s29 + $0x10] sm:$0xff]  ;;  %v634_v23 = vld [vmem:[%s5459_s25 + $0x8] sm:$0xff]  ;;  %v633_v26 = vld [vmem:[%s5459_s25] sm:$0xff]  ;;  %s5467_s24 = sld [smem:[#allocation14_spill]] }
  0x78   :  { %479 = vmatpush.msrb.mxu2 %v4290_v9  ;;  %v722_v24 = vld [vmem:[%s5460_s29 + $0x8] sm:$0xff]  ;;  %v721_v27 = vld [vmem:[%s5460_s29] sm:$0xff]  ;;  %s5468_s30 = sld [smem:[#allocation25_spill]] }
  0x79   :  { %623 = vmatpush.msra.mxu1 %v604_v41  ;;  %514 = vmatpush.msra.mxu3 %v489_v11  ;;  %v4295_v12 = vld [vmem:[#allocation1 + $0x2] ss:$9 sm:$0xff]  ;;  %v3728_v34 = vld [vmem:[%s5461_s9] ss:$0 sm:$0xff]  ;;  %s5469_s6 = sld [smem:[#allocation18_spill]]  ;;  %s3956_s9 = smov 1  }
  0x7a   :  { %v1193_v14 = vmul.f32 %v4295_v12, %v4252_v37  ;;  %653 = vmatpush.msra.mxu2 %v636_v15  ;;  %v4303_v19 = vld [vmem:[#allocation1 + $0x3] ss:$9 sm:$0xff]  ;;  %s5470_s12 = sld [smem:[#allocation30_spill]] }
  0x7b   :  { %624 = vmatpush.msra.mxu1 %v603_v7  ;;  %515 = vmatpush.msra.mxu3 %v488_v13  ;;  %v1194_v25 = vmul.f32 %v4308_v22, %v4303_v19  ;;  %v4317_v29 = vld [vmem:[%s3986_s17 + $0x8] sm:$0xff]  ;;  %v4323_v31 = vsub.f32 1.0, %v4303_v19  ;;  %s5464_s17 = sld [smem:[#allocation17_spill]] }
  0x7c   :  { %538 = vperm.xlu0 %3690, %v4252_v37   ;;  %v1197_v16 = vperm.slane %v1193_v14, 0  ;;  %654 = vmatpush.msra.mxu2 %v635_v20  ;;  %v4320_v30 = vsub.f32 1.0, %v4317_v29  ;;  %s5471_s20 = sld [smem:[#allocation20_spill]] }
  0x7d   :  { %625 = vmatpush.msra.mxu1 %v602_v10  ;;  %516 = vmatpush.msra.mxu3 %v487_v18  ;;  %v1198_v28 = vperm.slane %v1194_v25, 0  ;;  %v1246_v32 = vmul.f32 %v4323_v31, %v4308_v22  ;;  %s5472_s27 = sld [smem:[#allocation21_spill]]  ;;  %v4419_v10 = vsub.f32 1.0, %v4295_v12 }
  0x7e   :  { %655 = vmatpush.msra.mxu2 %v634_v23  ;;  %531 = vperm.xlu1 %3691, %v4320_v30   ;;  %v726_v7 = vld [vmem:[%s5468_s30 + $0x8] sm:$0xff]  ;;  %s5473_s1 = sld [smem:[#allocation23_spill]] }
  0x7f   :  { %v1250_v33 = vperm.slane %v1246_v32, 0  ;;  %v1177_v14 = vmul.f32 %v4419_v10, %v4257_v39  ;;  %v4426_v15 = vld [vmem:[%s5469_s6] ss:$0 sm:$0xff]  ;;  %s5475_s28 = sld [smem:[#allocation29_spill]] }
  0x80   :  { %656 = vmatpush.msra.mxu2 %v633_v26  ;;  %v866_v18 = vld [vmem:[%s5470_s12 + $0x8] sm:$0xff]  ;;  %v865_v25 = vld [vmem:[%s5470_s12] sm:$0xff]  ;;  %s5479_s2 = sld [smem:[#allocation33_spill]] }
  0x81   :  { %s5480_s10 = sld [smem:[#allocation12_spill]] }
  0x82   :  { %v3734_v20 = vld [vmem:[%s5471_s20] ss:$0 sm:$0xff]  ;;  %s5481_s7 = sld [smem:[#allocation28_spill]]  ;;  %s3868_s20 = scalar_lea.hbm %s4194_s4, 2 }
  0x83   :  { %s5482_s16 = sld [smem:[#allocation26_spill]] }
  0x84   :  { %1200 = vperm.xlu0 %3690, %v1197_v16   ;;  %v3735_v23 = vld [vmem:[%s5473_s1] ss:$0 sm:$0xff]  ;;  %s5484_s15 = sld [smem:[#allocation31_spill]] }
  0x85   :  { %s5491_s22 = sld [smem:[#allocation35_spill]] }
  0x86   :  { %543 = vperm.xlu1 %3691, %v4317_v29   ;;  %s5492_s26 = sld [smem:[#allocation36_spill]] }
  0x87   :  { %s5493_s13 = sld [smem:[#allocation37_spill]] }
  0x88   :  { %s5503_s21 = sld [smem:[#allocation39_spill]] }
  0x89   :  { %s5504_s25 = sld [smem:[#allocation41_spill]] }
  0x8a   :  { %s5505_s29 = sld [smem:[#allocation40_spill]] }
  0x8c   :  { %1204 = vperm.xlu0 %3690, %v1198_v28  }
  0x94   :  { %1256 = vperm.xlu0 %3690, %v1250_v33  }
  0xe2   :  { %v247_v43 = vpop.f32.mrf.mxu0 }
  0xe3   :  { %v358_v44 = vmul.f32 0.3, %v247_v43  ;;  %v282_v45 = vpop.f32.mrf.mxu1  ;;  %v789_v43 = vld [vmem:[%s5462_s3 + $0x18] sm:$0xff] }
  0xe4   :  { %v362_v46 = vmul.f32 0.7, %v282_v45  ;;  %v788_v45 = vld [vmem:[%s5462_s3 + $0x10] sm:$0xff] }
  0xe5   :  { %v360_v47 = vadd.f32 %v358_v44, %v4265_v42  ;;  %v922_v44 = vld [vmem:[%s5463_s8 + $0x18] sm:$0xff] }
  0xe6   :  { %v4421_v11 = vpop.permute.xlu0 %526 }
  0xe7   :  { %v364_v48 = vadd.f32 %v362_v46, %v360_v47  ;;  %v921_v46 = vld [vmem:[%s5463_s8 + $0x10] sm:$0xff]  ;;  %v787_v47 = vld [vmem:[%s5462_s3 + $0x8] sm:$0xff]  ;;  %5474 = vst [vmem:[#allocation44_spill] sm:$0xff] %v4421_v11 }
  0xe9   :  { %v250_v50 = vpop.f32.mrf.mxu3  ;;  %3549 = vmatmul.msk.f32.vlgmr.msrb.gmra.mxu0 %vm223_vm0, %v364_v48  ;;  %v920_v48 = vld [vmem:[%s5463_s8 + $0x8] sm:$0xff] }
  0xea   :  { %v359_v51 = vmul.f32 0.3, %v250_v50  ;;  %v786_v50 = vld [vmem:[%s5462_s3] sm:$0xff]  ;;  %s3957_s3 = smov 2  }
  0xeb   :  { %v285_v52 = vpop.f32.mrf.mxu1 }
  0xec   :  { %v361_v53 = vadd.f32 %v359_v51, %v4273_v49  ;;  %v363_v54 = vmul.f32 0.7, %v285_v52  ;;  %v919_v51 = vld [vmem:[%s5463_s8] sm:$0xff]  ;;  %s3958_s8 = smov 4  }
  0xee   :  { %v365_v55 = vadd.f32 %v363_v54, %v361_v53  ;;  %v3729_v54 = vld [vmem:[%s5464_s17] ss:$0 sm:$0xff]  ;;  %s3959_s17 = smov 3  }
  0xef   :  { %v317_v56 = vpop.f32.mrf.mxu2 }
  0xf0   :  { %v407_v60 = vmul.f32 0.4, %v317_v56 }
  0xf1   :  { %v352_v58 = vpop.f32.mrf.mxu3  ;;  %3550 = vmatmul.msk.f32.gmra.mxu0 %vm223_vm0, %v365_v55 }
  0xf2   :  { %v403_v59 = vmul.f32 0.3, %v352_v58  ;;  %v4359_v58 = vld [vmem:[%s5465_s14 + $0x10] sm:$0xff] }
  0xf4   :  { %v405_v61 = vadd.f32 %v403_v59, %v209_v57  ;;  %v4352_v57 = vld [vmem:[%s5465_s14 + $0x18] sm:$0xff]  ;;  %v4364_v59 = vld [vmem:[%s5465_s14 + $0x8] sm:$0xff] }
  0xf6   :  { %v409_v62 = vadd.f32 %v407_v60, %v405_v61  ;;  %v4369_v61 = vld [vmem:[%s5465_s14] sm:$0xff] }
  0xf7   :  { %v320_v63 = vpop.f32.mrf.mxu2 }
  0xf8   :  { %3551 = vmatmul.msk.f32.vlgmr.msrb.gmra.mxu1 %vm223_vm0, %v409_v62  ;;  %v408_v3 = vmul.f32 0.4, %v320_v63  ;;  %v4396_v63 = vld [vmem:[%s5467_s24 + $0x10] sm:$0xff] }
  0xf9   :  { %v355_v1 = vpop.f32.mrf.mxu3  ;;  %769 = vmatpush.msrb.mxu1 %v724_v17  ;;  %v1181_v17 = vperm.slane %v1177_v14, 0 }
  0xfa   :  { %v404_v2 = vmul.f32 0.3, %v355_v1 }
  0xfb   :  { %770 = vmatpush.msrb.mxu1 %v723_v21  ;;  %v3732_v21 = vld [vmem:[%s5472_s27] ss:$0 sm:$0xff] }
  0xfc   :  { %v406_v4 = vadd.f32 %v404_v2, %v210_v0  ;;  %v4399_v0 = vld [vmem:[%s5467_s24 + $0x8] sm:$0xff] }
  0xfd   :  { %771 = vmatpush.msrb.mxu1 %v722_v24 }
  0xfe   :  { %v410_v5 = vadd.f32 %v408_v3, %v406_v4  ;;  %v1176_v3 = vsub.f32 1.0, %v4308_v22 }
  0xff   :  { %772 = vmatpush.msrb.mxu1 %v721_v27  ;;  %v4436_v27 = vpop.permute.xlu1 %531 }
 0x100   :  { %3552 = vmatmul.msk.f32.gmra.mxu1 %vm223_vm0, %v410_v5  ;;  %v1220_v5 = vmul.f32 %v1176_v3, %v4303_v19  ;;  %5476 = vst [vmem:[#allocation45_spill] sm:$0xff] %v4436_v27 }
 0x102   :  { %v1224_v8 = vperm.slane %v1220_v5, 0 }
 0x166   :  { %v397_v36 = vpop.f32.mrf.mxu0 }
 0x167   :  { %v4329_v41 = vadd.f32 %v3728_v34, %v397_v36 }
 0x169   :  { %3553 = vmatmul.msk.f32.vlgmr.msrb.gmra.mxu2 %vm223_vm0, %v4329_v41  ;;  %3559 = vmatmul.msk.f32.vlgmr.msra.gmra.mxu1 %vm223_vm0, %v4329_v41 }
 0x16a   :  { %806 = vmatpush.msrb.mxu2 %v789_v43  ;;  %939 = vmatpush.msra.mxu1 %v922_v44 }
 0x16c   :  { %807 = vmatpush.msrb.mxu2 %v788_v45  ;;  %940 = vmatpush.msra.mxu1 %v921_v46 }
 0x16e   :  { %v400_v52 = vpop.f32.mrf.mxu0  ;;  %808 = vmatpush.msrb.mxu2 %v787_v47  ;;  %941 = vmatpush.msra.mxu1 %v920_v48 }
 0x16f   :  { %v4344_v53 = vadd.f32 %v3728_v34, %v400_v52  ;;  %v4438_v34 = vpop.permute.xlu0 %538 }
 0x170   :  { %809 = vmatpush.msrb.mxu2 %v786_v50  ;;  %942 = vmatpush.msra.mxu1 %v919_v51  ;;  %5477 = vst [vmem:[#allocation46_spill] sm:$0xff] %v4438_v34  ;;  %v864_v50 = vld [vmem:[%s5475_s28 + $0x18] sm:$0xff] }
 0x171   :  { %3554 = vmatmul.msk.f32.gmra.mxu2 %vm223_vm0, %v4344_v53  ;;  %3560 = vmatmul.msk.f32.gmra.mxu1 %vm223_vm0, %v4344_v53 }
 0x175   :  { %v442_v55 = vpop.f32.mrf.mxu1 }
 0x176   :  { %v443_v56 = vadd.f32 %v3729_v54, %v442_v55 }
 0x178   :  { %3555 = vmatmul.msk.f32.vlgmr.msra.gmra.mxu3 %vm223_vm0, %v443_v56 }
 0x179   :  { %3561 = vmatmul.msk.f32.vlgmr.msra.gmra.mxu2 %vm223_vm0, %v443_v56  ;;  %3567 = vmatmul.msk.f32.vlgmr.msrb.gmra.mxu1 %vm223_vm0, %v4329_v41 }
 0x17a   :  { %1137 = vmatpush.msrb.mxu1 %v4352_v57  ;;  %976 = vmatpush.msra.mxu2 %v4248_v35  ;;  %v1111_v35 = vld [vmem:[%s5466_s19] sm:$0xff]  ;;  %s3961_s19 = smov [#allocation5]  }
 0x17c   :  { %1138 = vmatpush.msrb.mxu1 %v4359_v58  ;;  %977 = vmatpush.msra.mxu2 %v4261_v40  ;;  %v4391_v40 = vld [vmem:[%s5467_s24 + $0x18] sm:$0xff] }
 0x17d   :  { %v445_v60 = vpop.f32.mrf.mxu1  ;;  %568 = vmatpush.msra.mxu0 %v4391_v40  ;;  %688 = vmatpush.msrb.mxu3 %v4391_v40 }
 0x17e   :  { %v446_v62 = vadd.f32 %v3729_v54, %v445_v60  ;;  %1139 = vmatpush.msrb.mxu1 %v4364_v59  ;;  %978 = vmatpush.msra.mxu2 %v4284_v6  ;;  %v863_v54 = vld [vmem:[%s5475_s28 + $0x10] sm:$0xff]  ;;  %v4451_v60 = vpop.permute.xlu1 %543 }
 0x17f   :  { %569 = vmatpush.msra.mxu0 %v4396_v63  ;;  %689 = vmatpush.msrb.mxu3 %v4396_v63  ;;  %5478 = vst [vmem:[#allocation47_spill] sm:$0xff] %v4451_v60 }
 0x180   :  { %3556 = vmatmul.msk.f32.gmra.mxu3 %vm223_vm0, %v446_v62  ;;  %1140 = vmatpush.msrb.mxu1 %v4369_v61 }
 0x181   :  { %3562 = vmatmul.msk.f32.gmra.mxu2 %vm223_vm0, %v446_v62  ;;  %3568 = vmatmul.msk.f32.gmra.mxu1 %vm223_vm0, %v4344_v53 }
 0x182   :  { %979 = vmatpush.msra.mxu2 %v4290_v9  ;;  %570 = vmatpush.msra.mxu0 %v4399_v0  ;;  %v725_v9 = vld [vmem:[%s5468_s30] sm:$0xff]  ;;  %s3468_s30 = sshll.u32 %s4194_s4, 4  ;;  %s3469_s30 = int_to_ptr.hbm [resolvable:$true] %s3468_s30 }
 0x183   :  { %690 = vmatpush.msrb.mxu3 %v4399_v0  ;;  %s3864_s6 = sshra.s32 %s3469_s30, 4  ;;  %s3865_s6 = int_to_ptr.hbm [resolvable:$true] %s3864_s6 }
 0x184   :  { %s3866_s12 = scalar_lea.hbm %s3865_s6, 2  ;;  %p3869_p1 = scmp.lt.s32.totalorder %s3865_s6, %s4194_s4 }
 0x185   :  { %p3867_p0 = scmp.ne.s32.totalorder %s3865_s6, %s3866_s12  ;;  %p3870_p2 = scmp.lt.s32.totalorder %s3868_s20, %s3866_s12 }
 0x187   :  { %p3871_p3 = por %p3870_p2, %p3869_p1 }
 0x189   :  { %3569 = vmatmul.msk.f32.vlgmr.msrb.gmra.mxu2 %vm223_vm0, %v443_v56  ;;  %3577 = vmatmul.msk.f32.vlgmr.msra.gmra.mxu1 %vm223_vm0, %v443_v56  ;;  %p3872_p4 = pnand %p3871_p3, %p3867_p0 }
 0x191   :  { %3578 = vmatmul.msk.f32.gmra.mxu1 %vm223_vm0, %v446_v62  ;;  %3570 = vmatmul.msk.f32.gmra.mxu2 %vm223_vm0, %v446_v62 }
 0x199   :  { %3585 = vmatmul.msk.f32.vlgmr.msrb.gmra.mxu1 %vm223_vm0, %v1111_v35  ;;  %3579 = vmatmul.msk.f32.vlgmr.msra.gmra.mxu2 %vm223_vm0, %v4265_v42  ;;  %v4406_v42 = vld [vmem:[%s5467_s24] sm:$0xff]  ;;  %s5372_s24 = sshll.u32 %s3961_s19, 4  ;;  %s3467_s24 = int_to_ptr.vmem [resolvable:$true] %s5372_s24 }
 0x19a   :  { %571 = vmatpush.msra.mxu0 %v4406_v42  ;;  %691 = vmatpush.msrb.mxu3 %v4406_v42 }
 0x19c   :  { %748 = vmatpush.msrb.mxu0 %v726_v7  ;;  %881 = vmatpush.msra.mxu3 %v866_v18  ;;  %v1201_v18 = vpop.permute.xlu0 %1200 }
 0x19e   :  { %749 = vmatpush.msrb.mxu0 %v725_v9  ;;  %882 = vmatpush.msra.mxu3 %v865_v25 }
 0x1a1   :  { %3586 = vmatmul.msk.f32.gmra.mxu1 %vm223_vm0, %v1111_v35  ;;  %3580 = vmatmul.msk.f32.gmra.mxu2 %vm223_vm0, %v4273_v49  ;;  %v1219_v49 = vmul.f32 %v4295_v12, %v4257_v39 }
 0x1a3   :  { %v1223_v2 = vperm.slane %v1219_v49, 0  ;;  %v862_v49 = vld [vmem:[%s5475_s28 + $0x8] sm:$0xff] }
 0x1a5   :  { %1226 = vperm.xlu1 %3691, %v1223_v2  }
 0x1ad   :  { %1230 = vperm.xlu1 %3691, %v1224_v8  }
 0x1b5   :  { %1184 = vperm.xlu1 %3691, %v1181_v17   ;;  %v207_v17 = vld [vmem:[%s5480_s10] sm:$0xff] }
 0x1e6   :  { %v627_v1 = vpop.f32.mrf.mxu1 }
 0x1e7   :  { %v628_v26 = vadd.f32 %v3732_v21, %v627_v1 }
 0x1e9   :  { %v664_v46 = vmul.f32 %v628_v26, %v4421_v11 }
 0x1ec   :  { %v481_v4 = vpop.f32.mrf.mxu2 }
 0x1ed   :  { %v482_v24 = vadd.f32 %v4426_v15, %v481_v4 }
 0x1ee   :  { %v630_v6 = vpop.f32.mrf.mxu1 }
 0x1ef   :  { %v534_v43 = vmul.f32 %v4421_v11, %v482_v24  ;;  %v631_v55 = vadd.f32 %v3732_v21, %v630_v6  ;;  %v861_v6 = vld [vmem:[%s5475_s28] sm:$0xff]  ;;  %v208_v21 = vld [vmem:[%s5480_s10 + $0x8] sm:$0xff] }
 0x1f1   :  { %v665_v8 = vmul.f32 %v631_v55, %v4436_v27 }
 0x1f4   :  { %v484_v13 = vpop.f32.mrf.mxu2 }
 0x1f5   :  { %v485_v52 = vadd.f32 %v4426_v15, %v484_v13  ;;  %v3736_v13 = vld [vmem:[%s5479_s2] ss:$0 sm:$0xff] }
 0x1f6   :  { %v4428_v16 = vpop.f32.mrf.mxu1 }
 0x1f7   :  { %v535_v2 = vmul.f32 %v4436_v27, %v485_v52 }
 0x1fb   :  { %v518_v28 = vpop.f32.mrf.mxu3 }
 0x1fc   :  { %v519_v32 = vadd.f32 %v3734_v20, %v518_v28  ;;  %v658_v33 = vpop.f32.mrf.mxu2 }
 0x1fd   :  { %v659_v36 = vadd.f32 %v3735_v23, %v658_v33 }
 0x1fe   :  { %v546_v44 = vmul.f32 %v4438_v34, %v519_v32  ;;  %v4442_v45 = vpop.f32.mrf.mxu1 }
 0x1ff   :  { %v666_v47 = vmul.f32 %v659_v36, %v4438_v34 }
 0x200   :  { %v548_v48 = vadd.f32 %v546_v44, %v534_v43 }
 0x201   :  { %v668_v51 = vadd.f32 %v666_v47, %v664_v46 }
 0x202   :  { %3557 = vmatmul.msk.f32.vlgmr.msra.gmra.mxu0 %vm223_vm0, %v548_v48 }
 0x203   :  { %v521_v56 = vpop.f32.mrf.mxu3  ;;  %3563 = vmatmul.msk.f32.vlgmr.msrb.gmra.mxu3 %vm223_vm0, %v668_v51  ;;  %902 = vmatpush.msra.mxu0 %v864_v50 }
 0x204   :  { %v522_v62 = vadd.f32 %v3734_v20, %v521_v56  ;;  %v661_v35 = vpop.f32.mrf.mxu2  ;;  %1005 = vmatpush.msrb.mxu3 %v4391_v40 }
 0x205   :  { %v662_v1 = vadd.f32 %v3735_v23, %v661_v35  ;;  %903 = vmatpush.msra.mxu0 %v863_v54 }
 0x206   :  { %v4456_v4 = vpop.f32.mrf.mxu1  ;;  %v547_v5 = vmul.f32 %v4451_v60, %v522_v62  ;;  %1006 = vmatpush.msrb.mxu3 %v4396_v63  ;;  %v3739_v62 = vld [vmem:[%s5484_s15] ss:$0 sm:$0xff] }
 0x207   :  { %v667_v7 = vmul.f32 %v662_v1, %v4451_v60  ;;  %904 = vmatpush.msra.mxu0 %v862_v49 }
 0x208   :  { %v549_v9 = vadd.f32 %v547_v5, %v535_v2  ;;  %1007 = vmatpush.msrb.mxu3 %v4399_v0 }
 0x209   :  { %v669_v40 = vadd.f32 %v667_v7, %v665_v8  ;;  %905 = vmatpush.msra.mxu0 %v861_v6  ;;  %v945_v8 = vadd.f32 %v3736_v13, %v4456_v4 }
 0x20a   :  { %3558 = vmatmul.msk.f32.gmra.mxu0 %vm223_vm0, %v549_v9  ;;  %1008 = vmatpush.msrb.mxu3 %v4406_v42  ;;  %v1178_v42 = vmul.f32 %v1176_v3, %v4323_v31 }
 0x20b   :  { %3564 = vmatmul.msk.f32.gmra.mxu3 %vm223_vm0, %v669_v40 }
 0x20c   :  { %v1182_v23 = vperm.slane %v1178_v42, 0  ;;  %v811_v32 = vpop.f32.mrf.mxu2  ;;  %v952_v42 = vmul.f32 %v945_v8, %v4438_v34 }
 0x20e   :  { %v947_v14 = vpop.f32.mrf.mxu1  ;;  %1188 = vperm.xlu1 %3691, %v1182_v23  }
 0x20f   :  { %v948_v63 = vadd.f32 %v3736_v13, %v947_v14 }
 0x211   :  { %v953_v5 = vmul.f32 %v948_v63, %v4451_v60 }
 0x212   :  { %3565 = vmatmul.msk.f32.vlgmr.msrb.gmra.mxu0 %vm727_vm1, %v207_v17 }
 0x213   :  { %3573 = vmatmul.msk.f32.vlgmr.msra.gmra.mxu3 %vm727_vm1, %v207_v17 }
 0x216   :  { %v4469_v20 = vpop.f32.mrf.mxu1 }
 0x217   :  { %v1207_v0 = vmul.f32 %v1201_v18, %v4469_v20 }
 0x219   :  { %1211 = vrot.lane.b32.xlu0 %v1207_v0, %s3953_s11 }
 0x21a   :  { %3566 = vmatmul.msk.f32.gmra.mxu0 %vm727_vm1, %v208_v21 }
 0x21b   :  { %3574 = vmatmul.msk.f32.gmra.mxu3 %vm727_vm1, %v208_v21 }
 0x222   :  { %3575 = vmatmul.msk.f32.vlgmr.msra.gmra.mxu0 %vm223_vm0, %v4329_v41  ;;  %v3737_v41 = vld [vmem:[%s5481_s7] ss:$0 sm:$0xff] }
 0x223   :  { %v812_v36 = vadd.f32 %v3737_v41, %v811_v32 }
 0x225   :  { %v819_v44 = vmul.f32 %v812_v36, %v4438_v34 }
 0x22a   :  { %3576 = vmatmul.msk.f32.gmra.mxu0 %vm223_vm0, %v4344_v53  ;;  %v3738_v53 = vld [vmem:[%s5482_s16] ss:$0 sm:$0xff] }
 0x27f   :  { %v4481_v24 = vpop.f32.mrf.mxu0 }
 0x280   :  { %v580_v25 = vsel %vm579_vm2, %v4481_v24, -inf }
 0x281   :  { %581 = vmax.xlane.f32.xlu2 %v580_v25 }
 0x286   :  { %v4487_v28 = vpop.f32.mrf.mxu3 }
 0x287   :  { %v4485_v26 = vpop.f32.mrf.mxu0  ;;  %5483 = vst [vmem:[#allocation48_spill] sm:$0xff] %v4487_v28 }
 0x28e   :  { %v4492_v43 = vpop.f32.mrf.mxu3 }
 0x28f   :  { %v751_v33 = vpop.f32.mrf.mxu0  ;;  %5485 = vst [vmem:[#allocation49_spill] sm:$0xff] %v4492_v43 }
 0x290   :  { %v775_v22 = vadd.f32 %v4428_v16, %v751_v33 }
 0x292   :  { %v784_v3 = vadd.f32 %v3738_v53, %v775_v22 }
 0x294   :  { %v817_v46 = vmul.f32 %v784_v3, %v4421_v11  ;;  %v814_v3 = vpop.f32.mrf.mxu2 }
 0x296   :  { %v821_v47 = vadd.f32 %v819_v44, %v817_v46  ;;  %v884_v51 = vpop.f32.mrf.mxu3  ;;  %v815_v46 = vadd.f32 %v3737_v41, %v814_v3 }
 0x297   :  { %v754_v48 = vpop.f32.mrf.mxu0 }
 0x298   :  { %v3571_v50 = vmul.f32 -1.442695, %v821_v47  ;;  %v778_v22 = vadd.f32 %v4442_v45, %v754_v48 }
 0x29a   :  { %3745 = vpow2.f32 %v3571_v50  ;;  %v785_v44 = vadd.f32 %v3738_v53, %v778_v22 }
 0x29e   :  { %v887_v35 = vpop.f32.mrf.mxu3 }
 0x29f   :  { %v907_v52 = vpop.f32.mrf.mxu0 }
 0x2a0   :  { %v3746_v54 = vpop.eup %3745  ;;  %v908_v56 = vadd.f32 %v907_v52, %v884_v51  ;;  %v818_v51 = vmul.f32 %v785_v44, %v4436_v27  ;;  %v820_v52 = vmul.f32 %v815_v46, %v4451_v60 }
 0x2a1   :  { %v829_v55 = vadd.f32 1.0, %v3746_v54 }
 0x2a2   :  { %v917_v2 = vadd.f32 %v3739_v62, %v908_v56  ;;  %v822_v54 = vadd.f32 %v820_v52, %v818_v51  ;;  %v981_v52 = vpop.f32.mrf.mxu2 }
 0x2a3   :  { %3747 = vrcp.f32 %v829_v55  ;;  %v842_v14 = vand.u32 2147483648, %v829_v55  ;;  %v840_v0 = vand.u32 2147483647, %v829_v55  ;;  %vm836_vm4 = vweird.f32 %v829_v55 }
 0x2a4   :  { %v950_v17 = vmul.f32 %v917_v2, %v4421_v11  ;;  %v3572_v45 = vmul.f32 -1.442695, %v822_v54  ;;  %v982_v54 = vadd.f32 %v4426_v15, %v981_v52 }
 0x2a5   :  { %v843_v63 = vor.u32 1.1754944e-38, %v842_v14  ;;  %vm841_vm6 = vcmp.eq.f32.partialorder %v840_v0, 8.507059e+37 }
 0x2a6   :  { %v954_v25 = vadd.f32 %v952_v42, %v950_v17  ;;  %3581 = vmatmul.msk.f32.vlgmr.msrb.gmra.mxu3 %vm223_vm0, %v982_v54 }
 0x2a7   :  { %v910_v16 = vpop.f32.mrf.mxu0 }
 0x2a8   :  { %v911_v49 = vadd.f32 %v910_v16, %v887_v35  ;;  %3749 = vtanh.f32 %v954_v25 }
 0x2a9   :  { %v3748_v1 = vpop.eup %3747  ;;  %3751 = vpow2.f32 %v3572_v45 }
 0x2aa   :  { %v832_v6 = vmul.f32 %v3748_v1, %v829_v55  ;;  %v918_v7 = vadd.f32 %v3739_v62, %v911_v49  ;;  %vm837_vm3 = vweird.f32 %v3748_v1 }
 0x2ab   :  { %vm838_vm5 = vmor %vm836_vm4, %vm837_vm3 }
 0x2ac   :  { %v833_v9 = vsub.f32 1.0, %v832_v6  ;;  %v951_v40 = vmul.f32 %v918_v7, %v4436_v27 }
 0x2ae   :  { %v834_v18 = vmul.f32 %v3748_v1, %v833_v9  ;;  %v4501_v21 = vadd.f32 %v953_v5, %v951_v40  ;;  %v3750_v13 = vpop.eup %3749 }
 0x2af   :  { %v3752_v48 = vpop.eup %3751 }
 0x2b0   :  { %v835_v23 = vadd.f32 %v3748_v1, %v834_v18  ;;  %v830_v62 = vadd.f32 1.0, %v3752_v48 }
 0x2b2   :  { %v839_v32 = vsel %vm838_vm5, %v3748_v1, %v835_v23  ;;  %3753 = vrcp.f32 %v830_v62  ;;  %v857_v42 = vand.u32 2147483648, %v830_v62  ;;  %vm851_vm8 = vweird.f32 %v830_v62 }
 0x2b3   :  { %v844_v4 = vsel %vm841_vm6, %v843_v63, %v839_v32  ;;  %v855_v23 = vand.u32 2147483647, %v830_v62 }
 0x2b4   :  { %1149 = vst [vmem:[#allocation1] sm:$0xff] %v844_v4  ;;  %v858_v32 = vor.u32 1.1754944e-38, %v857_v42  ;;  %v4576_v42 = vpop.f32.mrf.mxu1 }
 0x2b5   :  { %vm856_vm10 = vcmp.eq.f32.partialorder %v855_v23, 8.507059e+37 }
 0x2b8   :  { %v3754_v2 = vpop.eup %3753 }
 0x2b9   :  { %v847_v5 = vmul.f32 %v3754_v2, %v830_v62  ;;  %vm852_vm7 = vweird.f32 %v3754_v2 }
 0x2ba   :  { %vm853_vm9 = vmor %vm851_vm8, %vm852_vm7 }
 0x2bb   :  { %v4504_v33 = vld [vmem:[#allocation1 + $0x3] ss:$9 sm:$0xff]  ;;  %v848_v8 = vsub.f32 1.0, %v847_v5 }
 0x2bc   :  { %v4506_v36 = vld [vmem:[#allocation1 + $0x2] ss:$9 sm:$0xff] }
 0x2bd   :  { %1276 = vst [vmem:[#allocation1] sm:$0xff] %v3750_v13  ;;  %v849_v9 = vmul.f32 %v3754_v2, %v848_v8  ;;  %v1168_v60 = vperm.slane %v4506_v36, 0 }
 0x2bf   :  { %v850_v18 = vadd.f32 %v3754_v2, %v849_v9 }
 0x2c1   :  { %v854_v25 = vsel %vm853_vm9, %v3754_v2, %v850_v18 }
 0x2c2   :  { %v4547_v22 = vsel %vm856_vm10, %v858_v32, %v854_v25  ;;  %v1155_v32 = vlaneseq }
 0x2c4   :  { %v4509_v47 = vld [vmem:[#allocation1 + $0x2] ss:$9 sm:$0xff] }
 0x2c5   :  { %v4511_v50 = vld [vmem:[#allocation1 + $0x3] ss:$9 sm:$0xff]  ;;  %v1281_v43 = vperm.slane %v4509_v47, 0 }
 0x2c6   :  { %1513 = vst [vmem:[#allocation1] sm:$0xff] %v4252_v37 }
 0x2cd   :  { %v4516_v55 = vld [vmem:[#allocation1 + $0x4] ss:$9 sm:$0xff] }
 0x2ce   :  { %v4518_v56 = vld [vmem:[#allocation1 + $0x5] ss:$9 sm:$0xff] }
 0x2cf   :  { %1543 = vst [vmem:[#allocation1] sm:$0xff] %v844_v4 }
 0x2d6   :  { %v4520_v53 = vld [vmem:[#allocation1 + $0x4] ss:$9 sm:$0xff] }
 0x2d7   :  { %v4522_v41 = vld [vmem:[#allocation1 + $0x5] ss:$9 sm:$0xff] }
 0x2d8   :  { %1668 = vst [vmem:[#allocation1] sm:$0xff] %v3750_v13 }
 0x2df   :  { %v4524_v35 = vld [vmem:[#allocation1 + $0x4] ss:$9 sm:$0xff] }
 0x2e0   :  { %v4526_v16 = vld [vmem:[#allocation1 + $0x5] ss:$9 sm:$0xff] }
 0x2e1   :  { %1894 = vst [vmem:[#allocation1] sm:$0xff] %v4252_v37 }
 0x2e8   :  { %v4529_v49 = vld [vmem:[#allocation1 + $0x6] ss:$9 sm:$0xff] }
 0x2e9   :  { %v4531_v1 = vld [vmem:[#allocation1 + $0x7] ss:$9 sm:$0xff] }
 0x2ea   :  { %1924 = vst [vmem:[#allocation1] sm:$0xff] %v844_v4 }
 0x2f1   :  { %v4533_v6 = vld [vmem:[#allocation1 + $0x7] ss:$9 sm:$0xff] }
 0x2f2   :  { %v4535_v7 = vld [vmem:[#allocation1 + $0x6] ss:$9 sm:$0xff] }
 0x2f3   :  { %2049 = vst [vmem:[#allocation1] sm:$0xff] %v3750_v13 }
 0x2f4   :  { %v582_v17 = vpop.xlane.xlu2 %581 }
 0x2f5   :  { %v586_v0 = vsub.f32 %v4481_v24, %v582_v17  ;;  %v1227_v17 = vpop.permute.xlu1 %1226 }
 0x2f6   :  { %v1233_v18 = vmul.f32 %v1227_v17, %v4469_v20 }
 0x2f7   :  { %v588_v63 = vmul.f32 1.442695, %v586_v0  ;;  %v1205_v0 = vpop.permute.xlu0 %1204 }
 0x2f8   :  { %v1208_v23 = vmul.f32 %v1205_v0, %v4576_v42 }
 0x2f9   :  { %3755 = vpow2.f32 %v588_v63 }
 0x2fa   :  { %v4537_v40 = vld [vmem:[#allocation1 + $0x6] ss:$9 sm:$0xff]  ;;  %3757 = vtanh.f32 %v4501_v21  ;;  %v1245_v21 = vmul.f32 %v4419_v10, %v4252_v37 }
 0x2fb   :  { %v4539_v14 = vld [vmem:[#allocation1 + $0x7] ss:$9 sm:$0xff] }
 0x2fc   :  { %2640 = vst [vmem:[#allocation1] sm:$0xff] %v4317_v29  ;;  %v1249_v5 = vperm.slane %v1245_v21, 0 }
 0x2ff   :  { %v3756_v24 = vpop.eup %3755  ;;  %v1257_v63 = vpop.permute.xlu0 %1256 }
 0x300   :  { %v592_v3 = vsel %vm579_vm2, %v3756_v24, 0.0  ;;  %v3758_v44 = vpop.eup %3757  ;;  %v1260_v25 = vmul.f32 %v1257_v63, %v4576_v42 }
 0x301   :  { %593 = vadd.xlane.f32.xlu2 %v592_v3  ;;  %v4582_v3 = vshrl.u32 %v1155_v32, 7  ;;  %v4605_v32 = vld [vmem:[%s5491_s22 + $0x10] sm:$0xff] }
 0x303   :  { %v4543_v4 = vld [vmem:[#allocation1 + $0x2] ss:$9 sm:$0xff]  ;;  %3693 = vset.pattern.permute.xlu1 %v4582_v3  ;;  %3694 = vset.pattern.permute.xlu0 %v4582_v3 }
 0x304   :  { %v4545_v13 = vld [vmem:[#allocation1 + $0x3] ss:$9 sm:$0xff] }
 0x305   :  { %2670 = vst [vmem:[#allocation1] sm:$0xff] %v4547_v22 }
 0x30c   :  { %v4552_v46 = vld [vmem:[#allocation1 + $0x2] ss:$9 sm:$0xff] }
 0x30d   :  { %v4554_v51 = vld [vmem:[#allocation1 + $0x3] ss:$9 sm:$0xff] }
 0x30e   :  { %5486 = vst [vmem:[#allocation50_spill] sm:$0xff] %v4554_v51 }
 0x30f   :  { %2795 = vst [vmem:[#allocation1] sm:$0xff] %v3758_v44 }
 0x316   :  { %v4557_v45 = vld [vmem:[#allocation1 + $0x2] ss:$9 sm:$0xff] }
 0x317   :  { %5487 = vst [vmem:[#allocation51_spill] sm:$0xff] %v4557_v45  ;;  %v4559_v48 = vld [vmem:[#allocation1 + $0x3] ss:$9 sm:$0xff] }
 0x318   :  { %5488 = vst [vmem:[#allocation52_spill] sm:$0xff] %v4559_v48 }
 0x319   :  { %3022 = vst [vmem:[#allocation1] sm:$0xff] %v4317_v29  ;;  %1252 = vperm.xlu2 %3692, %v1249_v5  }
 0x320   :  { %v4565_v62 = vld [vmem:[#allocation1 + $0x4] ss:$9 sm:$0xff] }
 0x321   :  { %v4567_v2 = vld [vmem:[#allocation1 + $0x5] ss:$9 sm:$0xff]  ;;  %1237 = vrot.lane.b32.xlu2 %v1233_v18, %s3954_s18  ;;  %v1231_v18 = vpop.permute.xlu1 %1230 }
 0x322   :  { %3052 = vst [vmem:[#allocation1] sm:$0xff] %v4547_v22 }
 0x329   :  { %v4570_v8 = vld [vmem:[#allocation1 + $0x4] ss:$9 sm:$0xff]  ;;  %1213 = vrot.lane.b32.xlu2 %v1208_v23, %s3953_s11  ;;  %v1234_v23 = vmul.f32 %v1231_v18, %v4576_v42 }
 0x32a   :  { %5489 = vst [vmem:[#allocation53_spill] sm:$0xff] %v4570_v8  ;;  %v4572_v9 = vld [vmem:[#allocation1 + $0x5] ss:$9 sm:$0xff] }
 0x32b   :  { %5490 = vst [vmem:[#allocation54_spill] sm:$0xff] %v4572_v9 }
 0x32c   :  { %3177 = vst [vmem:[#allocation1] sm:$0xff] %v3758_v44 }
 0x331   :  { %1265 = vrot.lane.b32.xlu2 %v1260_v25, %s3955_s23  ;;  %v4601_v25 = vld [vmem:[%s5491_s22 + $0x18] sm:$0xff] }
 0x332   :  { %1377 = vmatpush.msrb.mxu2 %v4601_v25 }
 0x334   :  { %1378 = vmatpush.msrb.mxu2 %v4605_v32 }
 0x374   :  { %v594_v44 = vpop.xlane.xlu2 %593 }
 0x375   :  { %3759 = vrcp.f32 %v594_v44  ;;  %v4609_v44 = vld [vmem:[%s5491_s22 + $0x8] sm:$0xff] }
 0x376   :  { %1379 = vmatpush.msrb.mxu2 %v4609_v44 }
 0x37b   :  { %v3760_v52 = vpop.eup %3759 }
 0x37c   :  { %v4586_v54 = vmul.f32 %v3760_v52, %v3756_v24  ;;  %v1253_v21 = vpop.permute.xlu2 %1252  ;;  %v4596_v24 = vpop.f32.mrf.mxu3  ;;  %v4613_v52 = vld [vmem:[%s5491_s22] sm:$0xff] }
 0x37d   :  { %v1259_v5 = vmul.f32 %v1253_v21, %v4469_v20  ;;  %v1016_v63 = vsel %vm579_vm2, %v4596_v24, -inf  ;;  %1380 = vmatpush.msrb.mxu2 %v4613_v52  ;;  %v1402_v21 = vperm.slane %v4419_v10, 0 }
 0x37e   :  { %v1154_v17 = vperm.slane %v4586_v54, 2  ;;  %v1161_v0 = vperm.slane %v4586_v54, 3 }
 0x37f   :  { %1263 = vrot.lane.b32.xlu0 %v1259_v5, %s3955_s23  ;;  %1913 = vmatpush.msra.mxu2 %v4352_v57  ;;  %v1185_v5 = vpop.permute.xlu1 %1184 }
 0x380   :  { %1159 = vperm.xlu1 %3693, %v1154_v17   ;;  %v1403_v17 = vperm.slane %v4323_v31, 0 }
 0x381   :  { %1914 = vmatpush.msra.mxu2 %v4359_v58 }
 0x383   :  { %1915 = vmatpush.msra.mxu2 %v4364_v59 }
 0x384   :  { %v1238_v18 = vpop.permute.xlu2 %1237 }
 0x385   :  { %1916 = vmatpush.msra.mxu2 %v4369_v61 }
 0x387   :  { %1166 = vperm.xlu0 %3694, %v1161_v0   ;;  %v1388_v0 = vperm.slane %v4295_v12, 0 }
 0x388   :  { %1239 = vrot.lane.b32.xlu1 %v1234_v23, %s3954_s18  ;;  %v1212_v23 = vpop.permute.xlu0 %1211 }
 0x389   :  { %3697 = vset.pattern.permute.xlu1 %v5413_v38 }
 0x38c   :  { %v1214_v27 = vpop.permute.xlu2 %1213 }
 0x38f   :  { %3695 = vset.pattern.permute.xlu0 %v5413_v38  ;;  %v1191_v38 = vmul.f32 %v1185_v5, %v4469_v20  ;;  %v1169_v20 = vperm.slane %v4504_v33, 0 }
 0x390   :  { %1405 = vperm.xlu0 %3695, %v1402_v21   ;;  %v1389_v21 = vperm.slane %v4303_v19, 0 }
 0x391   :  { %v1217_v39 = vadd.f32 %v1212_v23, %v1191_v38 }
 0x393   :  { %v1243_v11 = vadd.f32 %v1238_v18, %v1217_v39  ;;  %v1586_v18 = vmul.f32 %v4516_v55, %v4295_v12 }
 0x398   :  { %1409 = vperm.xlu0 %3695, %v1403_v17  }
 0x3a0   :  { %1391 = vperm.xlu0 %3695, %v1388_v0  }
 0x3a8   :  { %1395 = vperm.xlu0 %3695, %v1389_v21  }
 0x3b0   :  { %3696 = vset.pattern.permute.xlu0 %v4582_v3 }
 0x3b2   :  { %1017 = vmax.xlane.f32.xlu1 %v1016_v63  ;;  %v1189_v63 = vpop.permute.xlu1 %1188 }
 0x3b3   :  { %v1192_v28 = vmul.f32 %v1189_v63, %v4576_v42 }
 0x3b5   :  { %v1218_v5 = vadd.f32 %v1214_v27, %v1192_v28 }
 0x3f1   :  { %v1264_v37 = vpop.permute.xlu0 %1263 }
 0x3f2   :  { %v1160_v34 = vpop.permute.xlu1 %1159  ;;  %v1269_v17 = vadd.f32 %v1264_v37, %v1243_v11  ;;  %v1266_v37 = vpop.permute.xlu2 %1265  ;;  %v1282_v11 = vperm.slane %v4511_v50, 0 }
 0x3f3   :  { %v1172_v9 = vmul.f32 %v1168_v60, %v1160_v34  ;;  %v1285_v48 = vmul.f32 %v1281_v43, %v1160_v34  ;;  %v984_v50 = vpop.f32.mrf.mxu2 }
 0x3f5   :  { %v1271_v8 = vsub.f32 1.0, %v1172_v9 }
 0x3f7   :  { %v1273_v0 = vmul.f32 %v1271_v8, %v1269_v17  ;;  %v1587_v17 = vmul.f32 %v4518_v56, %v4303_v19 }
 0x3f9   :  { %v4629_v38 = vadd.f32 %v1285_v48, %v1273_v0  ;;  %v1167_v23 = vpop.permute.xlu0 %1166  ;;  %v1591_v0 = vperm.slane %v1587_v17, 0 }
 0x3fa   :  { %v1173_v36 = vmul.f32 %v1169_v20, %v1167_v23  ;;  %v1240_v51 = vpop.permute.xlu1 %1239  ;;  %v1286_v27 = vmul.f32 %v1282_v11, %v1167_v23  ;;  %v4657_v20 = vsub.f32 1.0, %v4518_v56 }
 0x3fb   :  { %v1244_v45 = vadd.f32 %v1240_v51, %v1218_v5  ;;  %3588 = vmatmul.msk.f32.vlgmr.msrb.gmra.mxu2 %vm223_vm0, %v4629_v38  ;;  %v985_v51 = vadd.f32 %v4426_v15, %v984_v50  ;;  %v4680_v50 = vld [vmem:[%s5492_s26 + $0x8] sm:$0xff] }
 0x3fc   :  { %v1272_v39 = vsub.f32 1.0, %v1173_v36  ;;  %2511 = vmatpush.msrb.mxu2 %v4601_v25  ;;  %v1639_v5 = vmul.f32 %v4657_v20, %v4303_v19  ;;  %v5494_v19 = vmov 0  }
 0x3fd   :  { %v1270_v34 = vadd.f32 %v1266_v37, %v1244_v45  ;;  %3582 = vmatmul.msk.f32.gmra.mxu3 %vm223_vm0, %v985_v51  ;;  %v1548_v37 = vperm.slane %v4586_v54, 4  ;;  %v1040_v51 = vld [vmem:[%s5493_s13 + $0x10] sm:$0xff] }
 0x3fe   :  { %2512 = vmatpush.msrb.mxu2 %v4605_v32  ;;  %v1643_v23 = vperm.slane %v1639_v5, 0 }
 0x3ff   :  { %v1274_v60 = vmul.f32 %v1272_v39, %v1270_v34 }
 0x400   :  { %2513 = vmatpush.msrb.mxu2 %v4609_v44 }
 0x401   :  { %v4638_v28 = vadd.f32 %v1286_v27, %v1274_v60 }
 0x402   :  { %2514 = vmatpush.msrb.mxu2 %v4613_v52  ;;  %v1406_v8 = vpop.permute.xlu0 %1405 }
 0x403   :  { %3589 = vmatmul.msk.f32.gmra.mxu2 %vm223_vm0, %v4638_v28 }
 0x40a   :  { %v1410_v63 = vpop.permute.xlu0 %1409 }
 0x412   :  { %v1392_v60 = vpop.permute.xlu0 %1391 }
 0x425   :  { %v1018_v43 = vpop.xlane.xlu1 %1017 }
 0x426   :  { %v1022_v33 = vsub.f32 %v4596_v24, %v1018_v43  ;;  %v1590_v24 = vperm.slane %v1586_v18, 0  ;;  %v4670_v43 = vld [vmem:[%s5492_s26 + $0x18] sm:$0xff]  ;;  %v3841_v18 = vld [vmem:[%s5454_s0] sm:$0xff] }
 0x427   :  { %1474 = vmatpush.msra.mxu3 %v4670_v43  ;;  %1861 = vmatpush.msra.mxu1 %v4670_v43 }
 0x428   :  { %v1024_v47 = vmul.f32 1.442695, %v1022_v33  ;;  %v4675_v33 = vld [vmem:[%s5492_s26 + $0x10] sm:$0xff] }
 0x429   :  { %1475 = vmatpush.msra.mxu3 %v4675_v33  ;;  %1862 = vmatpush.msra.mxu1 %v4675_v33 }
 0x42a   :  { %3761 = vpow2.f32 %v1024_v47  ;;  %v1041_v47 = vld [vmem:[%s5493_s13 + $0x18] sm:$0xff] }
 0x42b   :  { %1058 = vmatpush.msrb.mxu0 %v1041_v47  ;;  %1476 = vmatpush.msra.mxu3 %v4680_v50 }
 0x42c   :  { %1863 = vmatpush.msra.mxu1 %v4680_v50 }
 0x42d   :  { %1059 = vmatpush.msrb.mxu0 %v1040_v51 }
 0x430   :  { %v3762_v45 = vpop.eup %3761 }
 0x431   :  { %v1028_v48 = vsel %vm579_vm2, %v3762_v45, 0.0 }
 0x432   :  { %1029 = vadd.xlane.f32.xlu2 %v1028_v48  ;;  %v1039_v48 = vld [vmem:[%s5493_s13 + $0x8] sm:$0xff] }
 0x433   :  { %1060 = vmatpush.msrb.mxu0 %v1039_v48 }
 0x47e   :  { %v1382_v9 = vpop.f32.mrf.mxu2 }
 0x47f   :  { %v1412_v42 = vmul.f32 %v1406_v8, %v1382_v9  ;;  %v1396_v8 = vpop.permute.xlu0 %1395 }
 0x481   :  { %1416 = vrot.lane.b32.xlu2 %v1412_v42, %s3954_s18  ;;  %v1038_v42 = vld [vmem:[%s5493_s13] sm:$0xff] }
 0x482   :  { %1061 = vmatpush.msrb.mxu0 %v1038_v42 }
 0x483   :  { %3583 = vmatmul.msk.f32.vlgmr.msrb.gmra.mxu0 %vm223_vm0, %v3841_v18  ;;  %v4719_v18 = vsub.f32 1.0, %v4516_v55 }
 0x484   :  { %1765 = vmatpush.msra.mxu0 %v4601_v25 }
 0x486   :  { %v4650_v21 = vpop.f32.mrf.mxu2  ;;  %1766 = vmatpush.msra.mxu0 %v4605_v32 }
 0x487   :  { %v1413_v15 = vmul.f32 %v1410_v63, %v4650_v21  ;;  %v1398_v63 = vmul.f32 %v1392_v60, %v1382_v9  ;;  %v1613_v60 = vmul.f32 %v4518_v56, %v4323_v31 }
 0x488   :  { %1767 = vmatpush.msra.mxu0 %v4609_v44 }
 0x489   :  { %1593 = vperm.xlu2 %3692, %v1590_v24   ;;  %1418 = vrot.lane.b32.xlu1 %v1413_v15, %s3954_s18  ;;  %v1612_v15 = vmul.f32 %v4516_v55, %v4419_v10  ;;  %v1617_v48 = vperm.slane %v1613_v60, 0 }
 0x48a   :  { %1768 = vmatpush.msra.mxu0 %v4613_v52 }
 0x48b   :  { %v1616_v5 = vperm.slane %v1612_v15, 0 }
 0x48c   :  { %2287 = vmatpush.msrb.mxu0 %v4352_v57 }
 0x48e   :  { %2288 = vmatpush.msrb.mxu0 %v4359_v58 }
 0x490   :  { %2289 = vmatpush.msrb.mxu0 %v4364_v59 }
 0x491   :  { %1597 = vperm.xlu2 %3692, %v1591_v0   ;;  %1619 = vperm.xlu1 %3697, %v1616_v5  }
 0x492   :  { %2290 = vmatpush.msrb.mxu0 %v4369_v61 }
 0x499   :  { %1649 = vperm.xlu2 %3692, %v1643_v23   ;;  %1623 = vperm.xlu1 %3697, %v1617_v48  }
 0x4a1   :  { %3699 = vset.pattern.permute.xlu2 %v4582_v3 }
 0x4a5   :  { %v1030_v36 = vpop.xlane.xlu2 %1029 }
 0x4a6   :  { %3763 = vrcp.f32 %v1030_v36  ;;  %v3842_v36 = vld [vmem:[%s5454_s0 + $0x8] sm:$0xff]  ;;  %s5502_s0 = sld [smem:[#allocation38_spill]] }
 0x4a7   :  { %3584 = vmatmul.msk.f32.gmra.mxu0 %vm223_vm0, %v3842_v36 }
 0x4a9   :  { %1553 = vperm.xlu2 %3699, %v1548_v37  }
 0x4ac   :  { %v3764_v39 = vpop.eup %3763 }
 0x4ad   :  { %v4663_v11 = vmul.f32 %v3764_v39, %v3762_v45  ;;  %v4686_v45 = vld [vmem:[%s5492_s26] sm:$0xff] }
 0x4ae   :  { %1477 = vmatpush.msra.mxu3 %v4686_v45  ;;  %1864 = vmatpush.msra.mxu1 %v4686_v45 }
 0x4af   :  { %v1424_v34 = vperm.slane %v4663_v11, 4  ;;  %v1431_v27 = vperm.slane %v4663_v11, 5 }
 0x4b0   :  { %1532 = vmatpush.msrb.mxu3 %v4352_v57  ;;  %2146 = vmatpush.msrb.mxu1 %v4601_v25  ;;  %v1571_v57 = vmul.f32 %v4657_v20, %v4323_v31 }
 0x4b1   :  { %1429 = vperm.xlu0 %3696, %v1424_v34   ;;  %3700 = vset.pattern.permute.xlu2 %v5494_v19  ;;  %v1399_v34 = vmul.f32 %v1396_v8, %v4650_v21  ;;  %v1570_v8 = vmul.f32 %v4719_v18, %v4419_v10  ;;  %v4744_v10 = vpop.f32.mrf.mxu3 }
 0x4b2   :  { %1533 = vmatpush.msrb.mxu3 %v4359_v58  ;;  %2147 = vmatpush.msrb.mxu1 %v4605_v32  ;;  %v1638_v58 = vmul.f32 %v4719_v18, %v4295_v12 }
 0x4b3   :  { %v1574_v5 = vperm.slane %v1570_v8, 0 }
 0x4b4   :  { %1534 = vmatpush.msrb.mxu3 %v4364_v59  ;;  %2148 = vmatpush.msrb.mxu1 %v4609_v44  ;;  %v1575_v59 = vperm.slane %v1571_v57, 0  ;;  %v1642_v15 = vperm.slane %v1638_v58, 0 }
 0x4b5   :  { %1577 = vperm.xlu1 %3697, %v1574_v5   ;;  %v1968_v5 = vmul.f32 %v4531_v1, %v4518_v56 }
 0x4b6   :  { %1535 = vmatpush.msrb.mxu3 %v4369_v61  ;;  %2149 = vmatpush.msrb.mxu1 %v4613_v52 }
 0x4b7   :  { %1581 = vperm.xlu2 %3700, %v1575_v59   ;;  %v1967_v59 = vmul.f32 %v4529_v49, %v4516_v55 }
 0x4b9   :  { %1436 = vperm.xlu0 %3696, %v1431_v27  }
 0x4c1   :  { %3698 = vset.pattern.permute.xlu0 %v5494_v19 }
 0x4c2   :  { %1645 = vperm.xlu0 %3698, %v1642_v15  }
 0x4ca   :  { %3701 = vset.pattern.permute.xlu0 %v4582_v3 }
 0x4db   :  { %v1417_v24 = vpop.permute.xlu2 %1416 }
 0x4dc   :  { %v1422_v17 = vadd.f32 %v1417_v24, %v1398_v63 }
 0x4fb   :  { %v1419_v37 = vpop.permute.xlu1 %1418 }
 0x4fc   :  { %v1423_v47 = vadd.f32 %v1419_v37, %v1399_v34  ;;  %v1594_v34 = vpop.permute.xlu2 %1593 }
 0x523   :  { %v1430_v0 = vpop.permute.xlu0 %1429 }
 0x524   :  { %v1438_v23 = vmul.f32 %v1430_v0, %v1422_v17 }
 0x526   :  { %v1440_v9 = vsel %vm223_vm0, %v1438_v23, 0.0 }
 0x527   :  { %v1441_v39 = vrot.slane %v1440_v9, 4 }
 0x529   :  { %v1442_v27 = vadd.f32 %v1441_v39, %v1440_v9 }
 0x52b   :  { %v1437_v51 = vpop.permute.xlu0 %1436  ;;  %v1443_v24 = vrot.slane %v1442_v27, 2 }
 0x52c   :  { %v1439_v42 = vmul.f32 %v1437_v51, %v1423_v47 }
 0x52d   :  { %v1444_v17 = vadd.f32 %v1443_v24, %v1442_v27  ;;  %v1620_v27 = vpop.permute.xlu1 %1619 }
 0x52e   :  { %v1447_v21 = vsel %vm223_vm0, %v1439_v42, 0.0  ;;  %v1598_v42 = vpop.permute.xlu2 %1597 }
 0x52f   :  { %v1448_v63 = vrot.slane %v1447_v21, 4  ;;  %v1445_v23 = vrot.slane %v1444_v17, 1 }
 0x531   :  { %v1449_v0 = vadd.f32 %v1448_v63, %v1447_v21  ;;  %v1446_v36 = vadd.f32 %v1445_v23, %v1444_v17  ;;  %v1971_v63 = vperm.slane %v1967_v59, 0  ;;  %v1555_v17 = vperm.slane %v4586_v54, 5 }
 0x532   :  { %v1972_v23 = vperm.slane %v1968_v5, 0 }
 0x533   :  { %v1450_v31 = vrot.slane %v1449_v0, 2 }
 0x534   :  { %v1646_v48 = vpop.permute.xlu0 %1645 }
 0x535   :  { %v1451_v9 = vadd.f32 %v1450_v31, %v1449_v0  ;;  %v1624_v57 = vpop.permute.xlu1 %1623  ;;  %v1993_v31 = vmul.f32 %v4529_v49, %v4719_v18 }
 0x536   :  { %v1650_v15 = vpop.permute.xlu2 %1649 }
 0x537   :  { %v1452_v61 = vrot.slane %v1451_v9, 1 }
 0x539   :  { %v1453_v37 = vadd.f32 %v1452_v61, %v1451_v9  ;;  %v4762_v9 = vsub.f32 1.0, %v4531_v1  ;;  %v1997_v61 = vperm.slane %v1993_v31, 0 }
 0x53b   :  { %v1456_v12 = vsel %vm1329_vm11, %v1453_v37, %v1446_v36  ;;  %v2020_v36 = vmul.f32 %v4762_v9, %v4518_v56  ;;  %v1994_v37 = vmul.f32 %v4531_v1, %v4657_v20 }
 0x53c   :  { %3590 = vmatmul.msk.f32.vlgmr.msra.gmra.mxu3 %vm223_vm0, %v1456_v12 }
 0x53d   :  { %2240 = vmatpush.msra.mxu3 %v4670_v43  ;;  %v2024_v12 = vperm.slane %v2020_v36, 0 }
 0x53f   :  { %2241 = vmatpush.msra.mxu3 %v4675_v33 }
 0x541   :  { %2242 = vmatpush.msra.mxu3 %v4680_v50 }
 0x543   :  { %2243 = vmatpush.msra.mxu3 %v4686_v45 }
 0x544   :  { %3592 = vmatmul.msk.f32.vlgmr.msrb.gmra.mxu3 %vm223_vm0, %v4629_v38 }
 0x545   :  { %2607 = vmatpush.msrb.mxu3 %v4670_v43 }
 0x547   :  { %2608 = vmatpush.msrb.mxu3 %v4675_v33 }
 0x549   :  { %2609 = vmatpush.msrb.mxu3 %v4680_v50 }
 0x54b   :  { %2610 = vmatpush.msrb.mxu3 %v4686_v45 }
 0x54c   :  { %3593 = vmatmul.msk.f32.gmra.mxu3 %vm223_vm0, %v4638_v28 }
 0x5bf   :  { %v4746_v39 = vpop.f32.mrf.mxu3 }
 0x5c7   :  { %v1537_v60 = vpop.f32.mrf.mxu3 }
 0x5c8   :  { %v1626_v47 = vmul.f32 %v1620_v27, %v1537_v60  ;;  %v1600_v51 = vmul.f32 %v1594_v34, %v1537_v60  ;;  %v1652_v21 = vmul.f32 %v1646_v48, %v1537_v60  ;;  %v1998_v34 = vperm.slane %v1994_v37, 0 }
 0x5c9   :  { %v4770_v27 = vsub.f32 1.0, %v4529_v49  ;;  %v1929_v48 = vperm.slane %v4586_v54, 6 }
 0x5ca   :  { %1630 = vrot.lane.b32.xlu1 %v1626_v47, %s3954_s18  ;;  %1604 = vrot.lane.b32.xlu0 %v1600_v51, %s3953_s11 }
 0x5cb   :  { %v1951_v47 = vmul.f32 %v4770_v27, %v4719_v18 }
 0x5cd   :  { %v1955_v51 = vperm.slane %v1951_v47, 0 }
 0x5cf   :  { %v1540_v24 = vpop.f32.mrf.mxu3 }
 0x5d0   :  { %v1627_v58 = vmul.f32 %v1624_v57, %v1540_v24  ;;  %v1601_v8 = vmul.f32 %v1598_v42, %v1540_v24  ;;  %v1653_v0 = vmul.f32 %v1650_v15, %v1540_v24  ;;  %v1578_v42 = vpop.permute.xlu1 %1577  ;;  %v2019_v57 = vmul.f32 %v4770_v27, %v4516_v55 }
 0x5d1   :  { %v1562_v15 = vperm.slane %v4520_v53, 0 }
 0x5d2   :  { %1656 = vrot.lane.b32.xlu0 %v1652_v21, %s3955_s23  ;;  %1632 = vrot.lane.b32.xlu2 %v1627_v58, %s3954_s18  ;;  %v2023_v21 = vperm.slane %v2019_v57, 0  ;;  %v1554_v58 = vpop.permute.xlu2 %1553 }
 0x5d3   :  { %1606 = vrot.lane.b32.xlu1 %v1601_v8, %s3953_s11 }
 0x5da   :  { %1560 = vperm.xlu0 %3701, %v1555_v17   ;;  %1974 = vperm.xlu2 %3700, %v1971_v63   ;;  %v1584_v63 = vmul.f32 %v1578_v42, %v1537_v60  ;;  %v1582_v31 = vpop.permute.xlu2 %1581 }
 0x5db   :  { %1658 = vrot.lane.b32.xlu1 %v1653_v0, %s3955_s23  ;;  %v1566_v0 = vmul.f32 %v1562_v15, %v1554_v58 }
 0x5dd   :  { %v1664_v36 = vsub.f32 1.0, %v1566_v0  ;;  %v4803_v0 = vld [vmem:[%s5465_s14 + $0x8] sm:$0xff] }
 0x5e2   :  { %1978 = vperm.xlu2 %3700, %v1972_v23   ;;  %3702 = vset.pattern.permute.xlu0 %v5494_v19 }
 0x5e3   :  { %2000 = vperm.xlu1 %3697, %v1997_v61   ;;  %2026 = vperm.xlu0 %3702, %v2023_v21   ;;  %v1673_v61 = vperm.slane %v4524_v35, 0  ;;  %v1563_v35 = vperm.slane %v4522_v41, 0  ;;  %v1674_v41 = vperm.slane %v4526_v16, 0 }
 0x5e5   :  { %v1677_v47 = vmul.f32 %v1673_v61, %v1554_v58  ;;  %v4792_v58 = vld [vmem:[%s5465_s14 + $0x18] sm:$0xff] }
 0x5ea   :  { %2030 = vperm.xlu2 %3700, %v2024_v12  }
 0x5eb   :  { %2004 = vperm.xlu1 %3697, %v1998_v34   ;;  %3705 = vset.pattern.permute.xlu0 %v4582_v3  ;;  %v1952_v34 = vmul.f32 %v4762_v9, %v4657_v20 }
 0x5ed   :  { %v1956_v53 = vperm.slane %v1952_v34, 0 }
 0x5f2   :  { %3703 = vset.pattern.permute.xlu2 %v4582_v3 }
 0x5f3   :  { %1958 = vperm.xlu1 %3697, %v1955_v51   ;;  %v1585_v51 = vmul.f32 %v1582_v31, %v1540_v24 }
 0x5fa   :  { %1934 = vperm.xlu2 %3703, %v1929_v48  }
 0x602   :  { %3704 = vset.pattern.permute.xlu2 %v5494_v19 }
 0x603   :  { %1962 = vperm.xlu2 %3704, %v1956_v53  }
 0x62c   :  { %v1633_v57 = vpop.permute.xlu2 %1632 }
 0x634   :  { %v1975_v16 = vpop.permute.xlu2 %1974 }
 0x63c   :  { %v1631_v8 = vpop.permute.xlu1 %1630  ;;  %v1605_v59 = vpop.permute.xlu0 %1604 }
 0x63d   :  { %v1610_v17 = vadd.f32 %v1605_v59, %v1584_v63  ;;  %v4797_v63 = vld [vmem:[%s5465_s14 + $0x10] sm:$0xff] }
 0x63f   :  { %v1636_v5 = vadd.f32 %v1631_v8, %v1610_v17 }
 0x644   :  { %v1657_v23 = vpop.permute.xlu0 %1656 }
 0x645   :  { %v1662_v37 = vadd.f32 %v1657_v23, %v1636_v5  ;;  %v1607_v12 = vpop.permute.xlu1 %1606  ;;  %v4808_v23 = vld [vmem:[%s5465_s14] sm:$0xff]  ;;  %s3960_s14 = smov 5  }
 0x646   :  { %v1611_v42 = vadd.f32 %v1607_v12, %v1585_v51 }
 0x647   :  { %v1666_v60 = vmul.f32 %v1664_v36, %v1662_v37 }
 0x648   :  { %v1637_v59 = vadd.f32 %v1633_v57, %v1611_v42 }
 0x649   :  { %v4784_v48 = vadd.f32 %v1677_v47, %v1666_v60  ;;  %v1979_v60 = vpop.permute.xlu2 %1978 }
 0x64b   :  { %3595 = vmatmul.msk.f32.vlgmr.msra.gmra.mxu0 %vm223_vm0, %v4784_v48  ;;  %3599 = vmatmul.msk.f32.vlgmr.msra.gmra.mxu2 %vm223_vm0, %v4784_v48 }
 0x64c   :  { %v1561_v21 = vpop.permute.xlu0 %1560  ;;  %3041 = vmatpush.msra.mxu2 %v4792_v58  ;;  %2989 = vmatpush.msra.mxu0 %v4670_v43 }
 0x64d   :  { %v1567_v24 = vmul.f32 %v1563_v35, %v1561_v21  ;;  %v1659_v8 = vpop.permute.xlu1 %1658  ;;  %v1678_v5 = vmul.f32 %v1674_v41, %v1561_v21  ;;  %v1936_v21 = vperm.slane %v4586_v54, 7  ;;  %v1790_v41 = vperm.slane %v4719_v18, 0 }
 0x64e   :  { %3042 = vmatpush.msra.mxu2 %v4797_v63  ;;  %2990 = vmatpush.msra.mxu0 %v4675_v33  ;;  %v1663_v17 = vadd.f32 %v1659_v8, %v1637_v59  ;;  %v1791_v59 = vperm.slane %v4657_v20, 0  ;;  %v2363_v54 = vmul.f32 %v4770_v27, %v4317_v29  ;;  %v4835_v18 = vrot.slane %v4317_v29, 1 }
 0x64f   :  { %v1665_v15 = vsub.f32 1.0, %v1567_v24 }
 0x650   :  { %3043 = vmatpush.msra.mxu2 %v4803_v0  ;;  %2991 = vmatpush.msra.mxu0 %v4680_v50 }
 0x651   :  { %v1667_v31 = vmul.f32 %v1665_v15, %v1663_v17  ;;  %v2031_v24 = vpop.permute.xlu2 %2030  ;;  %v2337_v15 = vmul.f32 %v4529_v49, %v4317_v29 }
 0x652   :  { %3044 = vmatpush.msra.mxu2 %v4808_v23  ;;  %2992 = vmatpush.msra.mxu0 %v4686_v45 }
 0x653   :  { %v4812_v61 = vadd.f32 %v1678_v5, %v1667_v31  ;;  %v2341_v17 = vperm.slane %v2337_v15, 0  ;;  %v2367_v5 = vperm.slane %v2363_v54, 0  ;;  %v2389_v31 = vmul.f32 %v4529_v49, %v4320_v30 }
 0x655   :  { %3596 = vmatmul.msk.f32.gmra.mxu0 %vm223_vm0, %v4812_v61  ;;  %3600 = vmatmul.msk.f32.gmra.mxu2 %vm223_vm0, %v4812_v61  ;;  %v2001_v36 = vpop.permute.xlu1 %2000  ;;  %v2027_v47 = vpop.permute.xlu0 %2026  ;;  %v2393_v20 = vperm.slane %v2389_v31, 0 }
 0x65d   :  { %v2005_v53 = vpop.permute.xlu1 %2004 }
 0x6ce   :  { %v1918_v37 = vpop.f32.mrf.mxu2 }
 0x6cf   :  { %v1981_v12 = vmul.f32 %v1975_v16, %v1918_v37  ;;  %v2007_v34 = vmul.f32 %v2001_v36, %v1918_v37  ;;  %v2033_v51 = vmul.f32 %v2027_v47, %v1918_v37  ;;  %v2364_v16 = vmul.f32 %v4835_v18, %v4762_v9 }
 0x6d0   :  { %v583_v36 = vsel %vm579_vm2, %v4485_v26, -inf  ;;  %v2338_v47 = vmul.f32 %v4835_v18, %v4531_v1 }
 0x6d1   :  { %1985 = vrot.lane.b32.xlu0 %v1981_v12, %s3953_s11  ;;  %2011 = vrot.lane.b32.xlu1 %v2007_v34, %s3954_s18  ;;  %v2368_v12 = vperm.slane %v2364_v16, 0  ;;  %v1776_v34 = vperm.slane %v4516_v55, 0  ;;  %v1943_v55 = vperm.slane %v4535_v7, 0  ;;  %v1944_v7 = vperm.slane %v4533_v6, 0 }
 0x6d8   :  { %v1921_v42 = vpop.f32.mrf.mxu2 }
 0x6d9   :  { %2037 = vrot.lane.b32.xlu0 %v2033_v51, %s3955_s23  ;;  %v2008_v35 = vmul.f32 %v2005_v53, %v1921_v42  ;;  %v1982_v57 = vmul.f32 %v1979_v60, %v1921_v42  ;;  %v2034_v8 = vmul.f32 %v2031_v24, %v1921_v42  ;;  %v1777_v60 = vperm.slane %v4518_v56, 0  ;;  %v1959_v53 = vpop.permute.xlu1 %1958 }
 0x6da   :  { %v2342_v51 = vperm.slane %v2338_v47, 0  ;;  %v1965_v24 = vmul.f32 %v1959_v53, %v1918_v37 }
 0x6db   :  { %2013 = vrot.lane.b32.xlu2 %v2008_v35, %s3954_s18  ;;  %1987 = vrot.lane.b32.xlu1 %v1982_v57, %s3953_s11  ;;  %v4846_v35 = vpop.f32.mrf.mxu0  ;;  %v1935_v57 = vpop.permute.xlu2 %1934 }
 0x6e1   :  { %1941 = vperm.xlu0 %3705, %v1936_v21  }
 0x6e3   :  { %2039 = vrot.lane.b32.xlu1 %v2034_v8, %s3955_s23  ;;  %v4849_v15 = vpop.f32.mrf.mxu0  ;;  %v1963_v56 = vpop.permute.xlu2 %1962 }
 0x6e9   :  { %3706 = vset.pattern.permute.xlu0 %v5494_v19 }
 0x6ea   :  { %1797 = vperm.xlu0 %3706, %v1791_v59  }
 0x6eb   :  { %1793 = vperm.xlu1 %3697, %v1790_v41   ;;  %v1947_v41 = vmul.f32 %v1943_v55, %v1935_v57  ;;  %v4858_v53 = vpop.f32.mrf.mxu0 }
 0x6ed   :  { %v2045_v31 = vsub.f32 1.0, %v1947_v41 }
 0x6f2   :  { %2344 = vperm.xlu0 %3706, %v2341_v17  }
 0x6fa   :  { %2370 = vperm.xlu0 %3706, %v2367_v5   ;;  %v2054_v5 = vperm.slane %v4537_v40, 0 }
 0x702   :  { %2396 = vperm.xlu0 %3706, %v2393_v20  }
 0x704   :  { %584 = vmax.xlane.f32.xlu2 %v583_v36  ;;  %v2058_v36 = vmul.f32 %v2054_v5, %v1935_v57 }
 0x70a   :  { %2374 = vperm.xlu0 %3706, %v2368_v12  }
 0x712   :  { %1779 = vperm.xlu0 %3706, %v1776_v34   ;;  %v1966_v34 = vmul.f32 %v1963_v56, %v1921_v42  ;;  %v2055_v42 = vperm.slane %v4539_v14, 0  ;;  %v1812_v56 = vperm.slane %v4663_v11, 6 }
 0x71a   :  { %1783 = vperm.xlu0 %3706, %v1777_v60  }
 0x71c   :  { %2348 = vperm.xlu2 %3704, %v2342_v51  }
 0x724   :  { %3707 = vset.pattern.permute.xlu2 %v4582_v3 }
 0x735   :  { %v2014_v60 = vpop.permute.xlu2 %2013 }
 0x743   :  { %v1986_v21 = vpop.permute.xlu0 %1985  ;;  %v2012_v8 = vpop.permute.xlu1 %2011 }
 0x744   :  { %v1991_v59 = vadd.f32 %v1986_v21, %v1965_v24 }
 0x746   :  { %v2017_v17 = vadd.f32 %v2012_v8, %v1991_v59 }
 0x74b   :  { %v2038_v54 = vpop.permute.xlu0 %2037 }
 0x74c   :  { %v2043_v20 = vadd.f32 %v2038_v54, %v2017_v17 }
 0x74d   :  { %v1988_v16 = vpop.permute.xlu1 %1987 }
 0x74e   :  { %v2047_v12 = vmul.f32 %v2045_v31, %v2043_v20  ;;  %v1992_v37 = vadd.f32 %v1988_v16, %v1966_v34 }
 0x750   :  { %v4852_v47 = vadd.f32 %v2058_v36, %v2047_v12  ;;  %v2018_v21 = vadd.f32 %v2014_v60, %v1992_v37  ;;  %v4880_v36 = vsub.f32 1.0, %v4835_v18  ;;  %v1819_v37 = vperm.slane %v4663_v11, 7 }
 0x752   :  { %3606 = vmatmul.msk.f32.vlgmr.msrb.gmra.mxu0 %vm223_vm0, %v4852_v47  ;;  %v2390_v12 = vmul.f32 %v4880_v36, %v4531_v1 }
 0x753   :  { %v1942_v51 = vpop.permute.xlu0 %1941  ;;  %3274 = vmatpush.msrb.mxu0 %v4601_v25  ;;  %v4866_v25 = vpop.f32.mrf.mxu0 }
 0x754   :  { %v1948_v40 = vmul.f32 %v1944_v7, %v1942_v51  ;;  %v2059_v55 = vmul.f32 %v2055_v42, %v1942_v51  ;;  %v2394_v34 = vperm.slane %v2390_v12, 0 }
 0x755   :  { %v2040_v24 = vpop.permute.xlu1 %2039  ;;  %3275 = vmatpush.msrb.mxu0 %v4605_v32 }
 0x756   :  { %v2046_v57 = vsub.f32 1.0, %v1948_v40  ;;  %v2044_v8 = vadd.f32 %v2040_v24, %v2018_v21 }
 0x757   :  { %3276 = vmatpush.msrb.mxu0 %v4609_v44  ;;  %v2321_v44 = vmul.f32 %v4770_v27, %v4320_v30 }
 0x758   :  { %v2048_v59 = vmul.f32 %v2046_v57, %v2044_v8 }
 0x759   :  { %3277 = vmatpush.msrb.mxu0 %v4613_v52  ;;  %v2325_v52 = vperm.slane %v2321_v44, 0 }
 0x75a   :  { %v4864_v6 = vadd.f32 %v2059_v55, %v2048_v59 }
 0x75c   :  { %v1798_v41 = vpop.permute.xlu0 %1797  ;;  %3607 = vmatmul.msk.f32.gmra.mxu0 %vm223_vm0, %v4864_v6 }
 0x75d   :  { %v1801_v32 = vmul.f32 %v1798_v41, %v4866_v25  ;;  %v1794_v17 = vpop.permute.xlu1 %1793 }
 0x75e   :  { %v1800_v14 = vmul.f32 %v1794_v17, %v4858_v53 }
 0x75f   :  { %1806 = vrot.lane.b32.xlu0 %v1801_v32, %s3954_s18 }
 0x760   :  { %1804 = vrot.lane.b32.xlu2 %v1800_v14, %s3954_s18  ;;  %v2322_v14 = vmul.f32 %v4880_v36, %v4762_v9 }
 0x767   :  { %2328 = vperm.xlu0 %3706, %v2325_v52   ;;  %v2326_v52 = vperm.slane %v2322_v14, 0 }
 0x768   :  { %1817 = vperm.xlu2 %3707, %v1812_v56  }
 0x777   :  { %v585_v54 = vpop.xlane.xlu2 %584 }
 0x778   :  { %v587_v5 = vsub.f32 %v4485_v26, %v585_v54  ;;  %v2345_v26 = vpop.permute.xlu0 %2344 }
 0x77a   :  { %v590_v31 = vmul.f32 1.442695, %v587_v5 }
 0x77c   :  { %3765 = vpow2.f32 %v590_v31 }
 0x77f   :  { %v2349_v42 = vpop.permute.xlu2 %2348 }
 0x780   :  { %v2371_v7 = vpop.permute.xlu0 %2370 }
 0x782   :  { %v3766_v20 = vpop.eup %3765 }
 0x783   :  { %v595_v16 = vsel %vm579_vm2, %v3766_v20, 0.0 }
 0x784   :  { %596 = vadd.xlane.f32.xlu1 %v595_v16 }
 0x788   :  { %v2397_v21 = vpop.permute.xlu0 %2396 }
 0x790   :  { %v2375_v59 = vpop.permute.xlu0 %2374 }
 0x798   :  { %v1780_v56 = vpop.permute.xlu0 %1779 }
 0x799   :  { %v1786_v54 = vmul.f32 %v1780_v56, %v4858_v53 }
 0x79d   :  { %2400 = vperm.xlu1 %3697, %v2394_v34  }
 0x7a5   :  { %3708 = vset.pattern.permute.xlu1 %v4582_v3 }
 0x7ad   :  { %1824 = vperm.xlu1 %3708, %v1819_v37   ;;  %v1784_v37 = vpop.permute.xlu0 %1783 }
 0x7ba   :  { %v1805_v44 = vpop.permute.xlu2 %1804 }
 0x7c2   :  { %v1818_v5 = vpop.permute.xlu2 %1817 }
 0x7cf   :  { %v4886_v60 = vpop.f32.mrf.mxu0 }
 0x7d0   :  { %v2377_v51 = vmul.f32 %v2371_v7, %v4886_v60  ;;  %v2351_v40 = vmul.f32 %v2345_v26, %v4886_v60  ;;  %v2403_v24 = vmul.f32 %v2397_v21, %v4886_v60  ;;  %v2171_v7 = vperm.slane %v4770_v27, 0 }
 0x7d1   :  { %v1807_v53 = vpop.permute.xlu0 %1806  ;;  %v2535_v27 = vperm.slane %v4320_v30, 0 }
 0x7d2   :  { %2381 = vrot.lane.b32.xlu0 %v2377_v51, %s3954_s18  ;;  %2355 = vrot.lane.b32.xlu2 %v2351_v40, %s3953_s11  ;;  %v1787_v40 = vmul.f32 %v1784_v37, %v4866_v25 }
 0x7d9   :  { %v4893_v57 = vpop.f32.mrf.mxu0 }
 0x7da   :  { %2407 = vrot.lane.b32.xlu2 %v2403_v24, %s3955_s23  ;;  %v2352_v11 = vmul.f32 %v2349_v42, %v4893_v57  ;;  %v2378_v34 = vmul.f32 %v2375_v59, %v4893_v57  ;;  %v1811_v24 = vadd.f32 %v1807_v53, %v1787_v40  ;;  %v2172_v42 = vperm.slane %v4762_v9, 0 }
 0x7dc   :  { %2357 = vrot.lane.b32.xlu0 %v2352_v11, %s3953_s11 }
 0x7f7   :  { %v597_v8 = vpop.xlane.xlu1 %596 }
 0x7f8   :  { %3767 = vrcp.f32 %v597_v8 }
 0x7fe   :  { %v3768_v55 = vpop.eup %3767 }
 0x7ff   :  { %v4898_v41 = vmul.f32 %v3768_v55, %v3766_v20  ;;  %v1810_v20 = vadd.f32 %v1805_v44, %v1786_v54  ;;  %v1019_v54 = vsel %vm579_vm2, %v4744_v10, -inf }
 0x801   :  { %v2307_v32 = vperm.slane %v4898_v41, 1  ;;  %v2300_v17 = vperm.slane %v4898_v41, 0  ;;  %v1826_v12 = vmul.f32 %v1818_v5, %v1810_v20 }
 0x803   :  { %2312 = vperm.xlu2 %3707, %v2307_v32   ;;  %2305 = vperm.xlu1 %3708, %v2300_v17   ;;  %v1828_v26 = vsel %vm223_vm0, %v1826_v12, 0.0 }
 0x804   :  { %v1829_v51 = vrot.slane %v1828_v26, 4 }
 0x806   :  { %v1830_v21 = vadd.f32 %v1829_v51, %v1828_v26  ;;  %v2157_v26 = vperm.slane %v4529_v49, 0  ;;  %v2329_v51 = vpop.permute.xlu0 %2328  ;;  %v2314_v49 = vperm.slane %v4547_v22, 0 }
 0x807   :  { %v2335_v40 = vmul.f32 %v2329_v51, %v4886_v60  ;;  %v2299_v60 = vrot.slane %v4547_v22, 1 }
 0x808   :  { %v1831_v55 = vrot.slane %v1830_v21, 2 }
 0x80a   :  { %v1832_v17 = vadd.f32 %v1831_v55, %v1830_v21 }
 0x80b   :  { %3709 = vset.pattern.permute.xlu1 %v5494_v19  ;;  %3710 = vset.pattern.permute.xlu2 %v5494_v19 }
 0x80c   :  { %2332 = vperm.xlu1 %3709, %v2326_v52   ;;  %v1833_v52 = vrot.slane %v1832_v17, 1 }
 0x80e   :  { %v1834_v9 = vadd.f32 %v1833_v52, %v1832_v17 }
 0x80f   :  { %v2401_v31 = vpop.permute.xlu1 %2400 }
 0x810   :  { %v2404_v16 = vmul.f32 %v2401_v31, %v4893_v57  ;;  %v2536_v31 = vperm.slane %v4880_v36, 0 }
 0x812   :  { %2409 = vrot.lane.b32.xlu0 %v2404_v16, %s3955_s23  ;;  %v2713_v16 = vmul.f32 %v4543_v4, %v4317_v29 }
 0x814   :  { %2383 = vrot.lane.b32.xlu1 %v2378_v34, %s3954_s18  ;;  %v2717_v12 = vperm.slane %v2713_v16, 0  ;;  %v4928_v34 = vsub.f32 1.0, %v4543_v4 }
 0x81a   :  { %2174 = vperm.xlu0 %3706, %v2171_v7   ;;  %v2158_v7 = vperm.slane %v4531_v1, 0 }
 0x81f   :  { %v1825_v11 = vpop.permute.xlu1 %1824 }
 0x820   :  { %v1827_v8 = vmul.f32 %v1825_v11, %v1811_v24 }
 0x822   :  { %v1835_v59 = vsel %vm223_vm0, %v1827_v8, 0.0  ;;  %2178 = vperm.xlu0 %3706, %v2172_v42  }
 0x823   :  { %v1836_v32 = vrot.slane %v1835_v59, 4 }
 0x825   :  { %v1837_v14 = vadd.f32 %v1836_v32, %v1835_v59  ;;  %v3847_v32 = vld [vmem:[#allocation1] sm:$0xff] }
 0x826   :  { %v2421_v17 = vperm.slane %v3847_v32, 0 }
 0x827   :  { %v1838_v44 = vrot.slane %v1837_v14, 2 }
 0x829   :  { %v1839_v56 = vadd.f32 %v1838_v44, %v1837_v14 }
 0x82a   :  { %2538 = vperm.xlu0 %3706, %v2535_v27  }
 0x82b   :  { %v1840_v25 = vrot.slane %v1839_v56, 1 }
 0x82c   :  { %1020 = vmax.xlane.f32.xlu2 %v1019_v54  ;;  %v2356_v53 = vpop.permute.xlu2 %2355 }
 0x82d   :  { %v1841_v5 = vadd.f32 %v1840_v25, %v1839_v56  ;;  %v2361_v24 = vadd.f32 %v2356_v53, %v2335_v40 }
 0x82f   :  { %v1844_v20 = vsel %vm1329_vm11, %v1841_v5, %v1834_v9  ;;  %v2315_v9 = vperm.slane %v2299_v60, 0  ;;  %v2522_v5 = vperm.slane %v4317_v29, 0 }
 0x830   :  { %3597 = vmatmul.msk.f32.vlgmr.msra.gmra.mxu1 %vm223_vm0, %v1844_v20 }
 0x831   :  { %2659 = vmatpush.msra.mxu1 %v4792_v58  ;;  %v2765_v58 = vmul.f32 %v4928_v34, %v4317_v29 }
 0x832   :  { %2542 = vperm.xlu0 %3706, %v2536_v31   ;;  %v2420_v31 = vrot.slane %v3847_v32, 1 }
 0x833   :  { %2660 = vmatpush.msra.mxu1 %v4797_v63  ;;  %v2739_v63 = vmul.f32 %v4543_v4, %v4320_v30 }
 0x834   :  { %v2408_v55 = vpop.permute.xlu2 %2407 }
 0x835   :  { %2661 = vmatpush.msra.mxu1 %v4803_v0  ;;  %v2769_v0 = vperm.slane %v2765_v58, 0 }
 0x837   :  { %2662 = vmatpush.msra.mxu1 %v4808_v23  ;;  %v2743_v23 = vperm.slane %v2739_v63, 0 }
 0x838   :  { %3602 = vmatmul.msk.f32.vlgmr.msrb.gmra.mxu1 %vm223_vm0, %v4852_v47 }
 0x839   :  { %3370 = vmatpush.msrb.mxu1 %v4670_v43  ;;  %v2740_v43 = vmul.f32 %v4545_v13, %v4880_v36 }
 0x83a   :  { %2720 = vperm.xlu0 %3706, %v2717_v12  }
 0x83b   :  { %3371 = vmatpush.msrb.mxu1 %v4675_v33  ;;  %v2744_v37 = vperm.slane %v2740_v43, 0  ;;  %v4946_v33 = vsub.f32 1.0, %v4545_v13 }
 0x83d   :  { %3372 = vmatpush.msrb.mxu1 %v4680_v50  ;;  %v2766_v50 = vmul.f32 %v4946_v33, %v4835_v18 }
 0x83f   :  { %3373 = vmatpush.msrb.mxu1 %v4686_v45  ;;  %v2770_v45 = vperm.slane %v2766_v50, 0 }
 0x840   :  { %3603 = vmatmul.msk.f32.gmra.mxu1 %vm223_vm0, %v4864_v6 }
 0x842   :  { %2772 = vperm.xlu0 %3706, %v2769_v0   ;;  %v2422_v0 = vperm.slane %v2420_v31, 0 }
 0x844   :  { %2746 = vperm.xlu2 %3710, %v2743_v23   ;;  %v2382_v21 = vpop.permute.xlu0 %2381 }
 0x845   :  { %v2387_v42 = vadd.f32 %v2382_v21, %v2361_v24 }
 0x847   :  { %v2413_v59 = vadd.f32 %v2408_v55, %v2387_v42 }
 0x84a   :  { %2750 = vperm.xlu0 %3706, %v2744_v37  }
 0x84c   :  { %2160 = vperm.xlu2 %3710, %v2157_v26  }
 0x84e   :  { %v2358_v56 = vpop.permute.xlu0 %2357 }
 0x852   :  { %2776 = vperm.xlu0 %3706, %v2770_v45  }
 0x854   :  { %2525 = vperm.xlu2 %3710, %v2522_v5   ;;  %v2675_v5 = vperm.slane %v4898_v41, 2 }
 0x85a   :  { %2164 = vperm.xlu0 %3706, %v2158_v7  }
 0x85c   :  { %3715 = vset.pattern.permute.xlu2 %v4582_v3 }
 0x85d   :  { %v2313_v54 = vpop.permute.xlu2 %2312 }
 0x85e   :  { %v2319_v20 = vmul.f32 %v2315_v9, %v2313_v54  ;;  %v2426_v37 = vmul.f32 %v2422_v0, %v2313_v54  ;;  %v2523_v9 = vperm.slane %v4835_v18, 0 }
 0x860   :  { %v2416_v23 = vsub.f32 1.0, %v2319_v20  ;;  %v2697_v20 = vmul.f32 %v4928_v34, %v4320_v30 }
 0x862   :  { %3711 = vset.pattern.permute.xlu0 %v4582_v3 }
 0x875   :  { %v2306_v11 = vpop.permute.xlu1 %2305 }
 0x876   :  { %v2318_v8 = vmul.f32 %v2314_v49, %v2306_v11  ;;  %v2425_v27 = vmul.f32 %v2421_v17, %v2306_v11  ;;  %v2714_v11 = vmul.f32 %v4545_v13, %v4835_v18 }
 0x878   :  { %v2415_v14 = vsub.f32 1.0, %v2318_v8  ;;  %v2718_v8 = vperm.slane %v2714_v11, 0 }
 0x87a   :  { %v2417_v1 = vmul.f32 %v2415_v14, %v2413_v59 }
 0x87c   :  { %v4955_v44 = vadd.f32 %v2425_v27, %v2417_v1 }
 0x87e   :  { %v2333_v52 = vpop.permute.xlu1 %2332  ;;  %3609 = vmatmul.msk.f32.vlgmr.msrb.gmra.mxu2 %vm223_vm0, %v4955_v44  ;;  %3613 = vmatmul.msk.f32.vlgmr.msra.gmra.mxu1 %vm223_vm0, %v4955_v44 }
 0x87f   :  { %v2336_v25 = vmul.f32 %v2333_v52, %v4893_v57 }
 0x881   :  { %v2362_v16 = vadd.f32 %v2358_v56, %v2336_v25 }
 0x884   :  { %v2410_v63 = vpop.permute.xlu0 %2409 }
 0x886   :  { %v2384_v12 = vpop.permute.xlu1 %2383 }
 0x887   :  { %v2388_v58 = vadd.f32 %v2384_v12, %v2362_v16 }
 0x889   :  { %v2414_v43 = vadd.f32 %v2410_v63, %v2388_v58  ;;  %v2701_v58 = vperm.slane %v2697_v20, 0  ;;  %v2698_v63 = vmul.f32 %v4946_v33, %v4880_v36 }
 0x88b   :  { %v2418_v26 = vmul.f32 %v2416_v23, %v2414_v43  ;;  %v2702_v0 = vperm.slane %v2698_v63, 0  ;;  %v2682_v23 = vperm.slane %v4898_v41, 3 }
 0x88c   :  { %v2175_v40 = vpop.permute.xlu0 %2174 }
 0x88d   :  { %v4964_v22 = vadd.f32 %v2426_v37, %v2418_v26  ;;  %v2918_v26 = vperm.slane %v4928_v34, 0 }
 0x88f   :  { %3610 = vmatmul.msk.f32.gmra.mxu2 %vm223_vm0, %v4964_v22  ;;  %3614 = vmatmul.msk.f32.gmra.mxu1 %vm223_vm0, %v4964_v22 }
 0x894   :  { %v2179_v42 = vpop.permute.xlu0 %2178 }
 0x89c   :  { %v2539_v55 = vpop.permute.xlu0 %2538 }
 0x89f   :  { %v1021_v57 = vpop.xlane.xlu2 %1020 }
 0x8a0   :  { %v1023_v50 = vsub.f32 %v4744_v10, %v1021_v57 }
 0x8a2   :  { %v1026_v45 = vmul.f32 1.442695, %v1023_v50 }
 0x8a4   :  { %3769 = vpow2.f32 %v1026_v45  ;;  %v2543_v14 = vpop.permute.xlu0 %2542  ;;  %v3121_v45 = vmul.f32 %v4565_v62, %v4928_v34 }
 0x8aa   :  { %v3770_v7 = vpop.eup %3769 }
 0x8ab   :  { %v1031_v51 = vsel %vm579_vm2, %v3770_v7, 0.0 }
 0x8ac   :  { %1032 = vadd.xlane.f32.xlu1 %v1031_v51  ;;  %v2721_v25 = vpop.permute.xlu0 %2720  ;;  %v3125_v51 = vperm.slane %v3121_v45, 0 }
 0x8ad   :  { %v4973_v53 = vpop.f32.mrf.mxu1 }
 0x8b4   :  { %v2773_v12 = vpop.permute.xlu0 %2772 }
 0x8b5   :  { %v4975_v21 = vpop.f32.mrf.mxu1 }
 0x8b6   :  { %v2181_v24 = vmul.f32 %v2175_v40, %v4975_v21  ;;  %v5027_v40 = vsub.f32 1.0, %v4565_v62 }
 0x8b8   :  { %v3147_v11 = vmul.f32 %v5027_v40, %v4543_v4 }
 0x8bc   :  { %v2751_v57 = vpop.permute.xlu0 %2750 }
 0x8bd   :  { %v4978_v49 = vpop.f32.mrf.mxu1 }
 0x8be   :  { %v2182_v10 = vmul.f32 %v2179_v42, %v4978_v49 }
 0x8c0   :  { %2187 = vrot.lane.b32.xlu2 %v2182_v10, %s3954_s18  ;;  %v3122_v10 = vmul.f32 %v4567_v2, %v4946_v33 }
 0x8c5   :  { %2724 = vperm.xlu1 %3709, %v2718_v8  }
 0x8cd   :  { %3712 = vset.pattern.permute.xlu1 %v4582_v3 }
 0x8fb   :  { %v5004_v16 = vpop.f32.mrf.mxu1 }
 0x8fc   :  { %v2779_v18 = vmul.f32 %v2773_v12, %v5004_v16  ;;  %v2727_v36 = vmul.f32 %v2721_v25, %v5004_v16 }
 0x901   :  { %v4985_v59 = vpop.f32.mrf.mxu2 }
 0x902   :  { %v2545_v32 = vmul.f32 %v2539_v55, %v4985_v59  ;;  %v3151_v55 = vperm.slane %v3147_v11, 0 }
 0x904   :  { %2549 = vrot.lane.b32.xlu2 %v2545_v32, %s3954_s18  ;;  %v3126_v32 = vperm.slane %v3122_v10, 0 }
 0x90c   :  { %v5014_v37 = vpop.f32.mrf.mxu1 }
 0x90d   :  { %v2754_v50 = vmul.f32 %v2751_v57, %v5014_v37 }
 0x912   :  { %v4994_v54 = vpop.f32.mrf.mxu2 }
 0x913   :  { %v2546_v31 = vmul.f32 %v2543_v14, %v4994_v54 }
 0x91f   :  { %v1033_v17 = vpop.xlane.xlu1 %1032 }
 0x920   :  { %3771 = vrcp.f32 %v1033_v17  ;;  %v5036_v17 = vsub.f32 1.0, %v4567_v2 }
 0x926   :  { %v3772_v1 = vpop.eup %3771 }
 0x927   :  { %v4989_v27 = vmul.f32 %v3772_v1, %v3770_v7  ;;  %v2919_v7 = vperm.slane %v4946_v33, 0  ;;  %v3148_v1 = vmul.f32 %v5036_v17, %v4545_v13 }
 0x929   :  { %v2564_v52 = vperm.slane %v4989_v27, 3  ;;  %v2200_v60 = vperm.slane %v4989_v27, 1  ;;  %v2193_v56 = vperm.slane %v4989_v27, 0  ;;  %v2557_v43 = vperm.slane %v4989_v27, 2 }
 0x92b   :  { %2569 = vperm.xlu2 %3715, %v2564_v52   ;;  %2205 = vperm.xlu1 %3712, %v2200_v60   ;;  %v3152_v52 = vperm.slane %v3148_v1, 0  ;;  %v2905_v60 = vperm.slane %v4545_v13, 0 }
 0x92c   :  { %2198 = vperm.xlu0 %3711, %v2193_v56   ;;  %v2777_v56 = vpop.permute.xlu0 %2776 }
 0x92d   :  { %v2780_v25 = vmul.f32 %v2777_v56, %v5014_v37 }
 0x933   :  { %2680 = vperm.xlu2 %3715, %v2675_v5   ;;  %3713 = vset.pattern.permute.xlu1 %v5494_v19 }
 0x934   :  { %2551 = vrot.lane.b32.xlu0 %v2546_v31, %s3954_s18  ;;  %2529 = vperm.xlu1 %3713, %v2523_v9   ;;  %v2940_v9 = vperm.slane %v4989_v27, 4  ;;  %v2165_v20 = vpop.permute.xlu0 %2164 }
 0x935   :  { %3716 = vset.pattern.permute.xlu0 %v5494_v19  ;;  %v2168_v63 = vmul.f32 %v2165_v20, %v4978_v49  ;;  %v3095_v49 = vmul.f32 %v4565_v62, %v4543_v4 }
 0x937   :  { %v2725_v8 = vpop.permute.xlu1 %2724 }
 0x938   :  { %v2728_v14 = vmul.f32 %v2725_v8, %v5014_v37 }
 0x93b   :  { %2783 = vrot.lane.b32.xlu2 %v2779_v18, %s3955_s23 }
 0x93c   :  { %2704 = vperm.xlu0 %3716, %v2701_v58   ;;  %3714 = vset.pattern.permute.xlu1 %v4582_v3 }
 0x93d   :  { %2185 = vrot.lane.b32.xlu1 %v2181_v24, %s3954_s18  ;;  %v2747_v24 = vpop.permute.xlu2 %2746 }
 0x93e   :  { %v2753_v42 = vmul.f32 %v2747_v24, %v5004_v16 }
 0x943   :  { %2687 = vperm.xlu2 %3715, %v2682_v23  }
 0x944   :  { %2708 = vperm.xlu0 %3716, %v2702_v0  }
 0x945   :  { %2562 = vperm.xlu1 %3714, %v2557_v43   ;;  %v2161_v5 = vpop.permute.xlu2 %2160 }
 0x94b   :  { %3717 = vset.pattern.permute.xlu2 %v5494_v19 }
 0x94c   :  { %2759 = vrot.lane.b32.xlu0 %v2754_v50, %s3954_s18  ;;  %2921 = vperm.xlu2 %3717, %v2918_v26  }
 0x94d   :  { %2731 = vrot.lane.b32.xlu1 %v2727_v36, %s3953_s11  ;;  %v2526_v31 = vpop.permute.xlu2 %2525 }
 0x94e   :  { %3718 = vset.pattern.permute.xlu1 %v5494_v19 }
 0x954   :  { %2925 = vperm.xlu0 %3716, %v2919_v7   ;;  %3128 = vperm.xlu2 %3717, %v3125_v51  }
 0x955   :  { %2757 = vrot.lane.b32.xlu1 %v2753_v42, %s3954_s18  ;;  %v2188_v12 = vpop.permute.xlu2 %2187  ;;  %v2167_v42 = vmul.f32 %v2161_v5, %v4975_v21 }
 0x956   :  { %v2192_v0 = vadd.f32 %v2188_v12, %v2168_v63  ;;  %v3096_v12 = vmul.f32 %v4567_v2, %v4545_v13 }
 0x95c   :  { %3154 = vperm.xlu0 %3716, %v3151_v55   ;;  %3132 = vperm.xlu2 %3717, %v3126_v32   ;;  %v3099_v32 = vperm.slane %v3095_v49, 0 }
 0x95d   :  { %2733 = vrot.lane.b32.xlu1 %v2728_v14, %s3953_s11 }
 0x95e   :  { %v2550_v23 = vpop.permute.xlu2 %2549 }
 0x964   :  { %3158 = vperm.xlu0 %3716, %v3152_v52   ;;  %2911 = vperm.xlu2 %3717, %v2905_v60  }
 0x965   :  { %2785 = vrot.lane.b32.xlu1 %v2780_v25, %s3955_s23 }
 0x96c   :  { %3719 = vset.pattern.permute.xlu2 %v4582_v3  ;;  %3720 = vset.pattern.permute.xlu0 %v4582_v3 }
 0x96d   :  { %3102 = vperm.xlu1 %3718, %v3099_v32   ;;  %v2689_v32 = vperm.slane %v4552_v46, 0 }
 0x974   :  { %2945 = vperm.xlu2 %3719, %v2940_v9  }
 0x97c   :  { %3724 = vset.pattern.permute.xlu2 %v5494_v19 }
 0x985   :  { %v2570_v51 = vpop.permute.xlu2 %2569 }
 0x99d   :  { %v2206_v58 = vpop.permute.xlu1 %2205 }
 0x99e   :  { %v2199_v18 = vpop.permute.xlu0 %2198  ;;  %v2208_v43 = vmul.f32 %v2206_v58, %v2192_v0  ;;  %v3100_v0 = vperm.slane %v3096_v12, 0  ;;  %v5495_v12 = vld [vmem:[#allocation51_spill] sm:$0xff] }
 0x9a0   :  { %v2216_v57 = vsel %vm223_vm0, %v2208_v43, 0.0  ;;  %3106 = vperm.xlu1 %3718, %v3100_v0  }
 0x9a1   :  { %v2217_v7 = vrot.slane %v2216_v57, 4 }
 0x9a3   :  { %v2218_v11 = vadd.f32 %v2217_v7, %v2216_v57 }
 0x9a5   :  { %v2219_v14 = vrot.slane %v2218_v11, 2 }
 0x9a6   :  { %v2530_v26 = vpop.permute.xlu1 %2529  ;;  %v2552_v36 = vpop.permute.xlu0 %2551 }
 0x9a7   :  { %v2533_v50 = vmul.f32 %v2530_v26, %v4994_v54  ;;  %v2532_v54 = vmul.f32 %v2526_v31, %v4985_v59  ;;  %v2220_v21 = vadd.f32 %v2219_v14, %v2218_v11  ;;  %v2681_v31 = vpop.permute.xlu2 %2680 }
 0x9a9   :  { %v2556_v45 = vadd.f32 %v2552_v36, %v2533_v50  ;;  %v2555_v25 = vadd.f32 %v2550_v23, %v2532_v54  ;;  %v2221_v43 = vrot.slane %v2220_v21, 1 }
 0x9ab   :  { %v2572_v24 = vmul.f32 %v2570_v51, %v2556_v45  ;;  %v2222_v36 = vadd.f32 %v2221_v43, %v2220_v21  ;;  %v3850_v21 = vld [vmem:[%s5491_s22 + $0x8] sm:$0xff] }
 0x9ad   :  { %v2580_v8 = vsel %vm223_vm0, %v2572_v24, 0.0  ;;  %v2904_v24 = vperm.slane %v4543_v4, 0  ;;  %v2693_v4 = vmul.f32 %v2689_v32, %v2681_v31 }
 0x9ae   :  { %v2581_v52 = vrot.slane %v2580_v8, 4 }
 0x9af   :  { %v2186_v10 = vpop.permute.xlu1 %2185  ;;  %2907 = vperm.xlu1 %3718, %v2904_v24   ;;  %v2791_v46 = vsub.f32 1.0, %v2693_v4 }
 0x9b0   :  { %v2191_v55 = vadd.f32 %v2186_v10, %v2167_v42  ;;  %v2582_v9 = vadd.f32 %v2581_v52, %v2580_v8  ;;  %v2705_v42 = vpop.permute.xlu0 %2704  ;;  %v3849_v52 = vld [vmem:[%s5491_s22 + $0x10] sm:$0xff] }
 0x9b1   :  { %v2711_v14 = vmul.f32 %v2705_v42, %v5004_v16 }
 0x9b2   :  { %v2207_v1 = vmul.f32 %v2199_v18, %v2191_v55  ;;  %v2583_v26 = vrot.slane %v2582_v9, 2  ;;  %v3848_v55 = vld [vmem:[%s5491_s22 + $0x18] sm:$0xff] }
 0x9b4   :  { %v2209_v60 = vsel %vm223_vm0, %v2207_v1, 0.0  ;;  %v2584_v45 = vadd.f32 %v2583_v26, %v2582_v9 }
 0x9b5   :  { %v2210_v56 = vrot.slane %v2209_v60, 4 }
 0x9b6   :  { %v2585_v49 = vrot.slane %v2584_v45, 1 }
 0x9b7   :  { %v2211_v5 = vadd.f32 %v2210_v56, %v2209_v60  ;;  %v2563_v20 = vpop.permute.xlu1 %2562  ;;  %v2784_v60 = vpop.permute.xlu2 %2783 }
 0x9b8   :  { %v2571_v58 = vmul.f32 %v2563_v20, %v2555_v25  ;;  %v2586_v25 = vadd.f32 %v2585_v49, %v2584_v45  ;;  %v3851_v20 = vld [vmem:[%s5491_s22] sm:$0xff]  ;;  %v2709_v16 = vpop.permute.xlu0 %2708 }
 0x9b9   :  { %v2212_v63 = vrot.slane %v2211_v5, 2 }
 0x9ba   :  { %v2573_v18 = vsel %vm223_vm0, %v2571_v58, 0.0  ;;  %v2800_v58 = vperm.slane %v5495_v12, 0 }
 0x9bb   :  { %v2213_v57 = vadd.f32 %v2212_v63, %v2211_v5  ;;  %v2574_v59 = vrot.slane %v2573_v18, 4 }
 0x9bc   :  { %v2804_v0 = vmul.f32 %v2800_v58, %v2681_v31 }
 0x9bd   :  { %v2214_v23 = vrot.slane %v2213_v57, 1  ;;  %v2575_v50 = vadd.f32 %v2574_v59, %v2573_v18 }
 0x9bf   :  { %v2215_v7 = vadd.f32 %v2214_v23, %v2213_v57  ;;  %v2576_v51 = vrot.slane %v2575_v50, 2  ;;  %v2732_v13 = vpop.permute.xlu1 %2731  ;;  %v2712_v57 = vmul.f32 %v2709_v16, %v5014_v37  ;;  %v2688_v59 = vpop.permute.xlu2 %2687  ;;  %v5496_v23 = vld [vmem:[#allocation50_spill] sm:$0xff] }
 0x9c0   :  { %v2737_v54 = vadd.f32 %v2732_v13, %v2711_v14  ;;  %v5497_v13 = vld [vmem:[#allocation52_spill] sm:$0xff] }
 0x9c1   :  { %v2577_v11 = vadd.f32 %v2576_v51, %v2575_v50  ;;  %v2225_v10 = vsel %vm1329_vm11, %v2222_v36, %v2215_v7  ;;  %v2690_v50 = vperm.slane %v5496_v23, 0  ;;  %v2760_v7 = vpop.permute.xlu0 %2759  ;;  %v2801_v24 = vperm.slane %v5497_v13, 0 }
 0x9c2   :  { %3604 = vmatmul.msk.f32.vlgmr.msra.gmra.mxu3 %vm223_vm0, %v2225_v10 }
 0x9c3   :  { %v2578_v8 = vrot.slane %v2577_v11, 1  ;;  %2893 = vmatpush.msra.mxu3 %v3848_v55  ;;  %v2694_v45 = vmul.f32 %v2690_v50, %v2688_v59  ;;  %v2805_v10 = vmul.f32 %v2801_v24, %v2688_v59  ;;  %v3080_v59 = vmul.f32 %v5036_v17, %v4946_v33 }
 0x9c4   :  { %v3299_v24 = vperm.slane %v5027_v40, 0 }
 0x9c5   :  { %v2579_v1 = vadd.f32 %v2578_v8, %v2577_v11  ;;  %2894 = vmatpush.msra.mxu3 %v3849_v52  ;;  %v2792_v42 = vsub.f32 1.0, %v2694_v45  ;;  %v3084_v23 = vperm.slane %v3080_v59, 0  ;;  %v3300_v45 = vperm.slane %v5036_v17, 0 }
 0x9c7   :  { %v2758_v56 = vpop.permute.xlu1 %2757  ;;  %2895 = vmatpush.msra.mxu3 %v3850_v21  ;;  %v2589_v5 = vsel %vm1329_vm11, %v2586_v25, %v2579_v1  ;;  %v2922_v32 = vpop.permute.xlu2 %2921  ;;  %v2947_v21 = vperm.slane %v4989_v27, 5 }
 0x9c8   :  { %v2763_v9 = vadd.f32 %v2758_v56, %v2737_v54 }
 0x9c9   :  { %2896 = vmatpush.msra.mxu3 %v3851_v20  ;;  %v2926_v54 = vpop.permute.xlu0 %2925 }
 0x9ca   :  { %v2789_v63 = vadd.f32 %v2784_v60, %v2763_v9  ;;  %3611 = vmatmul.msk.f32.vlgmr.msrb.gmra.mxu3 %vm223_vm0, %v2589_v5 }
 0x9cc   :  { %v2793_v43 = vmul.f32 %v2791_v46, %v2789_v63  ;;  %v3079_v63 = vmul.f32 %v5027_v40, %v4928_v34  ;;  %v3057_v34 = vperm.slane %v4898_v41, 4 }
 0x9ce   :  { %v5073_v18 = vadd.f32 %v2804_v0, %v2793_v43  ;;  %v3083_v0 = vperm.slane %v3079_v63, 0 }
 0x9cf   :  { %v2734_v26 = vpop.permute.xlu1 %2733  ;;  %v3129_v56 = vpop.permute.xlu2 %3128 }
 0x9d0   :  { %3620 = vmatmul.msk.f32.vlgmr.msra.gmra.mxu2 %vm223_vm0, %v5073_v18  ;;  %v2738_v36 = vadd.f32 %v2734_v26, %v2712_v57  ;;  %v3064_v57 = vperm.slane %v4898_v41, 5  ;;  %v5499_v41 = vld [vmem:[#allocation49_spill] sm:$0xff] }
 0x9d1   :  { %v3155_v9 = vpop.permute.xlu0 %3154 }
 0x9d2   :  { %3616 = vmatmul.msk.f32.vlgmr.msra.gmra.mxu3 %vm223_vm0, %v5073_v18  ;;  %v2764_v51 = vadd.f32 %v2760_v7, %v2738_v36  ;;  %v5498_v7 = vld [vmem:[#allocation48_spill] sm:$0xff] }
 0x9d7   :  { %v2786_v31 = vpop.permute.xlu1 %2785  ;;  %v3133_v50 = vpop.permute.xlu2 %3132 }
 0x9d8   :  { %v2790_v11 = vadd.f32 %v2786_v31, %v2764_v51  ;;  %v699_v51 = vsel %vm579_vm2, %v5498_v7, -inf  ;;  %v702_v31 = vsel %vm579_vm2, %v5499_v41, -inf }
 0x9d9   :  { %v3159_v43 = vpop.permute.xlu0 %3158 }
 0x9da   :  { %v2794_v37 = vmul.f32 %v2792_v42, %v2790_v11 }
 0x9dc   :  { %v5082_v49 = vadd.f32 %v2805_v10, %v2794_v37 }
 0x9de   :  { %3617 = vmatmul.msk.f32.gmra.mxu3 %vm223_vm0, %v5082_v49  ;;  %3621 = vmatmul.msk.f32.gmra.mxu2 %vm223_vm0, %v5082_v49 }
 0x9df   :  { %v3103_v14 = vpop.permute.xlu1 %3102  ;;  %v2912_v33 = vpop.permute.xlu2 %2911 }
 0x9e7   :  { %v2946_v10 = vpop.permute.xlu2 %2945 }
 0xa12   :  { %v3107_v58 = vpop.permute.xlu1 %3106 }
 0xa21   :  { %v2908_v13 = vpop.permute.xlu1 %2907 }
 0xa45   :  { %v5088_v8 = vpop.f32.mrf.mxu3 }
 0xa4d   :  { %v5090_v55 = vpop.f32.mrf.mxu3 }
 0xa53   :  { %v5092_v1 = vpop.f32.mrf.mxu2 }
 0xa54   :  { %v3109_v52 = vmul.f32 %v3103_v14, %v5092_v1  ;;  %v3135_v25 = vmul.f32 %v3129_v56, %v5092_v1  ;;  %v3161_v16 = vmul.f32 %v3155_v9, %v5092_v1  ;;  %v3286_v14 = vperm.slane %v4567_v2, 0 }
 0xa55   :  { %v2898_v4 = vpop.f32.mrf.mxu3 }
 0xa56   :  { %v2928_v60 = vmul.f32 %v2922_v32, %v2898_v4  ;;  %3113 = vrot.lane.b32.xlu2 %v3109_v52, %s3953_s11 }
 0xa58   :  { %2932 = vrot.lane.b32.xlu0 %v2928_v60, %s3954_s18 }
 0xa5e   :  { %3139 = vrot.lane.b32.xlu2 %v3135_v25, %s3954_s18 }
 0xa60   :  { %2952 = vperm.xlu0 %3720, %v2947_v21  }
 0xa61   :  { %v2901_v5 = vpop.f32.mrf.mxu3  ;;  %v5100_v20 = vpop.f32.mrf.mxu2 }
 0xa62   :  { %v2929_v12 = vmul.f32 %v2926_v54, %v2901_v5  ;;  %v3110_v46 = vmul.f32 %v3107_v58, %v5100_v20  ;;  %v3162_v26 = vmul.f32 %v3159_v43, %v5100_v20  ;;  %v3136_v36 = vmul.f32 %v3133_v50, %v5100_v20 }
 0xa63   :  { %v2915_v52 = vmul.f32 %v2912_v33, %v2901_v5 }
 0xa64   :  { %2934 = vrot.lane.b32.xlu1 %v2929_v12, %s3954_s18 }
 0xa66   :  { %3115 = vrot.lane.b32.xlu2 %v3110_v46, %s3953_s11 }
 0xa68   :  { %3165 = vrot.lane.b32.xlu0 %v3161_v16, %s3955_s23 }
 0xa6c   :  { %3086 = vperm.xlu1 %3718, %v3083_v0  }
 0xa6e   :  { %3167 = vrot.lane.b32.xlu2 %v3162_v26, %s3955_s23 }
 0xa70   :  { %3069 = vperm.xlu0 %3720, %v3064_v57  }
 0xa74   :  { %3721 = vset.pattern.permute.xlu1 %v4582_v3 }
 0xa78   :  { %3723 = vset.pattern.permute.xlu0 %v5494_v19 }
 0xa79   :  { %3302 = vperm.xlu0 %3723, %v3299_v24  }
 0xa7c   :  { %3062 = vperm.xlu1 %3721, %v3057_v34   ;;  %v3321_v34 = vperm.slane %v4989_v27, 6 }
 0xa81   :  { %3727 = vset.pattern.permute.xlu0 %v4582_v3 }
 0xa84   :  { %3722 = vset.pattern.permute.xlu1 %v5494_v19  ;;  %v2914_v19 = vmul.f32 %v2908_v13, %v2898_v4 }
 0xa85   :  { %3090 = vperm.xlu1 %3722, %v3084_v23  }
 0xa8d   :  { %3141 = vrot.lane.b32.xlu1 %v3136_v36, %s3954_s18 }
 0xa95   :  { %3306 = vperm.xlu1 %3722, %v3300_v45   ;;  %v5500_v45 = vld [vmem:[#allocation53_spill] sm:$0xff] }
 0xa97   :  { %700 = vmax.xlane.f32.xlu2 %v699_v51  ;;  %v3071_v51 = vperm.slane %v5500_v45, 0 }
 0xab0   :  { %v3114_v63 = vpop.permute.xlu2 %3113 }
 0xab8   :  { %v3140_v50 = vpop.permute.xlu2 %3139 }
 0xabf   :  { %703 = vmax.xlane.f32.xlu1 %v702_v31  ;;  %v3179_v31 = vld [vmem:[#allocation1 + $0x4] ss:$9 sm:$0xff] }
 0xac0   :  { %v3182_v24 = vperm.slane %v3179_v31, 0 }
 0xaca   :  { %v2933_v42 = vpop.permute.xlu0 %2932 }
 0xacb   :  { %v2938_v11 = vadd.f32 %v2933_v42, %v2914_v19 }
 0xacd   :  { %v2954_v37 = vmul.f32 %v2946_v10, %v2938_v11 }
 0xacf   :  { %v2956_v17 = vsel %vm223_vm0, %v2954_v37, 0.0 }
 0xad0   :  { %v2957_v32 = vrot.slane %v2956_v17, 4 }
 0xad2   :  { %v2958_v54 = vadd.f32 %v2957_v32, %v2956_v17  ;;  %v2953_v25 = vpop.permute.xlu0 %2952  ;;  %v3116_v17 = vpop.permute.xlu2 %3115 }
 0xad4   :  { %v2959_v40 = vrot.slane %v2958_v54, 2 }
 0xad6   :  { %v2935_v60 = vpop.permute.xlu1 %2934  ;;  %v2960_v12 = vadd.f32 %v2959_v40, %v2958_v54  ;;  %v3181_v40 = vld [vmem:[#allocation1 + $0x5] ss:$9 sm:$0xff] }
 0xad7   :  { %v2939_v56 = vadd.f32 %v2935_v60, %v2915_v52  ;;  %v5501_v60 = vld [vmem:[#allocation54_spill] sm:$0xff] }
 0xad8   :  { %3292 = vperm.xlu1 %3722, %v3286_v14   ;;  %v2961_v16 = vrot.slane %v2960_v12, 1  ;;  %v3285_v14 = vperm.slane %v4565_v62, 0 }
 0xad9   :  { %v2955_v4 = vmul.f32 %v2953_v25, %v2939_v56  ;;  %v3072_v56 = vperm.slane %v5501_v60, 0 }
 0xada   :  { %v2962_v26 = vadd.f32 %v2961_v16, %v2960_v12  ;;  %v3166_v19 = vpop.permute.xlu0 %3165  ;;  %3288 = vperm.xlu2 %3724, %v3285_v14   ;;  %v3168_v12 = vpop.permute.xlu2 %3167  ;;  %v5175_v14 = vld [vmem:[%s5503_s21] ss:$0 sm:$0xff] }
 0xadb   :  { %v2963_v21 = vsel %vm223_vm0, %v2955_v4, 0.0 }
 0xadc   :  { %v2964_v9 = vrot.slane %v2963_v21, 4 }
 0xade   :  { %v2965_v58 = vadd.f32 %v2964_v9, %v2963_v21  ;;  %v3087_v2 = vpop.permute.xlu1 %3086 }
 0xadf   :  { %v3093_v43 = vmul.f32 %v3087_v2, %v5092_v1 }
 0xae0   :  { %v2966_v46 = vrot.slane %v2965_v58, 2  ;;  %3725 = vset.pattern.permute.xlu1 %v4582_v3 }
 0xae1   :  { %v3119_v23 = vadd.f32 %v3114_v63, %v3093_v43 }
 0xae2   :  { %v2967_v0 = vadd.f32 %v2966_v46, %v2965_v58  ;;  %v3070_v54 = vpop.permute.xlu0 %3069  ;;  %3726 = vset.pattern.permute.xlu2 %v4582_v3  ;;  %v3183_v58 = vperm.slane %v3181_v40, 0 }
 0xae3   :  { %v3145_v36 = vadd.f32 %v3140_v50, %v3119_v23  ;;  %v3076_v25 = vmul.f32 %v3072_v56, %v3070_v54 }
 0xae4   :  { %v2968_v5 = vrot.slane %v2967_v0, 1  ;;  %v3187_v16 = vmul.f32 %v3183_v58, %v3070_v54 }
 0xae5   :  { %v3171_v1 = vadd.f32 %v3166_v19, %v3145_v36  ;;  %v3174_v46 = vsub.f32 1.0, %v3076_v25 }
 0xae6   :  { %v2969_v57 = vadd.f32 %v2968_v5, %v2967_v0 }
 0xae8   :  { %3326 = vperm.xlu1 %3725, %v3321_v34   ;;  %v2972_v59 = vsel %vm1329_vm11, %v2969_v57, %v2962_v26 }
 0xae9   :  { %3618 = vmatmul.msk.f32.vlgmr.msra.gmra.mxu0 %vm223_vm0, %v2972_v59 }
 0xaeb   :  { %v3303_v57 = vpop.permute.xlu0 %3302 }
 0xaee   :  { %v3063_v33 = vpop.permute.xlu1 %3062 }
 0xaef   :  { %v3075_v13 = vmul.f32 %v3071_v51, %v3063_v33  ;;  %v3186_v10 = vmul.f32 %v3182_v24, %v3063_v33  ;;  %v3328_v51 = vperm.slane %v4989_v27, 7 }
 0xaf1   :  { %v3173_v42 = vsub.f32 1.0, %v3075_v13 }
 0xaf3   :  { %v3175_v11 = vmul.f32 %v3173_v42, %v3171_v1 }
 0xaf5   :  { %v5136_v37 = vadd.f32 %v3186_v10, %v3175_v11 }
 0xaf7   :  { %v3091_v32 = vpop.permute.xlu1 %3090  ;;  %3623 = vmatmul.msk.f32.vlgmr.msrb.gmra.mxu0 %vm223_vm0, %v5136_v37 }
 0xaf8   :  { %v3094_v52 = vmul.f32 %v3091_v32, %v5100_v20 }
 0xafa   :  { %v3120_v4 = vadd.f32 %v3116_v17, %v3094_v52 }
 0xaff   :  { %v3142_v21 = vpop.permute.xlu1 %3141 }
 0xb00   :  { %v3146_v9 = vadd.f32 %v3142_v21, %v3120_v4 }
 0xb02   :  { %v3172_v63 = vadd.f32 %v3168_v12, %v3146_v9 }
 0xb04   :  { %v3176_v0 = vmul.f32 %v3174_v46, %v3172_v63 }
 0xb06   :  { %v5144_v62 = vadd.f32 %v3187_v16, %v3176_v0 }
 0xb07   :  { %v3307_v23 = vpop.permute.xlu1 %3306 }
 0xb08   :  { %3624 = vmatmul.msk.f32.gmra.mxu0 %vm223_vm0, %v5144_v62 }
 0xb0a   :  { %v701_v20 = vpop.xlane.xlu2 %700 }
 0xb0b   :  { %v705_v2 = vsub.f32 %v5498_v7, %v701_v20 }
 0xb0d   :  { %v707_v5 = vmul.f32 1.442695, %v705_v2 }
 0xb0f   :  { %3773 = vpow2.f32 %v707_v5 }
 0xb15   :  { %v3774_v43 = vpop.eup %3773 }
 0xb16   :  { %v711_v26 = vsel %vm579_vm2, %v3774_v43, 0.0 }
 0xb17   :  { %712 = vadd.xlane.f32.xlu0 %v711_v26 }
 0xb32   :  { %v704_v7 = vpop.xlane.xlu1 %703 }
 0xb33   :  { %v706_v31 = vsub.f32 %v5499_v41, %v704_v7  ;;  %v5165_v41 = vld [vmem:[%s5502_s0] ss:$0 sm:$0xff] }
 0xb34   :  { %v5169_v11 = vadd.f32 %v5165_v41, %v4846_v35  ;;  %v3289_v56 = vpop.permute.xlu2 %3288 }
 0xb35   :  { %v709_v19 = vmul.f32 1.442695, %v706_v31 }
 0xb36   :  { %v1458_v10 = vrot.slane %v5169_v11, 4 }
 0xb38   :  { %v1480_v17 = vadd.f32 %v4746_v39, %v1458_v10 }
 0xb4a   :  { %v3293_v4 = vpop.permute.xlu1 %3292 }
 0xb5a   :  { %v3327_v63 = vpop.permute.xlu1 %3326 }
 0xb66   :  { %v5150_v3 = vpop.f32.mrf.mxu0 }
 0xb74   :  { %v3279_v34 = vpop.f32.mrf.mxu0 }
 0xb75   :  { %v3309_v59 = vmul.f32 %v3303_v57, %v3279_v34  ;;  %v3295_v21 = vmul.f32 %v3289_v56, %v3279_v34  ;;  %v5507_v56 = vld [vmem:[#allocation46_spill] sm:$0xff] }
 0xb77   :  { %3313 = vrot.lane.b32.xlu0 %v3309_v59, %s3954_s18 }
 0xb85   :  { %v3282_v50 = vpop.f32.mrf.mxu0 }
 0xb86   :  { %v3310_v36 = vmul.f32 %v3307_v23, %v3282_v50  ;;  %v3296_v40 = vmul.f32 %v3293_v4, %v3282_v50 }
 0xb88   :  { %3315 = vrot.lane.b32.xlu2 %v3310_v36, %s3954_s18 }
 0xb8a   :  { %v713_v45 = vpop.xlane.xlu0 %712 }
 0xb8b   :  { %3775 = vrcp.f32 %v713_v45 }
 0xb8c   :  { %3777 = vpow2.f32 %v709_v19 }
 0xb8d   :  { %3779 = vtanh.f32 %v1480_v17  ;;  %v5188_v17 = vld [vmem:[%s5504_s25] ss:$0 sm:$0xff] }
 0xb90   :  { %3333 = vperm.xlu2 %3726, %v3328_v51  }
 0xb91   :  { %v3776_v33 = vpop.eup %3775 }
 0xb92   :  { %v5156_v13 = vmul.f32 %v3776_v33, %v3774_v43  ;;  %v5160_v42 = vpop.eup %3777 }
 0xb93   :  { %v714_v27 = vsel %vm579_vm2, %v5160_v42, 0.0  ;;  %v3780_v52 = vpop.eup %3779 }
 0xb94   :  { %v1289_v24 = vperm.slane %v5156_v13, 2  ;;  %v1296_v1 = vperm.slane %v5156_v13, 3  ;;  %v1681_v32 = vperm.slane %v5156_v13, 4  ;;  %v1486_v54 = vmul.f32 %v3780_v52, %v5175_v14 }
 0xb95   :  { %v1688_v35 = vperm.slane %v5156_v13, 5  ;;  %v2069_v25 = vperm.slane %v5156_v13, 7 }
 0xb96   :  { %1294 = vperm.xlu1 %3725, %v1289_v24   ;;  %v1487_v60 = vsel %vm1332_vm12, %v1486_v54, 0.0 }
 0xb98   :  { %1301 = vperm.xlu2 %3726, %v1296_v1  }
 0xba1   :  { %715 = vadd.xlane.f32.xlu0 %v714_v27 }
 0xbb5   :  { %1686 = vperm.xlu0 %3727, %v1681_v32   ;;  %v5191_v32 = vld [vmem:[%s5505_s29] ss:$0 sm:$0xff] }
 0xbc1   :  { %1488 = vadd.xlane.f32.xlu2 %v1487_v60  ;;  %v5506_v60 = vld [vmem:[#allocation44_spill] sm:$0xff] }
 0xbd9   :  { %1693 = vperm.xlu2 %3726, %v1688_v35   ;;  %v1079_v35 = vmul.f32 %v5188_v17, %v5506_v60 }
 0xbe1   :  { %2074 = vperm.xlu2 %3726, %v2069_v25   ;;  %v1073_v25 = vmul.f32 %v5191_v32, %v5507_v56  ;;  %v1845_v56 = vrot.slane %v5169_v11, 6 }
 0xbe2   :  { %v3316_v39 = vpop.permute.xlu2 %3315 }
 0xbe3   :  { %v3320_v9 = vadd.f32 %v3316_v39, %v3296_v40 }
 0xbe9   :  { %v3314_v12 = vpop.permute.xlu0 %3313 }
 0xbea   :  { %v3319_v58 = vadd.f32 %v3314_v12, %v3295_v21  ;;  %v3334_v46 = vpop.permute.xlu2 %3333  ;;  %v5199_v21 = vadd.f32 %v1079_v35, %v1073_v25 }
 0xbeb   :  { %v3336_v16 = vmul.f32 %v3334_v46, %v3320_v9 }
 0xbec   :  { %v3335_v0 = vmul.f32 %v3327_v63, %v3319_v58  ;;  %v1321_v63 = vrot.slane %v5199_v21, 3 }
 0xbed   :  { %v3344_v20 = vsel %vm223_vm0, %v3336_v16, 0.0 }
 0xbee   :  { %v3337_v2 = vsel %vm223_vm0, %v3335_v0, 0.0  ;;  %v3345_v5 = vrot.slane %v3344_v20, 4 }
 0xbef   :  { %v3338_v43 = vrot.slane %v3337_v2, 4 }
 0xbf0   :  { %v3346_v26 = vadd.f32 %v3345_v5, %v3344_v20 }
 0xbf1   :  { %v3339_v57 = vadd.f32 %v3338_v43, %v3337_v2  ;;  %v1320_v2 = vrot.slane %v5199_v21, 2 }
 0xbf2   :  { %v3347_v59 = vrot.slane %v3346_v26, 2  ;;  %v1302_v23 = vpop.permute.xlu2 %1301 }
 0xbf3   :  { %v3340_v34 = vrot.slane %v3339_v57, 2  ;;  %v1304_v45 = vmul.f32 %v1302_v23, %v4638_v28 }
 0xbf4   :  { %v3348_v50 = vadd.f32 %v3347_v59, %v3346_v26 }
 0xbf5   :  { %v3341_v36 = vadd.f32 %v3340_v34, %v3339_v57  ;;  %v1312_v19 = vsel %vm223_vm0, %v1304_v45, 0.0 }
 0xbf6   :  { %v3349_v7 = vrot.slane %v3348_v50, 1  ;;  %v1313_v1 = vrot.slane %v1312_v19, 4 }
 0xbf7   :  { %v3342_v51 = vrot.slane %v3341_v36, 1 }
 0xbf8   :  { %v3350_v31 = vadd.f32 %v3349_v7, %v3348_v50  ;;  %v1314_v27 = vadd.f32 %v1313_v1, %v1312_v19 }
 0xbf9   :  { %v3343_v33 = vadd.f32 %v3342_v51, %v3341_v36 }
 0xbfa   :  { %v1315_v10 = vrot.slane %v1314_v27, 2 }
 0xbfb   :  { %v3353_v24 = vsel %vm1329_vm11, %v3350_v31, %v3343_v33 }
 0xbfc   :  { %3625 = vmatmul.msk.f32.vlgmr.msrb.gmra.mxu1 %vm223_vm0, %v3353_v24  ;;  %v1316_v52 = vadd.f32 %v1315_v10, %v1314_v27 }
 0xbfe   :  { %v1317_v4 = vrot.slane %v1316_v52, 1 }
 0xc00   :  { %v1318_v12 = vadd.f32 %v1317_v4, %v1316_v52 }
 0xc02   :  { %v1325_v0 = vmul.f32 %v1321_v63, %v1318_v12  ;;  %v1712_v12 = vrot.slane %v5199_v21, 5 }
 0xc04   :  { %v1328_v43 = vrot.slane %v1325_v0, 7 }
 0xc08   :  { %v1295_v54 = vpop.permute.xlu1 %1294 }
 0xc09   :  { %v1303_v28 = vmul.f32 %v1295_v54, %v4629_v38 }
 0xc0b   :  { %v1305_v39 = vsel %vm223_vm0, %v1303_v28, 0.0 }
 0xc0c   :  { %v1306_v40 = vrot.slane %v1305_v39, 4 }
 0xc0e   :  { %v1307_v9 = vadd.f32 %v1306_v40, %v1305_v39  ;;  %v1867_v39 = vadd.f32 %v4973_v53, %v1845_v56 }
 0xc10   :  { %v1308_v58 = vrot.slane %v1307_v9, 2 }
 0xc12   :  { %v1309_v46 = vadd.f32 %v1308_v58, %v1307_v9 }
 0xc14   :  { %v1310_v16 = vrot.slane %v1309_v46, 1  ;;  %v716_v38 = vpop.xlane.xlu0 %715 }
 0xc15   :  { %3781 = vrcp.f32 %v716_v38 }
 0xc16   :  { %v1311_v20 = vadd.f32 %v1310_v16, %v1309_v46  ;;  %3783 = vtanh.f32 %v1867_v39 }
 0xc18   :  { %v1324_v5 = vmul.f32 %v1320_v2, %v1311_v20  ;;  %v2062_v20 = vperm.slane %v5156_v13, 6 }
 0xc1a   :  { %v1330_v26 = vsel %vm1329_vm11, %v1328_v43, %v1324_v5  ;;  %v5223_v5 = vadd.f32 %v5165_v41, %v4849_v15  ;;  %v5509_v15 = vld [vmem:[#allocation47_spill] sm:$0xff] }
 0xc1b   :  { %v3782_v57 = vpop.eup %3781  ;;  %v1333_v59 = vsel %vm1332_vm12, %v1330_v26, 0.0  ;;  %v1074_v41 = vmul.f32 %v5191_v32, %v5509_v15 }
 0xc1c   :  { %v720_v23 = vmul.f32 %v3782_v57, %v5160_v42  ;;  %1334 = vadd.xlane.f32.xlu1 %v1333_v59  ;;  %v3784_v11 = vpop.eup %3783  ;;  %v2246_v26 = vadd.f32 %v5088_v8, %v5223_v5 }
 0xc1d   :  { %v1870_v0 = vmul.f32 %v3784_v11, %v5175_v14 }
 0xc1e   :  { %v2815_v34 = vperm.slane %v720_v23, 3  ;;  %v2436_v50 = vperm.slane %v720_v23, 1  ;;  %v3197_v36 = vperm.slane %v720_v23, 5  ;;  %v2429_v45 = vperm.slane %v720_v23, 0 }
 0xc1f   :  { %v3190_v51 = vperm.slane %v720_v23, 4  ;;  %v1871_v53 = vsel %vm1332_vm12, %v1870_v0, 0.0  ;;  %v2808_v2 = vperm.slane %v720_v23, 2  ;;  %3785 = vtanh.f32 %v2246_v26 }
 0xc20   :  { %2820 = vperm.xlu2 %3726, %v2815_v34   ;;  %2441 = vperm.xlu0 %3727, %v2436_v50  }
 0xc27   :  { %v1687_v7 = vpop.permute.xlu0 %1686 }
 0xc28   :  { %3202 = vperm.xlu2 %3726, %v3197_v36   ;;  %2434 = vperm.xlu0 %3727, %v2429_v45   ;;  %v1695_v31 = vmul.f32 %v1687_v7, %v4784_v48  ;;  %v5508_v45 = vld [vmem:[#allocation45_spill] sm:$0xff] }
 0xc29   :  { %v1080_v7 = vmul.f32 %v5188_v17, %v5508_v45 }
 0xc2a   :  { %v1697_v33 = vsel %vm223_vm0, %v1695_v31, 0.0  ;;  %v3786_v31 = vpop.eup %3785 }
 0xc2b   :  { %v1698_v24 = vrot.slane %v1697_v33, 4 }
 0xc2d   :  { %v1699_v42 = vadd.f32 %v1698_v24, %v1697_v33  ;;  %v5235_v24 = vadd.f32 %v1080_v7, %v1074_v41 }
 0xc2f   :  { %v1700_v10 = vrot.slane %v1699_v42, 2 }
 0xc30   :  { %3195 = vperm.xlu0 %3727, %v3190_v51  }
 0xc31   :  { %v1701_v28 = vadd.f32 %v1700_v10, %v1699_v42 }
 0xc33   :  { %v1702_v48 = vrot.slane %v1701_v28, 1 }
 0xc34   :  { %v5208_v19 = vpop.xlane.xlu2 %1488 }
 0xc35   :  { %v1703_v40 = vadd.f32 %v1702_v48, %v1701_v28 }
 0xc3c   :  { %v1694_v1 = vpop.permute.xlu2 %1693 }
 0xc3d   :  { %v1696_v27 = vmul.f32 %v1694_v1, %v4812_v61  ;;  %v1711_v61 = vrot.slane %v5199_v21, 4  ;;  %v2249_v1 = vmul.f32 %v3786_v31, %v5175_v14 }
 0xc3f   :  { %v1704_v52 = vsel %vm223_vm0, %v1696_v27, 0.0  ;;  %v1715_v46 = vmul.f32 %v1711_v61, %v1703_v40  ;;  %v2973_v27 = vrot.slane %v5223_v5, 4  ;;  %v2250_v32 = vsel %vm1332_vm12, %v2249_v1, 0.0 }
 0xc40   :  { %v1705_v54 = vrot.slane %v1704_v52, 4 }
 0xc41   :  { %v2995_v17 = vadd.f32 %v5150_v3, %v2973_v27 }
 0xc42   :  { %v1706_v60 = vadd.f32 %v1705_v54, %v1704_v52  ;;  %v2460_v54 = vrot.slane %v5235_v24, 1 }
 0xc43   :  { %3787 = vtanh.f32 %v2995_v17 }
 0xc44   :  { %v1707_v35 = vrot.slane %v1706_v60, 2  ;;  %v2075_v61 = vpop.permute.xlu2 %2074 }
 0xc46   :  { %v1708_v25 = vadd.f32 %v1707_v35, %v1706_v60 }
 0xc48   :  { %v1709_v4 = vrot.slane %v1708_v25, 1 }
 0xc4a   :  { %v1710_v9 = vadd.f32 %v1709_v4, %v1708_v25  ;;  %v3788_v4 = vpop.eup %3787 }
 0xc4b   :  { %v2998_v3 = vmul.f32 %v3788_v4, %v5175_v14 }
 0xc4c   :  { %v1716_v58 = vmul.f32 %v1712_v12, %v1710_v9 }
 0xc4d   :  { %v2999_v40 = vsel %vm1332_vm12, %v2998_v3, 0.0  ;;  %v2093_v3 = vrot.slane %v5199_v21, 7 }
 0xc4e   :  { %v1719_v63 = vrot.slane %v1716_v58, 7  ;;  %v5251_v58 = vld [vmem:[#allocation2] ss:$0 sm:$0xff] }
 0xc50   :  { %v1720_v16 = vsel %vm1329_vm11, %v1719_v63, %v1715_v46 }
 0xc51   :  { %v1722_v38 = vsel %vm1332_vm12, %v1720_v16, 0.0 }
 0xc52   :  { %1723 = vadd.xlane.f32.xlu1 %v1722_v38  ;;  %v2077_v38 = vmul.f32 %v2075_v61, %v4864_v6 }
 0xc54   :  { %v2085_v0 = vsel %vm223_vm0, %v2077_v38, 0.0 }
 0xc5a   :  { %1872 = vadd.xlane.f32.xlu1 %v1871_v53 }
 0xc73   :  { %2067 = vperm.xlu1 %3725, %v2062_v20   ;;  %v2086_v20 = vrot.slane %v2085_v0, 4 }
 0xc75   :  { %v2087_v26 = vadd.f32 %v2086_v20, %v2085_v0  ;;  %v2092_v20 = vrot.slane %v5199_v21, 6 }
 0xc7a   :  { %v2821_v11 = vpop.permute.xlu2 %2820 }
 0xc7b   :  { %2813 = vperm.xlu1 %3725, %v2808_v2  }
 0xc8f   :  { %v5247_v9 = vpop.xlane.xlu1 %1334 }
 0xc92   :  { %v2442_v43 = vpop.permute.xlu0 %2441 }
 0xc93   :  { %v2444_v57 = vmul.f32 %v2442_v43, %v4964_v22  ;;  %v2823_v43 = vmul.f32 %v2821_v11, %v5082_v49 }
 0xc95   :  { %v2452_v59 = vsel %vm223_vm0, %v2444_v57, 0.0  ;;  %v3203_v57 = vpop.permute.xlu2 %3202 }
 0xc96   :  { %v2453_v34 = vrot.slane %v2452_v59, 4 }
 0xc98   :  { %v2454_v50 = vadd.f32 %v2453_v34, %v2452_v59  ;;  %v2831_v59 = vsel %vm223_vm0, %v2823_v43, 0.0 }
 0xc99   :  { %v2832_v6 = vrot.slane %v2831_v59, 4 }
 0xc9a   :  { %v2455_v36 = vrot.slane %v2454_v50, 2  ;;  %v2435_v13 = vpop.permute.xlu0 %2434 }
 0xc9b   :  { %v2443_v23 = vmul.f32 %v2435_v13, %v4955_v44 }
 0xc9c   :  { %v2456_v51 = vadd.f32 %v2455_v36, %v2454_v50  ;;  %v2088_v50 = vrot.slane %v2087_v26, 2  ;;  %v3205_v36 = vmul.f32 %v3203_v57, %v5144_v62  ;;  %v3375_v57 = vpop.f32.mrf.mxu1 }
 0xc9d   :  { %v2445_v8 = vsel %vm223_vm0, %v2443_v23, 0.0 }
 0xc9e   :  { %v2457_v22 = vrot.slane %v2456_v51, 1  ;;  %v2446_v33 = vrot.slane %v2445_v8, 4  ;;  %v2089_v7 = vadd.f32 %v2088_v50, %v2087_v26  ;;  %v3213_v15 = vsel %vm223_vm0, %v3205_v36, 0.0 }
 0xc9f   :  { %v3214_v62 = vrot.slane %v3213_v15, 4 }
 0xca0   :  { %v2447_v42 = vadd.f32 %v2446_v33, %v2445_v8  ;;  %v2458_v44 = vadd.f32 %v2457_v22, %v2456_v51  ;;  %v2833_v51 = vadd.f32 %v2832_v6, %v2831_v59  ;;  %v2090_v1 = vrot.slane %v2089_v7, 1 }
 0xca2   :  { %v2448_v10 = vrot.slane %v2447_v42, 2  ;;  %v2464_v60 = vmul.f32 %v2460_v54, %v2458_v44  ;;  %v3196_v34 = vpop.permute.xlu0 %3195  ;;  %v2834_v44 = vrot.slane %v2833_v51, 2  ;;  %v3215_v54 = vadd.f32 %v3214_v62, %v3213_v15 }
 0xca3   :  { %v3204_v23 = vmul.f32 %v3196_v34, %v5136_v37 }
 0xca4   :  { %v2449_v52 = vadd.f32 %v2448_v10, %v2447_v42  ;;  %v2467_v48 = vrot.slane %v2464_v60, 7  ;;  %v3216_v61 = vrot.slane %v3215_v54, 2 }
 0xca5   :  { %2251 = vadd.xlane.f32.xlu1 %v2250_v32  ;;  %v3206_v49 = vsel %vm223_vm0, %v3204_v23, 0.0 }
 0xca6   :  { %v2450_v28 = vrot.slane %v2449_v52, 1  ;;  %v3207_v10 = vrot.slane %v3206_v49, 4 }
 0xca8   :  { %v2451_v35 = vadd.f32 %v2450_v28, %v2449_v52 }
 0xcaa   :  { %v2463_v56 = vmul.f32 %v2451_v35, %v5235_v24  ;;  %v2591_v35 = vrot.slane %v5223_v5, 2 }
 0xcac   :  { %v2468_v25 = vsel %vm1329_vm11, %v2467_v48, %v2463_v56  ;;  %v2835_v56 = vadd.f32 %v2834_v44, %v2833_v51  ;;  %v3208_v48 = vadd.f32 %v3207_v10, %v3206_v49  ;;  %v3220_v10 = vrot.slane %v5235_v24, 4 }
 0xcad   :  { %v2470_v39 = vsel %vm1332_vm12, %v2468_v25, 0.0 }
 0xcae   :  { %2471 = vadd.xlane.f32.xlu0 %v2470_v39  ;;  %v2836_v38 = vrot.slane %v2835_v56, 1  ;;  %v3209_v11 = vrot.slane %v3208_v48, 2 }
 0xcb0   :  { %v3210_v34 = vadd.f32 %v3209_v11, %v3208_v48 }
 0xcb6   :  { %3000 = vadd.xlane.f32.xlu0 %v2999_v40  ;;  %v2613_v40 = vadd.f32 %v5090_v55, %v2591_v35  ;;  %v2837_v55 = vadd.f32 %v2836_v38, %v2835_v56  ;;  %v5511_v35 = vld [vmem:[#allocation43_spill] sm:$0xff] }
 0xcc5   :  { %v5249_v12 = vpop.xlane.xlu1 %1723 }
 0xccd   :  { %v1873_v46 = vpop.xlane.xlu1 %1872 }
 0xcce   :  { %v1874_v63 = vadd.f32 %v5251_v58, %v1873_v46 }
 0xcd0   :  { %v3598_v16 = vmul.f32 -1.442695, %v1874_v63 }
 0xcd2   :  { %3789 = vpow2.f32 %v3598_v16 }
 0xcd8   :  { %v3790_v53 = vpop.eup %3789 }
 0xcd9   :  { %v1878_v2 = vadd.f32 1.0, %v3790_v53 }
 0xcdb   :  { %3791 = vrcp.f32 %v1878_v2  ;;  %v1890_v8 = vand.u32 2147483648, %v1878_v2  ;;  %v1888_v42 = vand.u32 2147483647, %v1878_v2  ;;  %vm1884_vm14 = vweird.f32 %v1878_v2 }
 0xcdc   :  { %3793 = vtanh.f32 %v2613_v40 }
 0xcdd   :  { %v1891_v52 = vor.u32 1.1754944e-38, %v1890_v8  ;;  %vm1889_vm1 = vcmp.eq.f32.partialorder %v1888_v42, 8.507059e+37  ;;  %v2838_v8 = vrot.slane %v5235_v24, 2 }
 0xce1   :  { %v3792_v13 = vpop.eup %3791 }
 0xce2   :  { %v1880_v45 = vmul.f32 %v3792_v13, %v1878_v2  ;;  %vm1885_vm13 = vweird.f32 %v3792_v13  ;;  %v3217_v2 = vadd.f32 %v3216_v61, %v3215_v54  ;;  %v3794_v15 = vpop.eup %3793 }
 0xce3   :  { %vm1886_vm15 = vmor %vm1884_vm14, %vm1885_vm13 }
 0xce4   :  { %v1881_v41 = vsub.f32 1.0, %v1880_v45  ;;  %v3218_v23 = vrot.slane %v3217_v2, 1 }
 0xce5   :  { %v2068_v31 = vpop.permute.xlu1 %2067 }
 0xce6   :  { %v2076_v22 = vmul.f32 %v2068_v31, %v4852_v47  ;;  %v1882_v33 = vmul.f32 %v3792_v13, %v1881_v41  ;;  %v2091_v47 = vadd.f32 %v2090_v1, %v2089_v7  ;;  %v3211_v41 = vrot.slane %v3210_v34, 1 }
 0xce7   :  { %v3219_v49 = vadd.f32 %v3218_v23, %v3217_v2  ;;  %v3221_v1 = vrot.slane %v5235_v24, 5 }
 0xce8   :  { %v2078_v27 = vsel %vm223_vm0, %v2076_v22, 0.0  ;;  %v1883_v37 = vadd.f32 %v3792_v13, %v1882_v33  ;;  %v2097_v16 = vmul.f32 %v2093_v3, %v2091_v47  ;;  %v2616_v22 = vmul.f32 %v3794_v15, %v5175_v14 }
 0xce9   :  { %v2079_v17 = vrot.slane %v2078_v27, 4  ;;  %v3212_v33 = vadd.f32 %v3211_v41, %v3210_v34 }
 0xcea   :  { %v1887_v32 = vsel %vm1886_vm15, %v3792_v13, %v1883_v37  ;;  %v2100_v59 = vrot.slane %v2097_v16, 7  ;;  %v2839_v13 = vrot.slane %v5235_v24, 3  ;;  %v5280_v37 = vld [vmem:[#allocation4] ss:$0 sm:$0xff] }
 0xceb   :  { %v2080_v28 = vadd.f32 %v2079_v17, %v2078_v27  ;;  %v1892_v60 = vsel %vm1889_vm1, %v1891_v52, %v1887_v32  ;;  %v5278_v27 = vld [vmem:[#allocation3] ss:$0 sm:$0xff]  ;;  %v3225_v17 = vmul.f32 %v3221_v1, %v3219_v49  ;;  %v2617_v52 = vsel %vm1332_vm12, %v2616_v22, 0.0 }
 0xcec   :  { %3404 = vrot.lane.b32.xlu0 %v1892_v60, %s3956_s9  ;;  %v5510_v60 = vld [vmem:[#allocation42_spill] sm:$0xff]  ;;  %v1093_v56 = vmul.f32 %v5280_v37, %v5511_v35 }
 0xced   :  { %v2081_v25 = vrot.slane %v2080_v28, 2  ;;  %v2814_v39 = vpop.permute.xlu1 %2813  ;;  %v1087_v47 = vmul.f32 %v5278_v27, %v5510_v60  ;;  %v3228_v48 = vrot.slane %v3225_v17, 7  ;;  %v1094_v60 = vmul.f32 %v5280_v37, %v4320_v30 }
 0xcee   :  { %v2822_v4 = vmul.f32 %v2814_v39, %v5073_v18  ;;  %v3354_v18 = vrot.slane %v5223_v5, 6  ;;  %v2843_v5 = vmul.f32 %v2839_v13, %v2837_v55 }
 0xcef   :  { %v2082_v46 = vadd.f32 %v2081_v25, %v2080_v28  ;;  %v3224_v28 = vmul.f32 %v3220_v10, %v3212_v33  ;;  %v5292_v39 = vadd.f32 %v1093_v56, %v1087_v47 }
 0xcf0   :  { %v2824_v63 = vsel %vm223_vm0, %v2822_v4, 0.0  ;;  %v3376_v6 = vadd.f32 %v3375_v57, %v3354_v18  ;;  %v2846_v62 = vrot.slane %v2843_v5, 7 }
 0xcf1   :  { %v2083_v0 = vrot.slane %v2082_v46, 1  ;;  %v2825_v53 = vrot.slane %v2824_v63, 4  ;;  %v3229_v24 = vsel %vm1329_vm11, %v3228_v48, %v3224_v28  ;;  %v1725_v40 = vrot.slane %v5292_v39, 4 }
 0xcf2   :  { %3795 = vtanh.f32 %v3376_v6  ;;  %v3231_v3 = vsel %vm1332_vm12, %v3229_v24, 0.0  ;;  %v1088_v28 = vmul.f32 %v5278_v27, %v4317_v29  ;;  %v2106_v47 = vrot.slane %v5292_v39, 6 }
 0xcf3   :  { %v2084_v43 = vadd.f32 %v2083_v0, %v2082_v46  ;;  %v2826_v26 = vadd.f32 %v2825_v53, %v2824_v63  ;;  %v1727_v61 = vadd.f32 %v1725_v40, %v5249_v12 }
 0xcf4   :  { %v1096_v35 = vadd.f32 %v1094_v60, %v1088_v28 }
 0xcf5   :  { %v2827_v50 = vrot.slane %v2826_v26, 2  ;;  %v2096_v36 = vmul.f32 %v2092_v20, %v2084_v43  ;;  %v3594_v46 = vmul.f32 -1.442695, %v1727_v61 }
 0xcf6   :  { %v3234_v30 = vrot.slane %v1096_v35, 4 }
 0xcf7   :  { %v2828_v45 = vadd.f32 %v2827_v50, %v2826_v26  ;;  %v2101_v7 = vsel %vm1329_vm11, %v2100_v59, %v2096_v36  ;;  %3797 = vpow2.f32 %v3594_v46 }
 0xcf8   :  { %v2103_v21 = vsel %vm1332_vm12, %v2101_v7, 0.0  ;;  %v3796_v54 = vpop.eup %3795 }
 0xcf9   :  { %v2829_v51 = vrot.slane %v2828_v45, 1  ;;  %2104 = vadd.xlane.f32.xlu2 %v2103_v21  ;;  %v3379_v25 = vmul.f32 %v3796_v54, %v5175_v14 }
 0xcfb   :  { %v2830_v31 = vadd.f32 %v2829_v51, %v2828_v45  ;;  %v3380_v4 = vsel %vm1332_vm12, %v3379_v25, 0.0 }
 0xcfd   :  { %v2842_v42 = vmul.f32 %v2838_v8, %v2830_v31  ;;  %v3798_v14 = vpop.eup %3797 }
 0xcfe   :  { %v1731_v11 = vadd.f32 1.0, %v3798_v14 }
 0xcff   :  { %v2847_v44 = vsel %vm1329_vm11, %v2846_v62, %v2842_v42 }
 0xd00   :  { %v2849_v32 = vsel %vm1332_vm12, %v2847_v44, 0.0  ;;  %v1743_v5 = vand.u32 2147483648, %v1731_v11  ;;  %vm1737_vm6 = vweird.f32 %v1731_v11  ;;  %v1741_v49 = vand.u32 2147483647, %v1731_v11 }
 0xd01   :  { %2618 = vadd.xlane.f32.xlu2 %v2617_v52  ;;  %2850 = vadd.xlane.f32.xlu1 %v2849_v32 }
 0xd02   :  { %v1744_v8 = vor.u32 1.1754944e-38, %v1743_v5  ;;  %vm1742_vm8 = vcmp.eq.f32.partialorder %v1741_v49, 8.507059e+37 }
 0xd09   :  { %3381 = vadd.xlane.f32.xlu1 %v3380_v4  ;;  %3232 = vadd.xlane.f32.xlu2 %v3231_v3  ;;  %v2853_v4 = vrot.slane %v1096_v35, 2 }
 0xd18   :  { %v2252_v63 = vpop.xlane.xlu1 %2251 }
 0xd19   :  { %v2253_v16 = vadd.f32 %v5251_v58, %v2252_v63 }
 0xd1b   :  { %v3605_v38 = vmul.f32 -1.442695, %v2253_v16 }
 0xd1d   :  { %3799 = vpow2.f32 %v3605_v38 }
 0xd1e   :  { %3801 = vrcp.f32 %v1731_v11 }
 0xd21   :  { %v5299_v0 = vpop.xlane.xlu0 %2471 }
 0xd22   :  { %v2473_v24 = vadd.f32 %v5299_v0, %v1096_v35 }
 0xd23   :  { %v3800_v53 = vpop.eup %3799 }
 0xd24   :  { %v2257_v20 = vadd.f32 1.0, %v3800_v53  ;;  %v3802_v2 = vpop.eup %3801  ;;  %v3608_v3 = vmul.f32 -1.442695, %v2473_v24 }
 0xd25   :  { %v1733_v12 = vmul.f32 %v3802_v2, %v1731_v11  ;;  %vm1738_vm5 = vweird.f32 %v3802_v2 }
 0xd26   :  { %3803 = vrcp.f32 %v2257_v20  ;;  %v2269_v50 = vand.u32 2147483648, %v2257_v20  ;;  %v2267_v13 = vand.u32 2147483647, %v2257_v20  ;;  %vm2263_vm2 = vweird.f32 %v2257_v20  ;;  %vm1739_vm7 = vmor %vm1737_vm6, %vm1738_vm5 }
 0xd27   :  { %v1734_v34 = vsub.f32 1.0, %v1733_v12 }
 0xd28   :  { %v2270_v7 = vor.u32 1.1754944e-38, %v2269_v50  ;;  %vm2268_vm4 = vcmp.eq.f32.partialorder %v2267_v13, 8.507059e+37 }
 0xd29   :  { %v3001_v43 = vpop.xlane.xlu0 %3000  ;;  %v1735_v23 = vmul.f32 %v3802_v2, %v1734_v34 }
 0xd2a   :  { %v3002_v26 = vadd.f32 %v5251_v58, %v3001_v43 }
 0xd2b   :  { %v1736_v51 = vadd.f32 %v3802_v2, %v1735_v23 }
 0xd2c   :  { %v3804_v18 = vpop.eup %3803  ;;  %v3619_v57 = vmul.f32 -1.442695, %v3002_v26 }
 0xd2d   :  { %v2259_v59 = vmul.f32 %v3804_v18, %v2257_v20  ;;  %vm2264_vm0 = vweird.f32 %v3804_v18  ;;  %v1740_v31 = vsel %vm1739_vm7, %v3802_v2, %v1736_v51 }
 0xd2e   :  { %3805 = vpow2.f32 %v3619_v57  ;;  %vm2265_vm3 = vmor %vm2263_vm2, %vm2264_vm0  ;;  %v1745_v33 = vsel %vm1742_vm8, %v1744_v8, %v1740_v31 }
 0xd2f   :  { %v2260_v55 = vsub.f32 1.0, %v2259_v59 }
 0xd31   :  { %v2261_v36 = vmul.f32 %v3804_v18, %v2260_v55 }
 0xd33   :  { %v2262_v6 = vadd.f32 %v3804_v18, %v2261_v36 }
 0xd34   :  { %v3806_v45 = vpop.eup %3805 }
 0xd35   :  { %v3006_v21 = vadd.f32 1.0, %v3806_v45  ;;  %v2266_v15 = vsel %vm2265_vm3, %v3804_v18, %v2262_v6 }
 0xd36   :  { %v2271_v41 = vsel %vm2268_vm4, %v2270_v7, %v2266_v15 }
 0xd37   :  { %3807 = vrcp.f32 %v3006_v21  ;;  %3408 = vrot.lane.b32.xlu2 %v2271_v41, %s3957_s3  ;;  %v3018_v1 = vand.u32 2147483648, %v3006_v21  ;;  %v3016_v10 = vand.u32 2147483647, %v3006_v21  ;;  %vm3012_vm10 = vweird.f32 %v3006_v21 }
 0xd39   :  { %v3019_v52 = vor.u32 1.1754944e-38, %v3018_v1  ;;  %vm3017_vm12 = vcmp.eq.f32.partialorder %v3016_v10, 8.507059e+37 }
 0xd3d   :  { %v3808_v22 = vpop.eup %3807 }
 0xd3e   :  { %v3008_v42 = vmul.f32 %v3808_v22, %v3006_v21  ;;  %vm3013_vm9 = vweird.f32 %v3808_v22 }
 0xd3f   :  { %3436 = vrot.lane.b32.xlu2 %v1745_v33, %s3956_s9  ;;  %vm3014_vm11 = vmor %vm3012_vm10, %vm3013_vm9 }
 0xd40   :  { %v3009_v62 = vsub.f32 1.0, %v3008_v42 }
 0xd42   :  { %v3010_v44 = vmul.f32 %v3808_v22, %v3009_v62 }
 0xd44   :  { %v3011_v17 = vadd.f32 %v3808_v22, %v3010_v44 }
 0xd46   :  { %v3015_v32 = vsel %vm3014_vm11, %v3808_v22, %v3011_v17 }
 0xd47   :  { %v3020_v54 = vsel %vm3017_vm12, %v3019_v52, %v3015_v32 }
 0xd48   :  { %3416 = vrot.lane.b32.xlu0 %v3020_v54, %s3958_s8 }
 0xd6c   :  { %v2105_v56 = vpop.xlane.xlu2 %2104 }
 0xd6d   :  { %v2108_v48 = vadd.f32 %v2106_v47, %v2105_v56 }
 0xd6f   :  { %v3601_v25 = vmul.f32 -1.442695, %v2108_v48 }
 0xd71   :  { %3809 = vpow2.f32 %v3601_v25 }
 0xd72   :  { %3811 = vpow2.f32 %v3608_v3 }
 0xd74   :  { %v2851_v40 = vpop.xlane.xlu1 %2850  ;;  %v2619_v61 = vpop.xlane.xlu2 %2618 }
 0xd75   :  { %v2855_v46 = vadd.f32 %v2853_v4, %v2851_v40  ;;  %v2620_v63 = vadd.f32 %v5251_v58, %v2619_v61 }
 0xd77   :  { %v3615_v29 = vmul.f32 -1.442695, %v2855_v46  ;;  %v3612_v27 = vmul.f32 -1.442695, %v2620_v63  ;;  %v3810_v16 = vpop.eup %3809 }
 0xd78   :  { %v5312_v37 = vadd.f32 1.0, %v3810_v16  ;;  %v3812_v53 = vpop.eup %3811 }
 0xd79   :  { %3813 = vpow2.f32 %v3615_v29  ;;  %v5316_v18 = vadd.f32 1.0, %v3812_v53 }
 0xd7a   :  { %3815 = vpow2.f32 %v3612_v27  ;;  %vm2118_vm7 = vweird.f32 %v5312_v37  ;;  %v2124_v46 = vand.u32 2147483648, %v5312_v37  ;;  %v2122_v27 = vand.u32 2147483647, %v5312_v37 }
 0xd7b   :  { %3817 = vrcp.f32 %v5312_v37 }
 0xd7c   :  { %v3382_v14 = vpop.xlane.xlu1 %3381  ;;  %v3233_v38 = vpop.xlane.xlu2 %3232  ;;  %v2125_v53 = vor.u32 1.1754944e-38, %v2124_v46  ;;  %vm2123_vm12 = vcmp.eq.f32.partialorder %v2122_v27, 8.507059e+37 }
 0xd7d   :  { %v3383_v11 = vadd.f32 %v5251_v58, %v3382_v14  ;;  %v3236_v0 = vadd.f32 %v3234_v30, %v3233_v38 }
 0xd7f   :  { %v3814_v20 = vpop.eup %3813  ;;  %v3626_v2 = vmul.f32 -1.442695, %v3383_v11  ;;  %v3622_v43 = vmul.f32 -1.442695, %v3236_v0 }
 0xd80   :  { %v2859_v26 = vadd.f32 1.0, %v3814_v20  ;;  %v3816_v12 = vpop.eup %3815 }
 0xd81   :  { %3819 = vpow2.f32 %v3626_v2  ;;  %v2624_v57 = vadd.f32 1.0, %v3816_v12  ;;  %v5318_v59 = vpop.eup %3817  ;;  %v2489_v2 = vand.u32 2147483648, %v5316_v18 }
 0xd82   :  { %3821 = vrcp.f32 %v2859_v26  ;;  %v2114_v36 = vmul.f32 %v5318_v59, %v5312_v37  ;;  %v2869_v41 = vand.u32 2147483647, %v2859_v26  ;;  %v2871_v51 = vand.u32 2147483648, %v2859_v26 }
 0xd83   :  { %3823 = vpow2.f32 %v3622_v43  ;;  %vm2865_vm14 = vweird.f32 %v2859_v26  ;;  %v2636_v8 = vand.u32 2147483648, %v2624_v57  ;;  %v2634_v62 = vand.u32 2147483647, %v2624_v57 }
 0xd84   :  { %3825 = vrcp.f32 %v2624_v57  ;;  %v2115_v5 = vsub.f32 1.0, %v2114_v36  ;;  %vm2870_vm0 = vcmp.eq.f32.partialorder %v2869_v41, 8.507059e+37  ;;  %v2872_v44 = vor.u32 1.1754944e-38, %v2871_v51 }
 0xd85   :  { %3827 = vrcp.f32 %v5316_v18  ;;  %vm2630_vm2 = vweird.f32 %v2624_v57  ;;  %v2637_v60 = vor.u32 1.1754944e-38, %v2636_v8  ;;  %vm2635_vm4 = vcmp.eq.f32.partialorder %v2634_v62, 8.507059e+37 }
 0xd86   :  { %v2116_v10 = vmul.f32 %v5318_v59, %v2115_v5  ;;  %vm2119_vm5 = vweird.f32 %v5318_v59  ;;  %v2487_v43 = vand.u32 2147483647, %v5316_v18 }
 0xd87   :  { %v3820_v55 = vpop.eup %3819  ;;  %vm5345_vm9 = vmor %vm2118_vm7, %vm2119_vm5 }
 0xd88   :  { %v3822_v34 = vpop.eup %3821  ;;  %v5321_v50 = vadd.f32 1.0, %v3820_v55  ;;  %v2117_v4 = vadd.f32 %v5318_v59, %v2116_v10  ;;  %v2490_v55 = vor.u32 1.1754944e-38, %v2489_v2 }
 0xd89   :  { %v3824_v13 = vpop.eup %3823  ;;  %v2861_v6 = vmul.f32 %v3822_v34, %v2859_v26  ;;  %vm2866_vm13 = vweird.f32 %v3822_v34 }
 0xd8a   :  { %v3826_v23 = vpop.eup %3825  ;;  %3829 = vrcp.f32 %v5321_v50  ;;  %v5326_v45 = vadd.f32 1.0, %v3824_v13  ;;  %vm2867_vm1 = vmor %vm2865_vm14, %vm2866_vm13  ;;  %v3399_v24 = vand.u32 2147483648, %v5321_v50  ;;  %v3397_v40 = vand.u32 2147483647, %v5321_v50 }
 0xd8b   :  { %v5328_v7 = vpop.eup %3827  ;;  %v2862_v21 = vsub.f32 1.0, %v2861_v6  ;;  %v2626_v15 = vmul.f32 %v3826_v23, %v2624_v57  ;;  %vm2631_vm15 = vweird.f32 %v3826_v23  ;;  %vm3393_vm8 = vweird.f32 %v5321_v50 }
 0xd8c   :  { %3831 = vrcp.f32 %v5326_v45  ;;  %v2479_v22 = vmul.f32 %v5328_v7, %v5316_v18  ;;  %vm2632_vm3 = vmor %vm2630_vm2, %vm2631_vm15  ;;  %v3400_v30 = vor.u32 1.1754944e-38, %v3399_v24  ;;  %vm3398_vm11 = vcmp.eq.f32.partialorder %v3397_v40, 8.507059e+37 }
 0xd8d   :  { %v2863_v49 = vmul.f32 %v3822_v34, %v2862_v21  ;;  %v2627_v31 = vsub.f32 1.0, %v2626_v15  ;;  %v2121_v38 = vsel %vm5345_vm9, %v5318_v59, %v2117_v4  ;;  %vm2484_vm13 = vweird.f32 %v5328_v7 }
 0xd8e   :  { %v2480_v47 = vsub.f32 1.0, %v2479_v22  ;;  %v2126_v37 = vsel %vm2123_vm12, %v2125_v53, %v2121_v38  ;;  %vm2483_vm14 = vweird.f32 %v5316_v18  ;;  %v3252_v12 = vand.u32 2147483648, %v5326_v45 }
 0xd8f   :  { %v2864_v33 = vadd.f32 %v3822_v34, %v2863_v49  ;;  %v2628_v42 = vmul.f32 %v3826_v23, %v2627_v31  ;;  %v3250_v59 = vand.u32 2147483647, %v5326_v45  ;;  %v1493_v13 = vadd.f32 %v5251_v58, %v5208_v19  ;;  %v3405_v19 = vpop.permute.xlu0 %3404 }
 0xd90   :  { %v3830_v1 = vpop.eup %3829  ;;  %v2481_v16 = vmul.f32 %v5328_v7, %v2480_v47  ;;  %v3253_v36 = vor.u32 1.1754944e-38, %v3252_v12  ;;  %vm3429_vm12 = vcmask 31744  }
 0xd91   :  { %v2868_v17 = vsel %vm2867_vm1, %v3822_v34, %v2864_v33  ;;  %v2629_v52 = vadd.f32 %v3826_v23, %v2628_v42  ;;  %v3389_v32 = vmul.f32 %v3830_v1, %v5321_v50  ;;  %vm3394_vm6 = vweird.f32 %v3830_v1  ;;  %vm2485_vm1 = vmor %vm2483_vm14, %vm2484_vm13  ;;  %v3409_v62 = vpop.permute.xlu2 %3408 }
 0xd92   :  { %v3832_v54 = vpop.eup %3831  ;;  %v2873_v28 = vsel %vm2870_vm0, %v2872_v44, %v2868_v17  ;;  %vm3395_vm10 = vmor %vm3393_vm8, %vm3394_vm6  ;;  %v2482_v20 = vadd.f32 %v5328_v7, %v2481_v16  ;;  %vm3246_vm0 = vweird.f32 %v5326_v45  ;;  %v3591_v6 = vmul.f32 -1.442695, %v1493_v13 }
 0xd93   :  { %3448 = vrot.lane.b32.xlu2 %v2873_v28, %s3958_s8  ;;  %v2633_v35 = vsel %vm2632_vm3, %v3826_v23, %v2629_v52  ;;  %v3390_v56 = vsub.f32 1.0, %v3389_v32  ;;  %v3242_v48 = vmul.f32 %v3832_v54, %v5326_v45  ;;  %vm3247_vm15 = vweird.f32 %v3832_v54 }
 0xd94   :  { %v2638_v25 = vsel %vm2635_vm4, %v2637_v60, %v2633_v35  ;;  %v2486_v57 = vsel %vm2485_vm1, %v5328_v7, %v2482_v20  ;;  %vm3248_vm2 = vmor %vm3246_vm0, %vm3247_vm15  ;;  %vm2488_vm3 = vcmp.eq.f32.partialorder %v2487_v43, 8.507059e+37  ;;  %vm3251_vm4 = vcmp.eq.f32.partialorder %v3250_v59, 8.507059e+37 }
 0xd95   :  { %3412 = vrot.lane.b32.xlu1 %v2638_v25, %s3959_s17  ;;  %v3391_v3 = vmul.f32 %v3830_v1, %v3390_v56  ;;  %v3243_v61 = vsub.f32 1.0, %v3242_v48  ;;  %v2491_v50 = vsel %vm2488_vm3, %v2490_v55, %v2486_v57  ;;  %3833 = vpow2.f32 %v3591_v6 }
 0xd96   :  { %v1337_v23 = vrot.slane %v5292_v39, 2  ;;  %vm3423_vm8 = vcmask 7168   ;;  %vm3431_vm13 = vcmask 39936   ;;  %vm3433_vm15 = vcmask 41984  }
 0xd97   :  { %v3392_v63 = vadd.f32 %v3830_v1, %v3391_v3  ;;  %v3244_v11 = vmul.f32 %v3832_v54, %v3243_v61 }
 0xd98   :  { %v1339_v45 = vadd.f32 %v1337_v23, %v5247_v9 }
 0xd99   :  { %v3396_v14 = vsel %vm3395_vm10, %v3830_v1, %v3392_v63  ;;  %v3245_v26 = vadd.f32 %v3832_v54, %v3244_v11  ;;  %vm3425_vm10 = vcmask 15360   ;;  %v3437_v24 = vpop.permute.xlu2 %3436 }
 0xd9a   :  { %v3401_v0 = vsel %vm3398_vm11, %v3400_v30, %v3396_v14  ;;  %v3587_v21 = vmul.f32 -1.442695, %v1339_v45  ;;  %vm3427_vm11 = vcmask 23552  }
 0xd9b   :  { %3420 = vrot.lane.b32.xlu0 %v3401_v0, %s3960_s14  ;;  %v3249_v34 = vsel %vm3248_vm2, %v3832_v54, %v3245_v26  ;;  %v3834_v7 = vpop.eup %3833 }
 0xd9c   :  { %v3254_v18 = vsel %vm3251_vm4, %v3253_v36, %v3249_v34  ;;  %v1497_v15 = vadd.f32 1.0, %v3834_v7  ;;  %3835 = vpow2.f32 %v3587_v21 }
 0xd9d   :  { %3440 = vrot.lane.b32.xlu1 %v2126_v37, %s3957_s3 }
 0xd9e   :  { %3837 = vrcp.f32 %v1497_v15  ;;  %v1509_v39 = vand.u32 2147483648, %v1497_v15  ;;  %vm1503_vm6 = vweird.f32 %v1497_v15  ;;  %v1507_v9 = vand.u32 2147483647, %v1497_v15 }
 0xda0   :  { %v1510_v44 = vor.u32 1.1754944e-38, %v1509_v39  ;;  %vm1508_vm9 = vcmp.eq.f32.partialorder %v1507_v9, 8.507059e+37 }
 0xda2   :  { %v3836_v41 = vpop.eup %3835 }
 0xda3   :  { %3444 = vrot.lane.b32.xlu0 %v2491_v50, %s3959_s17  ;;  %v1343_v5 = vadd.f32 1.0, %v3836_v41 }
 0xda4   :  { %v3838_v51 = vpop.eup %3837 }
 0xda5   :  { %3452 = vrot.lane.b32.xlu1 %v3254_v18, %s3960_s14  ;;  %v1499_v49 = vmul.f32 %v3838_v51, %v1497_v15  ;;  %3839 = vrcp.f32 %v1343_v5  ;;  %vm1504_vm5 = vweird.f32 %v3838_v51  ;;  %v1355_v35 = vand.u32 2147483648, %v1343_v5 }
 0xda6   :  { %vm1505_vm7 = vmor %vm1503_vm6, %vm1504_vm5  ;;  %vm1349_vm1 = vweird.f32 %v1343_v5  ;;  %v1353_v25 = vand.u32 2147483647, %v1343_v5 }
 0xda7   :  { %v1500_v31 = vsub.f32 1.0, %v1499_v49 }
 0xda9   :  { %v1501_v8 = vmul.f32 %v3838_v51, %v1500_v31 }
 0xdab   :  { %v3840_v22 = vpop.eup %3839  ;;  %v1502_v58 = vadd.f32 %v3838_v51, %v1501_v8 }
 0xdac   :  { %v1345_v33 = vmul.f32 %v3840_v22, %v1343_v5  ;;  %vm1350_vm14 = vweird.f32 %v3840_v22 }
 0xdad   :  { %v1506_v42 = vsel %vm1505_vm7, %v3838_v51, %v1502_v58  ;;  %vm5378_vm0 = vmor %vm1349_vm1, %vm1350_vm14 }
 0xdae   :  { %v1346_v1 = vsub.f32 1.0, %v1345_v33  ;;  %v1511_v17 = vsel %vm1508_vm9, %v1510_v44, %v1506_v42 }
 0xdaf   :  { %v3424_v32 = vsel %vm3423_vm8, %v1511_v17, %v3405_v19 }
 0xdb0   :  { %v1347_v54 = vmul.f32 %v3840_v22, %v1346_v1  ;;  %v3426_v28 = vsel %vm3425_vm10, %v3424_v32, %v3409_v62 }
 0xdb2   :  { %v1348_v47 = vadd.f32 %v3840_v22, %v1347_v54 }
 0xdb4   :  { %v1352_v61 = vsel %vm5378_vm0, %v3840_v22, %v1348_v47 }
 0xdba   :  { %v3417_v10 = vpop.permute.xlu0 %3416 }
 0xe07   :  { %v3413_v52 = vpop.permute.xlu1 %3412 }
 0xe08   :  { %v3428_v60 = vsel %vm3427_vm11, %v3426_v28, %v3413_v52 }
 0xe09   :  { %v3430_v48 = vsel %vm3429_vm12, %v3428_v60, %v3417_v10 }
 0xe0d   :  { %v3421_v56 = vpop.permute.xlu0 %3420 }
 0xe0e   :  { %v3432_v4 = vsel %vm3431_vm13, %v3430_v48, %v3421_v56 }
 0xe0f   :  { %v3441_v40 = vpop.permute.xlu1 %3440  ;;  %3434 = vst.msk [vmem:[#allocation5] sm:$0x3] %vm3433_vm15, %v3432_v4 }
 0xe10   :  { %3875 = shalt.err (!%p3872_p4)
}
 0xe11   :  { %3471 = dma.vmem_to_hbm [thread:$0]  %s3467_s24, 32, %s3469_s30, [#allocation6]   ;;  %v1356_v46 = vor.u32 1.1754944e-38, %v1355_v35  ;;  %vm1354_vm2 = vcmp.eq.f32.partialorder %v1353_v25, 8.507059e+37  ;;  %v3449_v30 = vpop.permute.xlu2 %3448 }
 0xe12   :  { %s3962_s27 = smov [#allocation7]   ;;  %s3479_s28 = sshll.u32 %s4199_s5, 4  ;;  %s3480_s28 = int_to_ptr.hbm [resolvable:$true] %s3479_s28 }
 0xe13   :  { %v1357_v63 = vsel %vm1354_vm2, %v1356_v46, %v1352_v61  ;;  %s3477_s1 = sshll.u32 %s3962_s27, 4  ;;  %s3888_s4 = sshra.s32 %s3480_s28, 4  ;;  %s3478_s1 = int_to_ptr.vmem [resolvable:$true] %s3477_s1  ;;  %s3889_s4 = int_to_ptr.hbm [resolvable:$true] %s3888_s4 }
 0xe14   :  { %v3455_v29 = vsel %vm3423_vm8, %v1357_v63, %v3437_v24  ;;  %s3890_s2 = scalar_lea.hbm %s3889_s4, 2  ;;  %s3892_s10 = scalar_lea.hbm %s4199_s5, 2 }
 0xe15   :  { %v3456_v27 = vsel %vm3425_vm10, %v3455_v29, %v3441_v40  ;;  %v3445_v16 = vpop.permute.xlu0 %3444  ;;  %p3891_p5 = scmp.ne.s32.totalorder %s3889_s4, %s3890_s2  ;;  %p3893_p6 = scmp.lt.s32.totalorder %s3889_s4, %s4199_s5 }
 0xe16   :  { %v3457_v14 = vsel %vm3427_vm11, %v3456_v27, %v3445_v16  ;;  %p3894_p7 = scmp.lt.s32.totalorder %s3892_s10, %s3890_s2 }
 0xe17   :  { %v3453_v38 = vpop.permute.xlu1 %3452  ;;  %v3458_v11 = vsel %vm3429_vm12, %v3457_v14, %v3449_v30 }
 0xe18   :  { %v3459_v0 = vsel %vm3431_vm13, %v3458_v11, %v3453_v38  ;;  %p3895_p8 = por %p3894_p7, %p3893_p6 }
 0xe19   :  { %3460 = vst.msk [vmem:[#allocation7] sm:$0x3] %vm3433_vm15, %v3459_v0 }
 0xe1a   :  { %p3896_p9 = pnand %p3895_p8, %p3891_p5 }
 0xe1c   :  { %3899 = shalt.err (!%p3896_p9)
}
 0xe1d   :  { %3482 = dma.vmem_to_hbm [thread:$0]  %s3478_s1, 32, %s3480_s28, [#allocation8]  }
 0xe1e   :  { %3900 = dma.done.wait [#allocation6], 32  }
 0xe1f   :  { %3901 = vsyncadd [#allocation6], 4294967264 }
 0xe20   :  { %3902 = dma.done.wait [#allocation8], 32  }
 0xe21   :  { %3903 = vsyncadd [#allocation8], 4294967264 }
 0xe22   :  { %3491 = vsyncpa [#allocation6], 1 }
 0xe23   :  { %3492 = vsyncpa [#allocation8], 1 }

</bundles_post_ra>
